<compile_context>
chip_gen: v7x
topology: tpu7x:2x2x1
jax: 0.10.0
libtpu: 0.0.40
codegen_flags: <defaults>
</compile_context>

<pallas_src>
import functools

import jax
import jax.numpy as jnp
from jax.experimental import pallas as pl
from jax.experimental.pallas import tpu as pltpu

# ----- model hyper-parameters (ParticleNetFL defaults, small synthetic sizes) ---
B = 2               # batch
P = 16              # points per instance
PT_DIMS = 2         # coordinate dims (eta, phi)
FT_DIMS = 4         # input feature channels
NUM_CLASSES = 5
CONV_PARAMS = [(7, (32, 32, 32)), (7, (64, 64, 64))]
FC_PARAMS = [(128, 0.1)]
FUSION_IN = sum(c[-1] for _, c in CONV_PARAMS)                    # 96
FUSION_OUT = int(min(max(FUSION_IN // 128 * 128, 128), 1024))     # 128
BN_EPS = 1e-5

# knn score constants (all finite: never produce inf/NaN so the mantissa-bit
# index embedding stays a valid float ordering)
NEG_SELF = -1.0e38       # self excluded (reference drops the top-1 == self)
NEG_MASKED = -1.0e12     # masked columns ranked last (== coord_shift ranking)
NEG_REMOVED = -2.0e38    # already-selected columns


def _pad16(c):
    # contraction dims padded to 16 for bf16 (16,128) sublane packing
    return -(-c // 16) * 16


PT_PAD = _pad16(PT_DIMS)     # 16
FT_PAD = _pad16(FT_DIMS)     # 16


# ------------------------------ in-kernel building blocks -----------------------
def _embed_idx(score, idx_lo, keep_mask):
    """Embed the column index in the low mantissa bits of the score.

    Keys become unique per row (ties broken deterministically), ordering of
    scores that differ after clearing the low bits is preserved, so a single
    jnp.max + equality compare yields a valid one-hot argmax.
    """
    bits = pltpu.bitcast(score, jnp.int32)
    bits = jnp.bitwise_or(jnp.bitwise_and(bits, keep_mask), idx_lo)
    return pltpu.bitcast(bits, jnp.float32)


def _edge_conv(x, base, mask, p, k, c1,
               score_bias, idx_lo, keep_mask, removed_keys,
               wcat, b1, bsc, w1d, w2, b2, w3, b3):
    """One EdgeConvBlock on a single instance.

    x    : (P, Cin) point features   base : (P, D) knn coordinates
    mask : (P, 1)
    wcat = [w1_centre - w1_diff | w_shortcut] (BN folded, bf16); w3/b3 carry the
    1/k of the neighbour mean.
    """
    f32 = jnp.float32
    bf16 = jnp.bfloat16

    # --- knn (f32): score[i,j] = -||b_i - b_j||^2 up to a per-row constant ------
    two_inner = 2.0 * jax.lax.dot_general(
        base, base, (((1,), (1,)), ((), ())), preferred_element_type=f32)
    xx_j = jax.lax.dot_general(
        jnp.ones_like(base), base * base, (((1,), (1,)), ((), ())),
        preferred_element_type=f32)
    keys = _embed_idx(two_inner - xx_j + score_bias, idx_lo, keep_mask)   # (P,P)

    # k argmax passes, ONE cross-lane reduction each (keys unique per row)
    sels = []
    for _ in range(k):
        rowmax = jnp.max(keys, axis=1, keepdims=True)
        onehot = (keys == rowmax).astype(f32)
        sels.append(onehot)
        keys = jnp.where(onehot > 0.0, removed_keys, keys)
    sel = jnp.concatenate(sels, axis=0).astype(bf16)                      # (kP,P)

    # --- edge features + 3-layer 1x1-conv MLP (bf16 MXU, f32 accumulate) --------
    xb = x.astype(bf16)
    nbr = jnp.dot(sel, xb, preferred_element_type=f32)                    # gather
    xw = jnp.dot(xb, wcat, preferred_element_type=f32)                    # (P, C1+Cout)
    cx = xw[:, :c1] + b1          # centre half, layer-1 weight already Wc - Wd
    sc = xw[:, c1:] + bsc         # shortcut Conv1d + BN (folded)
    cxt = jnp.concatenate([cx] * k, axis=0)                               # (kP, C1)
    h = jnp.maximum(cxt + jnp.dot(nbr.astype(bf16), w1d,
                                  preferred_element_type=f32), 0.0)
    h = jnp.maximum(jnp.dot(h.astype(bf16), w2, preferred_element_type=f32) + b2, 0.0)
    h = jnp.maximum(jnp.dot(h.astype(bf16), w3, preferred_element_type=f32) + b3, 0.0)

    # mean over the k neighbours (1/k folded into w3/b3): sum the k slot slabs
    agg = h[0:p, :]
    for m in range(1, k):
        agg = agg + h[m * p:(m + 1) * p, :]

    return jnp.maximum(sc + agg, 0.0) * mask


def _particlenet_kernel(p,
                        pts_ref, fts_ref, maskc_ref, maskr_ref,
                        bnf_s, bnf_b,
                        wcat1, b11, bsc1, w1d1, w21, b21, w31, b31,
                        wcat2, b12, bsc2, w1d2, w22, b22, w32, b32,
                        wfa, wfb, bf, wfc1, bfc1, wfc2, bfc2,
                        out_ref):
    f32 = jnp.float32
    bf16 = jnp.bfloat16
    k1, k2 = CONV_PARAMS[0][0], CONV_PARAMS[1][0]
    c11, c12 = CONV_PARAMS[0][1][0], CONV_PARAMS[1][1][0]

    mask = maskc_ref[...]                                            # (P, 1)
    maskr = maskr_ref[...]                                           # (1, P)
    pts = pts_ref[...] * mask                                        # (P, PT_PAD)
    # use_fts_bn (eval-mode, folded to per-channel affine), then re-mask
    fts0 = (fts_ref[...] * mask * bnf_s[...] + bnf_b[...]) * mask    # (P, FT_PAD)

    # --- shared knn machinery: built once, reused by both EdgeConv blocks ------
    row = jax.lax.broadcasted_iota(jnp.int32, (p, p), 0)
    col = jax.lax.broadcasted_iota(jnp.int32, (p, p), 1)
    nbits = max(1, (p - 1).bit_length())                 # index bits (p<=16 -> 4)
    idx_lo = p - 1 - col                                  # lower col wins ties
    keep_mask = jnp.int32(~((1 << nbits) - 1))
    score_bias = (jnp.where(row == col, NEG_SELF, 0.0).astype(f32)
                  + (1.0 - maskr) * NEG_MASKED)
    removed_keys = _embed_idx(jnp.full((p, p), NEG_REMOVED, f32), idx_lo, keep_mask)

    fts1 = _edge_conv(fts0, pts, mask, p, k1, c11,
                      score_bias, idx_lo, keep_mask, removed_keys,
                      wcat1[...], b11[...], bsc1[...], w1d1[...],
                      w21[...], b21[...], w31[...], b31[...])        # (P, 32)
    fts2 = _edge_conv(fts1, fts1, mask, p, k2, c12,
                      score_bias, idx_lo, keep_mask, removed_keys,
                      wcat2[...], b12[...], bsc2[...], w1d2[...],
                      w22[...], b22[...], w32[...], b32[...])        # (P, 64)

    # fusion block: Conv1d(96->128) + BN (folded) + ReLU, masked; weight split per
    # EdgeConv branch so the channel concat never materialises.
    y = jnp.maximum(jnp.dot(fts1.astype(bf16), wfa[...], preferred_element_type=f32)
                    + jnp.dot(fts2.astype(bf16), wfb[...], preferred_element_type=f32)
                    + bf[...], 0.0) * mask                           # (P, 128)

    # masked mean pooling over the instance's points (use_counts)
    cnt = jnp.maximum(jnp.sum(mask, axis=0, keepdims=True), 1.0)     # (1, 1)
    pooled = jnp.sum(y, axis=0, keepdims=True) / cnt                 # (1, 128)

    # FC head: Linear + ReLU (+ Dropout = identity in eval), Linear -> logits
    h = jnp.maximum(jnp.dot(pooled.astype(bf16), wfc1[...],
                            preferred_element_type=f32) + bfc1[...], 0.0)
    out_ref[...] = jnp.dot(h.astype(bf16), wfc2[...],
                           preferred_element_type=f32) + bfc2[...]


# ------------------------------ Pallas wrapper -----------------------------------
_PARAM_ORDER = (
    'bnf_s', 'bnf_b',
    'wcat1', 'b11', 'bsc1', 'w1d1', 'w21', 'b21', 'w31', 'b31',
    'wcat2', 'b12', 'bsc2', 'w1d2', 'w22', 'b22', 'w32', 'b32',
    'wfa', 'wfb', 'bf', 'wfc1', 'bfc1', 'wfc2', 'bfc2')


def _inst_spec(arr):
    """Per-instance block: leading batch dim squeezed, rest full."""
    zeros = (0,) * (arr.ndim - 1)
    return pl.BlockSpec((None,) + tuple(arr.shape[1:]),
                        lambda b, z=zeros: (b,) + z)


def _full_spec(arr):
    """Full-array block (weights): same block every grid step -> no re-DMA."""
    zeros = (0,) * arr.ndim
    return pl.BlockSpec(tuple(arr.shape), lambda b, z=zeros: z)


def particlenet_fl_forward(points, features, mask, params):
    """points (B, PT_DIMS, P), features (B, FT_DIMS, P), mask (B, 1, P) [NCW]."""
    bsz, _, p = points.shape
    # layout prep only: NCW -> channels-last per instance; pad contraction dims
    pts = jnp.transpose(points, (0, 2, 1))                           # (B, P, PT)
    fts = jnp.transpose(features, (0, 2, 1))                         # (B, P, FT)
    maskc = jnp.transpose(mask, (0, 2, 1))                           # (B, P, 1)
    maskr = mask                                                     # (B, 1, P)
    pts = jnp.pad(pts, ((0, 0), (0, 0), (0, PT_PAD - PT_DIMS)))
    fts = jnp.pad(fts, ((0, 0), (0, 0), (0, FT_PAD - FT_DIMS)))

    weights = tuple(params[name] for name in _PARAM_ORDER)
    args = (pts, fts, maskc, maskr) + weights

    grid_spec = pltpu.PrefetchScalarGridSpec(
        num_scalar_prefetch=0, grid=(bsz,),
        in_specs=[_inst_spec(pts), _inst_spec(fts),
                  _inst_spec(maskc), _inst_spec(maskr)]
                 + [_full_spec(w) for w in weights],
        out_specs=pl.BlockSpec((None, 1, NUM_CLASSES), lambda b: (b, 0, 0)),
    )
    # NOTE: batch axis is "parallel" -> uses both TensorCores on v7x; sequential
    # (and near-free) on v5e/v6e.  If B*P is scaled up, set vmem_limit_bytes and
    # tile the knn query rows as an extra "arbitrary" axis.
    out = pl.pallas_call(
        functools.partial(_particlenet_kernel, p),
        out_shape=jax.ShapeDtypeStruct((bsz, 1, NUM_CLASSES), jnp.float32),
        grid_spec=grid_spec,
        compiler_params=pltpu.CompilerParams(dimension_semantics=("parallel",)),
    )(*args)
    return out.reshape(bsz, NUM_CLASSES)


# ------------------------------ parameter init -----------------------------------
def _fold_bn(key, c):
    """Eval-mode BatchNorm folded to a per-channel (scale, bias)."""
    k1, k2, k3, k4 = jax.random.split(key, 4)
    gamma = jax.random.uniform(k1, (c,), jnp.float32, 0.5, 1.5)
    beta = 0.1 * jax.random.normal(k2, (c,), jnp.float32)
    mean = 0.1 * jax.random.normal(k3, (c,), jnp.float32)
    var = jax.random.uniform(k4, (c,), jnp.float32, 0.5, 1.5)
    scale = gamma / jnp.sqrt(var + BN_EPS)
    bias = beta - mean * scale
    return scale.reshape(1, c), bias.reshape(1, c)


def _pad_rows(w, rows):
    return jnp.pad(w, ((0, rows - w.shape[0]), (0, 0)))


def init_params(key):
    """Random weights with BN folded offline; matmul weights stored in bf16."""
    bf16 = jnp.bfloat16
    prm = {}
    key, sub = jax.random.split(key)
    s, b = _fold_bn(sub, FT_DIMS)
    prm['bnf_s'] = jnp.pad(s, ((0, 0), (0, FT_PAD - FT_DIMS)))
    prm['bnf_b'] = jnp.pad(b, ((0, 0), (0, FT_PAD - FT_DIMS)))

    in_feat = FT_DIMS
    for bix, (k, channels) in enumerate(CONV_PARAMS, start=1):
        cin_pad = _pad16(in_feat)
        cin = 2 * in_feat
        ws, bs = [], []
        for li, cout in enumerate(channels):
            key, kw, kb = jax.random.split(key, 3)
            w = 0.1 * jax.random.normal(kw, (cin, cout), jnp.float32)
            sc_, bb_ = _fold_bn(kb, cout)
            if li == len(channels) - 1:          # fold the 1/k neighbour mean
                sc_, bb_ = sc_ / k, bb_ / k
            ws.append(w * sc_)                    # fold BN scale into the weight
            bs.append(bb_)
            cin = cout
        w1, w2, w3 = ws
        # fold the centre term: tile(x)@Wc + (nbr - tile(x))@Wd == tile(x)@(Wc-Wd) + nbr@Wd
        w1c = w1[:in_feat] - w1[in_feat:]
        w1d = w1[in_feat:]
        # shortcut Conv1d(1x1, no bias) + BN (folded)
        key, kw, kb = jax.random.split(key, 3)
        wsc = 0.1 * jax.random.normal(kw, (in_feat, channels[-1]), jnp.float32)
        ssc, bsc = _fold_bn(kb, channels[-1])
        wsc = wsc * ssc
        # merge the two matmuls that share input x: [w1c | wsc]
        prm[f'wcat{bix}'] = _pad_rows(jnp.concatenate([w1c, wsc], axis=1),
                                      cin_pad).astype(bf16)
        prm[f'b1{bix}'] = bs[0]
        prm[f'bsc{bix}'] = bsc
        prm[f'w1d{bix}'] = _pad_rows(w1d, cin_pad).astype(bf16)
        prm[f'w2{bix}'] = w2.astype(bf16)
        prm[f'b2{bix}'] = bs[1]
        prm[f'w3{bix}'] = w3.astype(bf16)
        prm[f'b3{bix}'] = bs[2]
        in_feat = channels[-1]

    # fusion Conv1d(96 -> 128) + BN (folded), split per EdgeConv branch
    key, kw, kb = jax.random.split(key, 3)
    wf = 0.1 * jax.random.normal(kw, (FUSION_IN, FUSION_OUT), jnp.float32)
    sf, bff = _fold_bn(kb, FUSION_OUT)
    wf = wf * sf
    c_first = CONV_PARAMS[0][1][-1]               # 32 rows come from block 1
    prm['wfa'] = wf[:c_first].astype(bf16)
    prm['wfb'] = wf[c_first:].astype(bf16)
    prm['bf'] = bff

    key, kw, kb = jax.random.split(key, 3)
    prm['wfc1'] = (0.1 * jax.random.normal(
        kw, (FUSION_OUT, FC_PARAMS[0][0]), jnp.float32)).astype(bf16)
    prm['bfc1'] = 0.1 * jax.random.normal(kb, (1, FC_PARAMS[0][0]), jnp.float32)
    key, kw, kb = jax.random.split(key, 3)
    prm['wfc2'] = (0.1 * jax.random.normal(
        kw, (FC_PARAMS[0][0], NUM_CLASSES), jnp.float32)).astype(bf16)
    prm['bfc2'] = 0.1 * jax.random.normal(kb, (1, NUM_CLASSES), jnp.float32)
    return prm


# ------------------------------ main ----------------------------------------------
if __name__ == "__main__":
    key = jax.random.PRNGKey(0)
    kp, kf, kpar = jax.random.split(key, 3)
    points = jax.random.normal(kp, (B, PT_DIMS, P), jnp.float32)
    features = jax.random.normal(kf, (B, FT_DIMS, P), jnp.float32)
    # mask: first n_b points valid per instance (float 0/1), shape (B, 1, P)
    valid = jnp.array([12, 9], dtype=jnp.int32)
    mask = (jnp.arange(P)[None, None, :] < valid[:, None, None]).astype(jnp.float32)

    params = init_params(kpar)
    out = jax.jit(particlenet_fl_forward)(points, features, mask, params)
    out = jax.block_until_ready(out)
    assert out.shape == (B, NUM_CLASSES) and out.dtype == jnp.float32
    assert bool(jnp.all(jnp.isfinite(out)))
    print("KERNEL_OK")
</pallas_src>

<mosaic_0001>
module attributes {stable_mosaic.version = 11 : i64} {
  func.func @_particlenet_kernel(%arg0: i32, %arg1: memref<1x16x16xf32, #tpu.memory_space<vmem>>, %arg2: memref<1x16x16xf32, #tpu.memory_space<vmem>>, %arg3: memref<1x16x1xf32, #tpu.memory_space<vmem>>, %arg4: memref<1x1x16xf32, #tpu.memory_space<vmem>>, %arg5: memref<1x16xf32, #tpu.memory_space<vmem>>, %arg6: memref<1x16xf32, #tpu.memory_space<vmem>>, %arg7: memref<16x64xbf16, #tpu.memory_space<vmem>>, %arg8: memref<1x32xf32, #tpu.memory_space<vmem>>, %arg9: memref<1x32xf32, #tpu.memory_space<vmem>>, %arg10: memref<16x32xbf16, #tpu.memory_space<vmem>>, %arg11: memref<32x32xbf16, #tpu.memory_space<vmem>>, %arg12: memref<1x32xf32, #tpu.memory_space<vmem>>, %arg13: memref<32x32xbf16, #tpu.memory_space<vmem>>, %arg14: memref<1x32xf32, #tpu.memory_space<vmem>>, %arg15: memref<32x128xbf16, #tpu.memory_space<vmem>>, %arg16: memref<1x64xf32, #tpu.memory_space<vmem>>, %arg17: memref<1x64xf32, #tpu.memory_space<vmem>>, %arg18: memref<32x64xbf16, #tpu.memory_space<vmem>>, %arg19: memref<64x64xbf16, #tpu.memory_space<vmem>>, %arg20: memref<1x64xf32, #tpu.memory_space<vmem>>, %arg21: memref<64x64xbf16, #tpu.memory_space<vmem>>, %arg22: memref<1x64xf32, #tpu.memory_space<vmem>>, %arg23: memref<32x128xbf16, #tpu.memory_space<vmem>>, %arg24: memref<64x128xbf16, #tpu.memory_space<vmem>>, %arg25: memref<1x128xf32, #tpu.memory_space<vmem>>, %arg26: memref<128x128xbf16, #tpu.memory_space<vmem>>, %arg27: memref<1x128xf32, #tpu.memory_space<vmem>>, %arg28: memref<128x5xbf16, #tpu.memory_space<vmem>>, %arg29: memref<1x5xf32, #tpu.memory_space<vmem>>, %arg30: memref<1x1x5xf32, #tpu.memory_space<vmem>>) attributes {dimension_semantics = [#tpu.dimension_semantics<parallel>], iteration_bounds = array<i64: 2>, scalar_prefetch = 0 : i64, scratch_operands = 0 : i64, tpu.core_type = #tpu.core_type<tc>, window_params = [{transform_indices = @transform_0, window_bounds = array<i64: 1, 16, 16>}, {transform_indices = @transform_1, window_bounds = array<i64: 1, 16, 16>}, {transform_indices = @transform_2, window_bounds = array<i64: 1, 16, 1>}, {transform_indices = @transform_3, window_bounds = array<i64: 1, 1, 16>}, {pipeline_mode = #tpu.pipeline_mode<synchronous>, transform_indices = @transform_4, window_bounds = array<i64: 1, 16>}, {pipeline_mode = #tpu.pipeline_mode<synchronous>, transform_indices = @transform_5, window_bounds = array<i64: 1, 16>}, {pipeline_mode = #tpu.pipeline_mode<synchronous>, transform_indices = @transform_6, window_bounds = array<i64: 16, 64>}, {pipeline_mode = #tpu.pipeline_mode<synchronous>, transform_indices = @transform_7, window_bounds = array<i64: 1, 32>}, {pipeline_mode = #tpu.pipeline_mode<synchronous>, transform_indices = @transform_8, window_bounds = array<i64: 1, 32>}, {pipeline_mode = #tpu.pipeline_mode<synchronous>, transform_indices = @transform_9, window_bounds = array<i64: 16, 32>}, {pipeline_mode = #tpu.pipeline_mode<synchronous>, transform_indices = @transform_10, window_bounds = array<i64: 32, 32>}, {pipeline_mode = #tpu.pipeline_mode<synchronous>, transform_indices = @transform_11, window_bounds = array<i64: 1, 32>}, {pipeline_mode = #tpu.pipeline_mode<synchronous>, transform_indices = @transform_12, window_bounds = array<i64: 32, 32>}, {pipeline_mode = #tpu.pipeline_mode<synchronous>, transform_indices = @transform_13, window_bounds = array<i64: 1, 32>}, {pipeline_mode = #tpu.pipeline_mode<synchronous>, transform_indices = @transform_14, window_bounds = array<i64: 32, 128>}, {pipeline_mode = #tpu.pipeline_mode<synchronous>, transform_indices = @transform_15, window_bounds = array<i64: 1, 64>}, {pipeline_mode = #tpu.pipeline_mode<synchronous>, transform_indices = @transform_16, window_bounds = array<i64: 1, 64>}, {pipeline_mode = #tpu.pipeline_mode<synchronous>, transform_indices = @transform_17, window_bounds = array<i64: 32, 64>}, {pipeline_mode = #tpu.pipeline_mode<synchronous>, transform_indices = @transform_18, window_bounds = array<i64: 64, 64>}, {pipeline_mode = #tpu.pipeline_mode<synchronous>, transform_indices = @transform_19, window_bounds = array<i64: 1, 64>}, {pipeline_mode = #tpu.pipeline_mode<synchronous>, transform_indices = @transform_20, window_bounds = array<i64: 64, 64>}, {pipeline_mode = #tpu.pipeline_mode<synchronous>, transform_indices = @transform_21, window_bounds = array<i64: 1, 64>}, {pipeline_mode = #tpu.pipeline_mode<synchronous>, transform_indices = @transform_22, window_bounds = array<i64: 32, 128>}, {pipeline_mode = #tpu.pipeline_mode<synchronous>, transform_indices = @transform_23, window_bounds = array<i64: 64, 128>}, {pipeline_mode = #tpu.pipeline_mode<synchronous>, transform_indices = @transform_24, window_bounds = array<i64: 1, 128>}, {pipeline_mode = #tpu.pipeline_mode<synchronous>, transform_indices = @transform_25, window_bounds = array<i64: 128, 128>}, {pipeline_mode = #tpu.pipeline_mode<synchronous>, transform_indices = @transform_26, window_bounds = array<i64: 1, 128>}, {pipeline_mode = #tpu.pipeline_mode<synchronous>, transform_indices = @transform_27, window_bounds = array<i64: 128, 5>}, {pipeline_mode = #tpu.pipeline_mode<synchronous>, transform_indices = @transform_28, window_bounds = array<i64: 1, 5>}, {transform_indices = @transform_29, window_bounds = array<i64: 1, 1, 5>}]} {
    %c0 = arith.constant 0 : index
    %c0_0 = arith.constant 0 : index
    %c0_1 = arith.constant 0 : index
    %0 = vector.load %arg3[%c0, %c0_0, %c0_1] : memref<1x16x1xf32, #tpu.memory_space<vmem>>, vector<1x16x1xf32>
    %1 = vector.shape_cast %0 : vector<1x16x1xf32> to vector<16x1xf32>
    %c0_2 = arith.constant 0 : index
    %c0_3 = arith.constant 0 : index
    %c0_4 = arith.constant 0 : index
    %2 = vector.load %arg4[%c0_2, %c0_3, %c0_4] : memref<1x1x16xf32, #tpu.memory_space<vmem>>, vector<1x1x16xf32>
    %3 = vector.shape_cast %2 : vector<1x1x16xf32> to vector<1x16xf32>
    %c0_5 = arith.constant 0 : index
    %c0_6 = arith.constant 0 : index
    %c0_7 = arith.constant 0 : index
    %4 = vector.load %arg1[%c0_5, %c0_6, %c0_7] : memref<1x16x16xf32, #tpu.memory_space<vmem>>, vector<1x16x16xf32>
    %5 = vector.shape_cast %4 : vector<1x16x16xf32> to vector<16x16xf32>
    %6 = vector.broadcast %1 : vector<16x1xf32> to vector<16x16xf32>
    %7 = arith.mulf %5, %6 : vector<16x16xf32>
    %c0_8 = arith.constant 0 : index
    %c0_9 = arith.constant 0 : index
    %c0_10 = arith.constant 0 : index
    %8 = vector.load %arg2[%c0_8, %c0_9, %c0_10] : memref<1x16x16xf32, #tpu.memory_space<vmem>>, vector<1x16x16xf32>
    %9 = vector.shape_cast %8 : vector<1x16x16xf32> to vector<16x16xf32>
    %10 = vector.broadcast %1 : vector<16x1xf32> to vector<16x16xf32>
    %11 = arith.mulf %9, %10 : vector<16x16xf32>
    %c0_11 = arith.constant 0 : index
    %c0_12 = arith.constant 0 : index
    %12 = vector.load %arg5[%c0_11, %c0_12] : memref<1x16xf32, #tpu.memory_space<vmem>>, vector<1x16xf32>
    %13 = vector.broadcast %12 : vector<1x16xf32> to vector<16x16xf32>
    %14 = arith.mulf %11, %13 : vector<16x16xf32>
    %c0_13 = arith.constant 0 : index
    %c0_14 = arith.constant 0 : index
    %15 = vector.load %arg6[%c0_13, %c0_14] : memref<1x16xf32, #tpu.memory_space<vmem>>, vector<1x16xf32>
    %16 = vector.broadcast %15 : vector<1x16xf32> to vector<16x16xf32>
    %17 = arith.addf %14, %16 : vector<16x16xf32>
    %18 = vector.broadcast %1 : vector<16x1xf32> to vector<16x16xf32>
    %19 = arith.mulf %17, %18 : vector<16x16xf32>
    %20 = tpu.iota {dimensions = array<i32: 0>} : vector<16x16xi32>
    %21 = tpu.iota {dimensions = array<i32: 1>} : vector<16x16xi32>
    %c15_i32 = arith.constant 15 : i32
    %22 = vector.broadcast %c15_i32 : i32 to vector<16x16xi32>
    %23 = arith.subi %22, %21 : vector<16x16xi32>
    %24 = arith.cmpi eq, %20, %21 : vector<16x16xi32>
    %cst = arith.constant -9.99999968E+37 : f32
    %cst_15 = arith.constant 0.000000e+00 : f32
    %25 = vector.broadcast %cst : f32 to vector<16x16xf32>
    %26 = vector.broadcast %cst_15 : f32 to vector<16x16xf32>
    %27 = arith.select %24, %25, %26 : vector<16x16xi1>, vector<16x16xf32>
    %cst_16 = arith.constant 1.000000e+00 : f32
    %28 = vector.broadcast %cst_16 : f32 to vector<1x16xf32>
    %29 = arith.subf %28, %3 : vector<1x16xf32>
    %cst_17 = arith.constant -9.99999995E+11 : f32
    %30 = vector.broadcast %cst_17 : f32 to vector<1x16xf32>
    %31 = arith.mulf %29, %30 : vector<1x16xf32>
    %32 = vector.broadcast %31 : vector<1x16xf32> to vector<16x16xf32>
    %33 = arith.addf %27, %32 : vector<16x16xf32>
    %cst_18 = arith.constant -2.000000e+38 : f32
    %34 = vector.broadcast %cst_18 : f32 to vector<16x16xf32>
    %35 = tpu.bitcast %34 : vector<16x16xf32> -> vector<16x16xi32>
    %c-16_i32 = arith.constant -16 : i32
    %36 = vector.broadcast %c-16_i32 : i32 to vector<16x16xi32>
    %37 = arith.andi %35, %36 : vector<16x16xi32>
    %38 = arith.ori %37, %23 : vector<16x16xi32>
    %39 = tpu.bitcast %38 : vector<16x16xi32> -> vector<16x16xf32>
    %c0_19 = arith.constant 0 : index
    %c0_20 = arith.constant 0 : index
    %40 = vector.load %arg7[%c0_19, %c0_20] : memref<16x64xbf16, #tpu.memory_space<vmem>>, vector<16x64xbf16>
    %c0_21 = arith.constant 0 : index
    %c0_22 = arith.constant 0 : index
    %41 = vector.load %arg8[%c0_21, %c0_22] : memref<1x32xf32, #tpu.memory_space<vmem>>, vector<1x32xf32>
    %c0_23 = arith.constant 0 : index
    %c0_24 = arith.constant 0 : index
    %42 = vector.load %arg9[%c0_23, %c0_24] : memref<1x32xf32, #tpu.memory_space<vmem>>, vector<1x32xf32>
    %c0_25 = arith.constant 0 : index
    %c0_26 = arith.constant 0 : index
    %43 = vector.load %arg10[%c0_25, %c0_26] : memref<16x32xbf16, #tpu.memory_space<vmem>>, vector<16x32xbf16>
    %c0_27 = arith.constant 0 : index
    %c0_28 = arith.constant 0 : index
    %44 = vector.load %arg11[%c0_27, %c0_28] : memref<32x32xbf16, #tpu.memory_space<vmem>>, vector<32x32xbf16>
    %c0_29 = arith.constant 0 : index
    %c0_30 = arith.constant 0 : index
    %45 = vector.load %arg12[%c0_29, %c0_30] : memref<1x32xf32, #tpu.memory_space<vmem>>, vector<1x32xf32>
    %c0_31 = arith.constant 0 : index
    %c0_32 = arith.constant 0 : index
    %46 = vector.load %arg13[%c0_31, %c0_32] : memref<32x32xbf16, #tpu.memory_space<vmem>>, vector<32x32xbf16>
    %c0_33 = arith.constant 0 : index
    %c0_34 = arith.constant 0 : index
    %47 = vector.load %arg14[%c0_33, %c0_34] : memref<1x32xf32, #tpu.memory_space<vmem>>, vector<1x32xf32>
    %cst_35 = arith.constant dense<0.000000e+00> : vector<16x16xf32>
    %48 = tpu.matmul %7, %7, %cst_35 {dimension_numbers = #tpu.dot_dimension_numbers<[1], [1], [0], [0], [0, 0, 1, 0], [], []>} : vector<16x16xf32>, vector<16x16xf32>, vector<16x16xf32> -> vector<16x16xf32>
    %cst_36 = arith.constant 2.000000e+00 : f32
    %49 = vector.broadcast %cst_36 : f32 to vector<16x16xf32>
    %50 = arith.mulf %49, %48 : vector<16x16xf32>
    %cst_37 = arith.constant 1.000000e+00 : f32
    %51 = vector.broadcast %cst_37 : f32 to vector<16x16xf32>
    %52 = arith.mulf %7, %7 : vector<16x16xf32>
    %cst_38 = arith.constant dense<0.000000e+00> : vector<16x16xf32>
    %53 = tpu.matmul %51, %52, %cst_38 {dimension_numbers = #tpu.dot_dimension_numbers<[1], [1], [0], [0], [0, 0, 1, 0], [], []>} : vector<16x16xf32>, vector<16x16xf32>, vector<16x16xf32> -> vector<16x16xf32>
    %54 = arith.subf %50, %53 : vector<16x16xf32>
    %55 = arith.addf %54, %33 : vector<16x16xf32>
    %56 = tpu.bitcast %55 : vector<16x16xf32> -> vector<16x16xi32>
    %c-16_i32_39 = arith.constant -16 : i32
    %57 = vector.broadcast %c-16_i32_39 : i32 to vector<16x16xi32>
    %58 = arith.andi %56, %57 : vector<16x16xi32>
    %59 = arith.ori %58, %23 : vector<16x16xi32>
    %60 = tpu.bitcast %59 : vector<16x16xi32> -> vector<16x16xf32>
    %cst_40 = arith.constant dense<0xFF800000> : vector<16xf32>
    %61 = vector.multi_reduction <maximumf>, %60, %cst_40 [1] : vector<16x16xf32> to vector<16xf32>
    %62 = vector.shape_cast %61 : vector<16xf32> to vector<16x1xf32>
    %63 = vector.broadcast %62 : vector<16x1xf32> to vector<16x16xf32>
    %64 = arith.cmpf oeq, %60, %63 : vector<16x16xf32>
    %65 = arith.extui %64 : vector<16x16xi1> to vector<16x16xi32>
    %66 = arith.sitofp %65 : vector<16x16xi32> to vector<16x16xf32>
    %cst_41 = arith.constant 0.000000e+00 : f32
    %67 = vector.broadcast %cst_41 : f32 to vector<16x16xf32>
    %68 = arith.cmpf ogt, %66, %67 : vector<16x16xf32>
    %69 = arith.select %68, %39, %60 : vector<16x16xi1>, vector<16x16xf32>
    %cst_42 = arith.constant dense<0xFF800000> : vector<16xf32>
    %70 = vector.multi_reduction <maximumf>, %69, %cst_42 [1] : vector<16x16xf32> to vector<16xf32>
    %71 = vector.shape_cast %70 : vector<16xf32> to vector<16x1xf32>
    %72 = vector.broadcast %71 : vector<16x1xf32> to vector<16x16xf32>
    %73 = arith.cmpf oeq, %69, %72 : vector<16x16xf32>
    %74 = arith.extui %73 : vector<16x16xi1> to vector<16x16xi32>
    %75 = arith.sitofp %74 : vector<16x16xi32> to vector<16x16xf32>
    %cst_43 = arith.constant 0.000000e+00 : f32
    %76 = vector.broadcast %cst_43 : f32 to vector<16x16xf32>
    %77 = arith.cmpf ogt, %75, %76 : vector<16x16xf32>
    %78 = arith.select %77, %39, %69 : vector<16x16xi1>, vector<16x16xf32>
    %cst_44 = arith.constant dense<0xFF800000> : vector<16xf32>
    %79 = vector.multi_reduction <maximumf>, %78, %cst_44 [1] : vector<16x16xf32> to vector<16xf32>
    %80 = vector.shape_cast %79 : vector<16xf32> to vector<16x1xf32>
    %81 = vector.broadcast %80 : vector<16x1xf32> to vector<16x16xf32>
    %82 = arith.cmpf oeq, %78, %81 : vector<16x16xf32>
    %83 = arith.extui %82 : vector<16x16xi1> to vector<16x16xi32>
    %84 = arith.sitofp %83 : vector<16x16xi32> to vector<16x16xf32>
    %cst_45 = arith.constant 0.000000e+00 : f32
    %85 = vector.broadcast %cst_45 : f32 to vector<16x16xf32>
    %86 = arith.cmpf ogt, %84, %85 : vector<16x16xf32>
    %87 = arith.select %86, %39, %78 : vector<16x16xi1>, vector<16x16xf32>
    %cst_46 = arith.constant dense<0xFF800000> : vector<16xf32>
    %88 = vector.multi_reduction <maximumf>, %87, %cst_46 [1] : vector<16x16xf32> to vector<16xf32>
    %89 = vector.shape_cast %88 : vector<16xf32> to vector<16x1xf32>
    %90 = vector.broadcast %89 : vector<16x1xf32> to vector<16x16xf32>
    %91 = arith.cmpf oeq, %87, %90 : vector<16x16xf32>
    %92 = arith.extui %91 : vector<16x16xi1> to vector<16x16xi32>
    %93 = arith.sitofp %92 : vector<16x16xi32> to vector<16x16xf32>
    %cst_47 = arith.constant 0.000000e+00 : f32
    %94 = vector.broadcast %cst_47 : f32 to vector<16x16xf32>
    %95 = arith.cmpf ogt, %93, %94 : vector<16x16xf32>
    %96 = arith.select %95, %39, %87 : vector<16x16xi1>, vector<16x16xf32>
    %cst_48 = arith.constant dense<0xFF800000> : vector<16xf32>
    %97 = vector.multi_reduction <maximumf>, %96, %cst_48 [1] : vector<16x16xf32> to vector<16xf32>
    %98 = vector.shape_cast %97 : vector<16xf32> to vector<16x1xf32>
    %99 = vector.broadcast %98 : vector<16x1xf32> to vector<16x16xf32>
    %100 = arith.cmpf oeq, %96, %99 : vector<16x16xf32>
    %101 = arith.extui %100 : vector<16x16xi1> to vector<16x16xi32>
    %102 = arith.sitofp %101 : vector<16x16xi32> to vector<16x16xf32>
    %cst_49 = arith.constant 0.000000e+00 : f32
    %103 = vector.broadcast %cst_49 : f32 to vector<16x16xf32>
    %104 = arith.cmpf ogt, %102, %103 : vector<16x16xf32>
    %105 = arith.select %104, %39, %96 : vector<16x16xi1>, vector<16x16xf32>
    %cst_50 = arith.constant dense<0xFF800000> : vector<16xf32>
    %106 = vector.multi_reduction <maximumf>, %105, %cst_50 [1] : vector<16x16xf32> to vector<16xf32>
    %107 = vector.shape_cast %106 : vector<16xf32> to vector<16x1xf32>
    %108 = vector.broadcast %107 : vector<16x1xf32> to vector<16x16xf32>
    %109 = arith.cmpf oeq, %105, %108 : vector<16x16xf32>
    %110 = arith.extui %109 : vector<16x16xi1> to vector<16x16xi32>
    %111 = arith.sitofp %110 : vector<16x16xi32> to vector<16x16xf32>
    %cst_51 = arith.constant 0.000000e+00 : f32
    %112 = vector.broadcast %cst_51 : f32 to vector<16x16xf32>
    %113 = arith.cmpf ogt, %111, %112 : vector<16x16xf32>
    %114 = arith.select %113, %39, %105 : vector<16x16xi1>, vector<16x16xf32>
    %cst_52 = arith.constant dense<0xFF800000> : vector<16xf32>
    %115 = vector.multi_reduction <maximumf>, %114, %cst_52 [1] : vector<16x16xf32> to vector<16xf32>
    %116 = vector.shape_cast %115 : vector<16xf32> to vector<16x1xf32>
    %117 = vector.broadcast %116 : vector<16x1xf32> to vector<16x16xf32>
    %118 = arith.cmpf oeq, %114, %117 : vector<16x16xf32>
    %119 = arith.extui %118 : vector<16x16xi1> to vector<16x16xi32>
    %120 = arith.sitofp %119 : vector<16x16xi32> to vector<16x16xf32>
    %121 = tpu.concatenate %66, %75, %84, %93, %102, %111, %120 in 0 : vector<16x16xf32>, vector<16x16xf32>, vector<16x16xf32>, vector<16x16xf32>, vector<16x16xf32>, vector<16x16xf32>, vector<16x16xf32> -> vector<112x16xf32>
    %122 = arith.truncf %121 : vector<112x16xf32> to vector<112x16xbf16>
    %123 = arith.truncf %19 : vector<16x16xf32> to vector<16x16xbf16>
    %cst_53 = arith.constant dense<0.000000e+00> : vector<112x16xf32>
    %124 = tpu.matmul %122, %123, %cst_53 {dimension_numbers = #tpu.dot_dimension_numbers<[1], [0], [0], [1], [0, 0, 1, 1], [], []>} : vector<112x16xbf16>, vector<16x16xbf16>, vector<112x16xf32> -> vector<112x16xf32>
    %cst_54 = arith.constant dense<0.000000e+00> : vector<16x64xf32>
    %125 = tpu.matmul %123, %40, %cst_54 {dimension_numbers = #tpu.dot_dimension_numbers<[1], [0], [0], [1], [0, 0, 1, 1], [], []>} : vector<16x16xbf16>, vector<16x64xbf16>, vector<16x64xf32> -> vector<16x64xf32>
    %126 = vector.extract_strided_slice %125 {offsets = [0, 0], sizes = [16, 32], strides = [1, 1]} : vector<16x64xf32> to vector<16x32xf32>
    %127 = vector.broadcast %41 : vector<1x32xf32> to vector<16x32xf32>
    %128 = arith.addf %126, %127 : vector<16x32xf32>
    %129 = vector.extract_strided_slice %125 {offsets = [0, 32], sizes = [16, 32], strides = [1, 1]} : vector<16x64xf32> to vector<16x32xf32>
    %130 = vector.broadcast %42 : vector<1x32xf32> to vector<16x32xf32>
    %131 = arith.addf %129, %130 : vector<16x32xf32>
    %132 = tpu.concatenate %128, %128, %128, %128, %128, %128, %128 in 0 : vector<16x32xf32>, vector<16x32xf32>, vector<16x32xf32>, vector<16x32xf32>, vector<16x32xf32>, vector<16x32xf32>, vector<16x32xf32> -> vector<112x32xf32>
    %133 = arith.truncf %124 : vector<112x16xf32> to vector<112x16xbf16>
    %cst_55 = arith.constant dense<0.000000e+00> : vector<112x32xf32>
    %134 = tpu.matmul %133, %43, %cst_55 {dimension_numbers = #tpu.dot_dimension_numbers<[1], [0], [0], [1], [0, 0, 1, 1], [], []>} : vector<112x16xbf16>, vector<16x32xbf16>, vector<112x32xf32> -> vector<112x32xf32>
    %135 = arith.addf %132, %134 : vector<112x32xf32>
    %cst_56 = arith.constant 0.000000e+00 : f32
    %136 = vector.broadcast %cst_56 : f32 to vector<112x32xf32>
    %137 = arith.maximumf %135, %136 : vector<112x32xf32>
    %138 = arith.truncf %137 : vector<112x32xf32> to vector<112x32xbf16>
    %cst_57 = arith.constant dense<0.000000e+00> : vector<112x32xf32>
    %139 = tpu.matmul %138, %44, %cst_57 {dimension_numbers = #tpu.dot_dimension_numbers<[1], [0], [0], [1], [0, 0, 1, 1], [], []>} : vector<112x32xbf16>, vector<32x32xbf16>, vector<112x32xf32> -> vector<112x32xf32>
    %140 = vector.broadcast %45 : vector<1x32xf32> to vector<112x32xf32>
    %141 = arith.addf %139, %140 : vector<112x32xf32>
    %cst_58 = arith.constant 0.000000e+00 : f32
    %142 = vector.broadcast %cst_58 : f32 to vector<112x32xf32>
    %143 = arith.maximumf %141, %142 : vector<112x32xf32>
    %144 = arith.truncf %143 : vector<112x32xf32> to vector<112x32xbf16>
    %cst_59 = arith.constant dense<0.000000e+00> : vector<112x32xf32>
    %145 = tpu.matmul %144, %46, %cst_59 {dimension_numbers = #tpu.dot_dimension_numbers<[1], [0], [0], [1], [0, 0, 1, 1], [], []>} : vector<112x32xbf16>, vector<32x32xbf16>, vector<112x32xf32> -> vector<112x32xf32>
    %146 = vector.broadcast %47 : vector<1x32xf32> to vector<112x32xf32>
    %147 = arith.addf %145, %146 : vector<112x32xf32>
    %cst_60 = arith.constant 0.000000e+00 : f32
    %148 = vector.broadcast %cst_60 : f32 to vector<112x32xf32>
    %149 = arith.maximumf %147, %148 : vector<112x32xf32>
    %150 = vector.extract_strided_slice %149 {offsets = [0, 0], sizes = [16, 32], strides = [1, 1]} : vector<112x32xf32> to vector<16x32xf32>
    %151 = vector.extract_strided_slice %149 {offsets = [16, 0], sizes = [16, 32], strides = [1, 1]} : vector<112x32xf32> to vector<16x32xf32>
    %152 = arith.addf %150, %151 : vector<16x32xf32>
    %153 = vector.extract_strided_slice %149 {offsets = [32, 0], sizes = [16, 32], strides = [1, 1]} : vector<112x32xf32> to vector<16x32xf32>
    %154 = arith.addf %152, %153 : vector<16x32xf32>
    %155 = vector.extract_strided_slice %149 {offsets = [48, 0], sizes = [16, 32], strides = [1, 1]} : vector<112x32xf32> to vector<16x32xf32>
    %156 = arith.addf %154, %155 : vector<16x32xf32>
    %157 = vector.extract_strided_slice %149 {offsets = [64, 0], sizes = [16, 32], strides = [1, 1]} : vector<112x32xf32> to vector<16x32xf32>
    %158 = arith.addf %156, %157 : vector<16x32xf32>
    %159 = vector.extract_strided_slice %149 {offsets = [80, 0], sizes = [16, 32], strides = [1, 1]} : vector<112x32xf32> to vector<16x32xf32>
    %160 = arith.addf %158, %159 : vector<16x32xf32>
    %161 = vector.extract_strided_slice %149 {offsets = [96, 0], sizes = [16, 32], strides = [1, 1]} : vector<112x32xf32> to vector<16x32xf32>
    %162 = arith.addf %160, %161 : vector<16x32xf32>
    %163 = arith.addf %131, %162 : vector<16x32xf32>
    %cst_61 = arith.constant 0.000000e+00 : f32
    %164 = vector.broadcast %cst_61 : f32 to vector<16x32xf32>
    %165 = arith.maximumf %163, %164 : vector<16x32xf32>
    %166 = vector.broadcast %1 : vector<16x1xf32> to vector<16x32xf32>
    %167 = arith.mulf %165, %166 : vector<16x32xf32>
    %c0_62 = arith.constant 0 : index
    %c0_63 = arith.constant 0 : index
    %168 = vector.load %arg15[%c0_62, %c0_63] : memref<32x128xbf16, #tpu.memory_space<vmem>>, vector<32x128xbf16>
    %c0_64 = arith.constant 0 : index
    %c0_65 = arith.constant 0 : index
    %169 = vector.load %arg16[%c0_64, %c0_65] : memref<1x64xf32, #tpu.memory_space<vmem>>, vector<1x64xf32>
    %c0_66 = arith.constant 0 : index
    %c0_67 = arith.constant 0 : index
    %170 = vector.load %arg17[%c0_66, %c0_67] : memref<1x64xf32, #tpu.memory_space<vmem>>, vector<1x64xf32>
    %c0_68 = arith.constant 0 : index
    %c0_69 = arith.constant 0 : index
    %171 = vector.load %arg18[%c0_68, %c0_69] : memref<32x64xbf16, #tpu.memory_space<vmem>>, vector<32x64xbf16>
    %c0_70 = arith.constant 0 : index
    %c0_71 = arith.constant 0 : index
    %172 = vector.load %arg19[%c0_70, %c0_71] : memref<64x64xbf16, #tpu.memory_space<vmem>>, vector<64x64xbf16>
    %c0_72 = arith.constant 0 : index
    %c0_73 = arith.constant 0 : index
    %173 = vector.load %arg20[%c0_72, %c0_73] : memref<1x64xf32, #tpu.memory_space<vmem>>, vector<1x64xf32>
    %c0_74 = arith.constant 0 : index
    %c0_75 = arith.constant 0 : index
    %174 = vector.load %arg21[%c0_74, %c0_75] : memref<64x64xbf16, #tpu.memory_space<vmem>>, vector<64x64xbf16>
    %c0_76 = arith.constant 0 : index
    %c0_77 = arith.constant 0 : index
    %175 = vector.load %arg22[%c0_76, %c0_77] : memref<1x64xf32, #tpu.memory_space<vmem>>, vector<1x64xf32>
    %cst_78 = arith.constant dense<0.000000e+00> : vector<16x16xf32>
    %176 = tpu.matmul %167, %167, %cst_78 {dimension_numbers = #tpu.dot_dimension_numbers<[1], [1], [0], [0], [0, 0, 1, 0], [], []>} : vector<16x32xf32>, vector<16x32xf32>, vector<16x16xf32> -> vector<16x16xf32>
    %cst_79 = arith.constant 2.000000e+00 : f32
    %177 = vector.broadcast %cst_79 : f32 to vector<16x16xf32>
    %178 = arith.mulf %177, %176 : vector<16x16xf32>
    %cst_80 = arith.constant 1.000000e+00 : f32
    %179 = vector.broadcast %cst_80 : f32 to vector<16x32xf32>
    %180 = arith.mulf %167, %167 : vector<16x32xf32>
    %cst_81 = arith.constant dense<0.000000e+00> : vector<16x16xf32>
    %181 = tpu.matmul %179, %180, %cst_81 {dimension_numbers = #tpu.dot_dimension_numbers<[1], [1], [0], [0], [0, 0, 1, 0], [], []>} : vector<16x32xf32>, vector<16x32xf32>, vector<16x16xf32> -> vector<16x16xf32>
    %182 = arith.subf %178, %181 : vector<16x16xf32>
    %183 = arith.addf %182, %33 : vector<16x16xf32>
    %184 = tpu.bitcast %183 : vector<16x16xf32> -> vector<16x16xi32>
    %c-16_i32_82 = arith.constant -16 : i32
    %185 = vector.broadcast %c-16_i32_82 : i32 to vector<16x16xi32>
    %186 = arith.andi %184, %185 : vector<16x16xi32>
    %187 = arith.ori %186, %23 : vector<16x16xi32>
    %188 = tpu.bitcast %187 : vector<16x16xi32> -> vector<16x16xf32>
    %cst_83 = arith.constant dense<0xFF800000> : vector<16xf32>
    %189 = vector.multi_reduction <maximumf>, %188, %cst_83 [1] : vector<16x16xf32> to vector<16xf32>
    %190 = vector.shape_cast %189 : vector<16xf32> to vector<16x1xf32>
    %191 = vector.broadcast %190 : vector<16x1xf32> to vector<16x16xf32>
    %192 = arith.cmpf oeq, %188, %191 : vector<16x16xf32>
    %193 = arith.extui %192 : vector<16x16xi1> to vector<16x16xi32>
    %194 = arith.sitofp %193 : vector<16x16xi32> to vector<16x16xf32>
    %cst_84 = arith.constant 0.000000e+00 : f32
    %195 = vector.broadcast %cst_84 : f32 to vector<16x16xf32>
    %196 = arith.cmpf ogt, %194, %195 : vector<16x16xf32>
    %197 = arith.select %196, %39, %188 : vector<16x16xi1>, vector<16x16xf32>
    %cst_85 = arith.constant dense<0xFF800000> : vector<16xf32>
    %198 = vector.multi_reduction <maximumf>, %197, %cst_85 [1] : vector<16x16xf32> to vector<16xf32>
    %199 = vector.shape_cast %198 : vector<16xf32> to vector<16x1xf32>
    %200 = vector.broadcast %199 : vector<16x1xf32> to vector<16x16xf32>
    %201 = arith.cmpf oeq, %197, %200 : vector<16x16xf32>
    %202 = arith.extui %201 : vector<16x16xi1> to vector<16x16xi32>
    %203 = arith.sitofp %202 : vector<16x16xi32> to vector<16x16xf32>
    %cst_86 = arith.constant 0.000000e+00 : f32
    %204 = vector.broadcast %cst_86 : f32 to vector<16x16xf32>
    %205 = arith.cmpf ogt, %203, %204 : vector<16x16xf32>
    %206 = arith.select %205, %39, %197 : vector<16x16xi1>, vector<16x16xf32>
    %cst_87 = arith.constant dense<0xFF800000> : vector<16xf32>
    %207 = vector.multi_reduction <maximumf>, %206, %cst_87 [1] : vector<16x16xf32> to vector<16xf32>
    %208 = vector.shape_cast %207 : vector<16xf32> to vector<16x1xf32>
    %209 = vector.broadcast %208 : vector<16x1xf32> to vector<16x16xf32>
    %210 = arith.cmpf oeq, %206, %209 : vector<16x16xf32>
    %211 = arith.extui %210 : vector<16x16xi1> to vector<16x16xi32>
    %212 = arith.sitofp %211 : vector<16x16xi32> to vector<16x16xf32>
    %cst_88 = arith.constant 0.000000e+00 : f32
    %213 = vector.broadcast %cst_88 : f32 to vector<16x16xf32>
    %214 = arith.cmpf ogt, %212, %213 : vector<16x16xf32>
    %215 = arith.select %214, %39, %206 : vector<16x16xi1>, vector<16x16xf32>
    %cst_89 = arith.constant dense<0xFF800000> : vector<16xf32>
    %216 = vector.multi_reduction <maximumf>, %215, %cst_89 [1] : vector<16x16xf32> to vector<16xf32>
    %217 = vector.shape_cast %216 : vector<16xf32> to vector<16x1xf32>
    %218 = vector.broadcast %217 : vector<16x1xf32> to vector<16x16xf32>
    %219 = arith.cmpf oeq, %215, %218 : vector<16x16xf32>
    %220 = arith.extui %219 : vector<16x16xi1> to vector<16x16xi32>
    %221 = arith.sitofp %220 : vector<16x16xi32> to vector<16x16xf32>
    %cst_90 = arith.constant 0.000000e+00 : f32
    %222 = vector.broadcast %cst_90 : f32 to vector<16x16xf32>
    %223 = arith.cmpf ogt, %221, %222 : vector<16x16xf32>
    %224 = arith.select %223, %39, %215 : vector<16x16xi1>, vector<16x16xf32>
    %cst_91 = arith.constant dense<0xFF800000> : vector<16xf32>
    %225 = vector.multi_reduction <maximumf>, %224, %cst_91 [1] : vector<16x16xf32> to vector<16xf32>
    %226 = vector.shape_cast %225 : vector<16xf32> to vector<16x1xf32>
    %227 = vector.broadcast %226 : vector<16x1xf32> to vector<16x16xf32>
    %228 = arith.cmpf oeq, %224, %227 : vector<16x16xf32>
    %229 = arith.extui %228 : vector<16x16xi1> to vector<16x16xi32>
    %230 = arith.sitofp %229 : vector<16x16xi32> to vector<16x16xf32>
    %cst_92 = arith.constant 0.000000e+00 : f32
    %231 = vector.broadcast %cst_92 : f32 to vector<16x16xf32>
    %232 = arith.cmpf ogt, %230, %231 : vector<16x16xf32>
    %233 = arith.select %232, %39, %224 : vector<16x16xi1>, vector<16x16xf32>
    %cst_93 = arith.constant dense<0xFF800000> : vector<16xf32>
    %234 = vector.multi_reduction <maximumf>, %233, %cst_93 [1] : vector<16x16xf32> to vector<16xf32>
    %235 = vector.shape_cast %234 : vector<16xf32> to vector<16x1xf32>
    %236 = vector.broadcast %235 : vector<16x1xf32> to vector<16x16xf32>
    %237 = arith.cmpf oeq, %233, %236 : vector<16x16xf32>
    %238 = arith.extui %237 : vector<16x16xi1> to vector<16x16xi32>
    %239 = arith.sitofp %238 : vector<16x16xi32> to vector<16x16xf32>
    %cst_94 = arith.constant 0.000000e+00 : f32
    %240 = vector.broadcast %cst_94 : f32 to vector<16x16xf32>
    %241 = arith.cmpf ogt, %239, %240 : vector<16x16xf32>
    %242 = arith.select %241, %39, %233 : vector<16x16xi1>, vector<16x16xf32>
    %cst_95 = arith.constant dense<0xFF800000> : vector<16xf32>
    %243 = vector.multi_reduction <maximumf>, %242, %cst_95 [1] : vector<16x16xf32> to vector<16xf32>
    %244 = vector.shape_cast %243 : vector<16xf32> to vector<16x1xf32>
    %245 = vector.broadcast %244 : vector<16x1xf32> to vector<16x16xf32>
    %246 = arith.cmpf oeq, %242, %245 : vector<16x16xf32>
    %247 = arith.extui %246 : vector<16x16xi1> to vector<16x16xi32>
    %248 = arith.sitofp %247 : vector<16x16xi32> to vector<16x16xf32>
    %249 = tpu.concatenate %194, %203, %212, %221, %230, %239, %248 in 0 : vector<16x16xf32>, vector<16x16xf32>, vector<16x16xf32>, vector<16x16xf32>, vector<16x16xf32>, vector<16x16xf32>, vector<16x16xf32> -> vector<112x16xf32>
    %250 = arith.truncf %249 : vector<112x16xf32> to vector<112x16xbf16>
    %251 = arith.truncf %167 : vector<16x32xf32> to vector<16x32xbf16>
    %cst_96 = arith.constant dense<0.000000e+00> : vector<112x32xf32>
    %252 = tpu.matmul %250, %251, %cst_96 {dimension_numbers = #tpu.dot_dimension_numbers<[1], [0], [0], [1], [0, 0, 1, 1], [], []>} : vector<112x16xbf16>, vector<16x32xbf16>, vector<112x32xf32> -> vector<112x32xf32>
    %cst_97 = arith.constant dense<0.000000e+00> : vector<16x128xf32>
    %253 = tpu.matmul %251, %168, %cst_97 {dimension_numbers = #tpu.dot_dimension_numbers<[1], [0], [0], [1], [0, 0, 1, 1], [], []>} : vector<16x32xbf16>, vector<32x128xbf16>, vector<16x128xf32> -> vector<16x128xf32>
    %254 = vector.extract_strided_slice %253 {offsets = [0, 0], sizes = [16, 64], strides = [1, 1]} : vector<16x128xf32> to vector<16x64xf32>
    %255 = vector.broadcast %169 : vector<1x64xf32> to vector<16x64xf32>
    %256 = arith.addf %254, %255 : vector<16x64xf32>
    %257 = vector.extract_strided_slice %253 {offsets = [0, 64], sizes = [16, 64], strides = [1, 1]} : vector<16x128xf32> to vector<16x64xf32>
    %258 = vector.broadcast %170 : vector<1x64xf32> to vector<16x64xf32>
    %259 = arith.addf %257, %258 : vector<16x64xf32>
    %260 = tpu.concatenate %256, %256, %256, %256, %256, %256, %256 in 0 : vector<16x64xf32>, vector<16x64xf32>, vector<16x64xf32>, vector<16x64xf32>, vector<16x64xf32>, vector<16x64xf32>, vector<16x64xf32> -> vector<112x64xf32>
    %261 = arith.truncf %252 : vector<112x32xf32> to vector<112x32xbf16>
    %cst_98 = arith.constant dense<0.000000e+00> : vector<112x64xf32>
    %262 = tpu.matmul %261, %171, %cst_98 {dimension_numbers = #tpu.dot_dimension_numbers<[1], [0], [0], [1], [0, 0, 1, 1], [], []>} : vector<112x32xbf16>, vector<32x64xbf16>, vector<112x64xf32> -> vector<112x64xf32>
    %263 = arith.addf %260, %262 : vector<112x64xf32>
    %cst_99 = arith.constant 0.000000e+00 : f32
    %264 = vector.broadcast %cst_99 : f32 to vector<112x64xf32>
    %265 = arith.maximumf %263, %264 : vector<112x64xf32>
    %266 = arith.truncf %265 : vector<112x64xf32> to vector<112x64xbf16>
    %cst_100 = arith.constant dense<0.000000e+00> : vector<112x64xf32>
    %267 = tpu.matmul %266, %172, %cst_100 {dimension_numbers = #tpu.dot_dimension_numbers<[1], [0], [0], [1], [0, 0, 1, 1], [], []>} : vector<112x64xbf16>, vector<64x64xbf16>, vector<112x64xf32> -> vector<112x64xf32>
    %268 = vector.broadcast %173 : vector<1x64xf32> to vector<112x64xf32>
    %269 = arith.addf %267, %268 : vector<112x64xf32>
    %cst_101 = arith.constant 0.000000e+00 : f32
    %270 = vector.broadcast %cst_101 : f32 to vector<112x64xf32>
    %271 = arith.maximumf %269, %270 : vector<112x64xf32>
    %272 = arith.truncf %271 : vector<112x64xf32> to vector<112x64xbf16>
    %cst_102 = arith.constant dense<0.000000e+00> : vector<112x64xf32>
    %273 = tpu.matmul %272, %174, %cst_102 {dimension_numbers = #tpu.dot_dimension_numbers<[1], [0], [0], [1], [0, 0, 1, 1], [], []>} : vector<112x64xbf16>, vector<64x64xbf16>, vector<112x64xf32> -> vector<112x64xf32>
    %274 = vector.broadcast %175 : vector<1x64xf32> to vector<112x64xf32>
    %275 = arith.addf %273, %274 : vector<112x64xf32>
    %cst_103 = arith.constant 0.000000e+00 : f32
    %276 = vector.broadcast %cst_103 : f32 to vector<112x64xf32>
    %277 = arith.maximumf %275, %276 : vector<112x64xf32>
    %278 = vector.extract_strided_slice %277 {offsets = [0, 0], sizes = [16, 64], strides = [1, 1]} : vector<112x64xf32> to vector<16x64xf32>
    %279 = vector.extract_strided_slice %277 {offsets = [16, 0], sizes = [16, 64], strides = [1, 1]} : vector<112x64xf32> to vector<16x64xf32>
    %280 = arith.addf %278, %279 : vector<16x64xf32>
    %281 = vector.extract_strided_slice %277 {offsets = [32, 0], sizes = [16, 64], strides = [1, 1]} : vector<112x64xf32> to vector<16x64xf32>
    %282 = arith.addf %280, %281 : vector<16x64xf32>
    %283 = vector.extract_strided_slice %277 {offsets = [48, 0], sizes = [16, 64], strides = [1, 1]} : vector<112x64xf32> to vector<16x64xf32>
    %284 = arith.addf %282, %283 : vector<16x64xf32>
    %285 = vector.extract_strided_slice %277 {offsets = [64, 0], sizes = [16, 64], strides = [1, 1]} : vector<112x64xf32> to vector<16x64xf32>
    %286 = arith.addf %284, %285 : vector<16x64xf32>
    %287 = vector.extract_strided_slice %277 {offsets = [80, 0], sizes = [16, 64], strides = [1, 1]} : vector<112x64xf32> to vector<16x64xf32>
    %288 = arith.addf %286, %287 : vector<16x64xf32>
    %289 = vector.extract_strided_slice %277 {offsets = [96, 0], sizes = [16, 64], strides = [1, 1]} : vector<112x64xf32> to vector<16x64xf32>
    %290 = arith.addf %288, %289 : vector<16x64xf32>
    %291 = arith.addf %259, %290 : vector<16x64xf32>
    %cst_104 = arith.constant 0.000000e+00 : f32
    %292 = vector.broadcast %cst_104 : f32 to vector<16x64xf32>
    %293 = arith.maximumf %291, %292 : vector<16x64xf32>
    %294 = vector.broadcast %1 : vector<16x1xf32> to vector<16x64xf32>
    %295 = arith.mulf %293, %294 : vector<16x64xf32>
    %296 = arith.truncf %167 : vector<16x32xf32> to vector<16x32xbf16>
    %c0_105 = arith.constant 0 : index
    %c0_106 = arith.constant 0 : index
    %297 = vector.load %arg23[%c0_105, %c0_106] : memref<32x128xbf16, #tpu.memory_space<vmem>>, vector<32x128xbf16>
    %cst_107 = arith.constant dense<0.000000e+00> : vector<16x128xf32>
    %298 = tpu.matmul %296, %297, %cst_107 {dimension_numbers = #tpu.dot_dimension_numbers<[1], [0], [0], [1], [0, 0, 1, 1], [], []>} : vector<16x32xbf16>, vector<32x128xbf16>, vector<16x128xf32> -> vector<16x128xf32>
    %299 = arith.truncf %295 : vector<16x64xf32> to vector<16x64xbf16>
    %c0_108 = arith.constant 0 : index
    %c0_109 = arith.constant 0 : index
    %300 = vector.load %arg24[%c0_108, %c0_109] : memref<64x128xbf16, #tpu.memory_space<vmem>>, vector<64x128xbf16>
    %cst_110 = arith.constant dense<0.000000e+00> : vector<16x128xf32>
    %301 = tpu.matmul %299, %300, %cst_110 {dimension_numbers = #tpu.dot_dimension_numbers<[1], [0], [0], [1], [0, 0, 1, 1], [], []>} : vector<16x64xbf16>, vector<64x128xbf16>, vector<16x128xf32> -> vector<16x128xf32>
    %302 = arith.addf %298, %301 : vector<16x128xf32>
    %c0_111 = arith.constant 0 : index
    %c0_112 = arith.constant 0 : index
    %303 = vector.load %arg25[%c0_111, %c0_112] : memref<1x128xf32, #tpu.memory_space<vmem>>, vector<1x128xf32>
    %304 = vector.broadcast %303 : vector<1x128xf32> to vector<16x128xf32>
    %305 = arith.addf %302, %304 : vector<16x128xf32>
    %cst_113 = arith.constant 0.000000e+00 : f32
    %306 = vector.broadcast %cst_113 : f32 to vector<16x128xf32>
    %307 = arith.maximumf %305, %306 : vector<16x128xf32>
    %308 = vector.broadcast %1 : vector<16x1xf32> to vector<16x128xf32>
    %309 = arith.mulf %307, %308 : vector<16x128xf32>
    %cst_114 = arith.constant dense<0.000000e+00> : vector<1xf32>
    %310 = vector.multi_reduction <add>, %1, %cst_114 [0] : vector<16x1xf32> to vector<1xf32>
    %311 = vector.shape_cast %310 : vector<1xf32> to vector<1x1xf32>
    %cst_115 = arith.constant 1.000000e+00 : f32
    %312 = vector.broadcast %cst_115 : f32 to vector<1x1xf32>
    %313 = arith.maximumf %311, %312 : vector<1x1xf32>
    %cst_116 = arith.constant dense<0.000000e+00> : vector<128xf32>
    %314 = vector.multi_reduction <add>, %309, %cst_116 [0] : vector<16x128xf32> to vector<128xf32>
    %315 = vector.shape_cast %314 : vector<128xf32> to vector<1x128xf32>
    %316 = vector.broadcast %313 : vector<1x1xf32> to vector<1x128xf32>
    %317 = arith.divf %315, %316 : vector<1x128xf32>
    %318 = arith.truncf %317 : vector<1x128xf32> to vector<1x128xbf16>
    %c0_117 = arith.constant 0 : index
    %c0_118 = arith.constant 0 : index
    %319 = vector.load %arg26[%c0_117, %c0_118] : memref<128x128xbf16, #tpu.memory_space<vmem>>, vector<128x128xbf16>
    %cst_119 = arith.constant dense<0.000000e+00> : vector<1x128xf32>
    %320 = tpu.matmul %318, %319, %cst_119 {dimension_numbers = #tpu.dot_dimension_numbers<[1], [0], [0], [1], [0, 0, 1, 1], [], []>} : vector<1x128xbf16>, vector<128x128xbf16>, vector<1x128xf32> -> vector<1x128xf32>
    %c0_120 = arith.constant 0 : index
    %c0_121 = arith.constant 0 : index
    %321 = vector.load %arg27[%c0_120, %c0_121] : memref<1x128xf32, #tpu.memory_space<vmem>>, vector<1x128xf32>
    %322 = arith.addf %320, %321 : vector<1x128xf32>
    %cst_122 = arith.constant 0.000000e+00 : f32
    %323 = vector.broadcast %cst_122 : f32 to vector<1x128xf32>
    %324 = arith.maximumf %322, %323 : vector<1x128xf32>
    %325 = arith.truncf %324 : vector<1x128xf32> to vector<1x128xbf16>
    %c0_123 = arith.constant 0 : index
    %c0_124 = arith.constant 0 : index
    %326 = vector.load %arg28[%c0_123, %c0_124] : memref<128x5xbf16, #tpu.memory_space<vmem>>, vector<128x5xbf16>
    %cst_125 = arith.constant dense<0.000000e+00> : vector<1x5xf32>
    %327 = tpu.matmul %325, %326, %cst_125 {dimension_numbers = #tpu.dot_dimension_numbers<[1], [0], [0], [1], [0, 0, 1, 1], [], []>} : vector<1x128xbf16>, vector<128x5xbf16>, vector<1x5xf32> -> vector<1x5xf32>
    %c0_126 = arith.constant 0 : index
    %c0_127 = arith.constant 0 : index
    %328 = vector.load %arg29[%c0_126, %c0_127] : memref<1x5xf32, #tpu.memory_space<vmem>>, vector<1x5xf32>
    %329 = arith.addf %327, %328 : vector<1x5xf32>
    %c0_128 = arith.constant 0 : index
    %c0_129 = arith.constant 0 : index
    %c0_130 = arith.constant 0 : index
    %330 = vector.load %arg30[%c0_128, %c0_129, %c0_130] : memref<1x1x5xf32, #tpu.memory_space<vmem>>, vector<1x1x5xf32>
    %331 = vector.shape_cast %330 : vector<1x1x5xf32> to vector<1x5xf32>
    %332 = vector.shape_cast %329 : vector<1x5xf32> to vector<1x1x5xf32>
    tpu.vector_store %arg30[%c0_128, %c0_129, %c0_130], %332 {strides = array<i32>} : memref<1x1x5xf32, #tpu.memory_space<vmem>>, vector<1x1x5xf32>,
    return
  }
  func.func @transform_0(%arg0: i32) -> (i32, i32, i32) {
    %c0_i32 = arith.constant 0 : i32
    %c0_i32_0 = arith.constant 0 : i32
    %c0_i32_1 = arith.constant 0 : i32
    return %arg0, %c0_i32, %c0_i32_0 : i32, i32, i32
  }
  func.func @transform_1(%arg0: i32) -> (i32, i32, i32) {
    %c0_i32 = arith.constant 0 : i32
    %c0_i32_0 = arith.constant 0 : i32
    %c0_i32_1 = arith.constant 0 : i32
    return %arg0, %c0_i32, %c0_i32_0 : i32, i32, i32
  }
  func.func @transform_2(%arg0: i32) -> (i32, i32, i32) {
    %c0_i32 = arith.constant 0 : i32
    %c0_i32_0 = arith.constant 0 : i32
    %c0_i32_1 = arith.constant 0 : i32
    return %arg0, %c0_i32, %c0_i32_0 : i32, i32, i32
  }
  func.func @transform_3(%arg0: i32) -> (i32, i32, i32) {
    %c0_i32 = arith.constant 0 : i32
    %c0_i32_0 = arith.constant 0 : i32
    %c0_i32_1 = arith.constant 0 : i32
    return %arg0, %c0_i32, %c0_i32_0 : i32, i32, i32
  }
  func.func @transform_4(%arg0: i32) -> (i32, i32) {
    %c0_i32 = arith.constant 0 : i32
    %c0_i32_0 = arith.constant 0 : i32
    %c0_i32_1 = arith.constant 0 : i32
    return %c0_i32, %c0_i32_0 : i32, i32
  }
  func.func @transform_5(%arg0: i32) -> (i32, i32) {
    %c0_i32 = arith.constant 0 : i32
    %c0_i32_0 = arith.constant 0 : i32
    %c0_i32_1 = arith.constant 0 : i32
    return %c0_i32, %c0_i32_0 : i32, i32
  }
  func.func @transform_6(%arg0: i32) -> (i32, i32) {
    %c0_i32 = arith.constant 0 : i32
    %c0_i32_0 = arith.constant 0 : i32
    %c0_i32_1 = arith.constant 0 : i32
    return %c0_i32, %c0_i32_0 : i32, i32
  }
  func.func @transform_7(%arg0: i32) -> (i32, i32) {
    %c0_i32 = arith.constant 0 : i32
    %c0_i32_0 = arith.constant 0 : i32
    %c0_i32_1 = arith.constant 0 : i32
    return %c0_i32, %c0_i32_0 : i32, i32
  }
  func.func @transform_8(%arg0: i32) -> (i32, i32) {
    %c0_i32 = arith.constant 0 : i32
    %c0_i32_0 = arith.constant 0 : i32
    %c0_i32_1 = arith.constant 0 : i32
    return %c0_i32, %c0_i32_0 : i32, i32
  }
  func.func @transform_9(%arg0: i32) -> (i32, i32) {
    %c0_i32 = arith.constant 0 : i32
    %c0_i32_0 = arith.constant 0 : i32
    %c0_i32_1 = arith.constant 0 : i32
    return %c0_i32, %c0_i32_0 : i32, i32
  }
  func.func @transform_10(%arg0: i32) -> (i32, i32) {
    %c0_i32 = arith.constant 0 : i32
    %c0_i32_0 = arith.constant 0 : i32
    %c0_i32_1 = arith.constant 0 : i32
    return %c0_i32, %c0_i32_0 : i32, i32
  }
  func.func @transform_11(%arg0: i32) -> (i32, i32) {
    %c0_i32 = arith.constant 0 : i32
    %c0_i32_0 = arith.constant 0 : i32
    %c0_i32_1 = arith.constant 0 : i32
    return %c0_i32, %c0_i32_0 : i32, i32
  }
  func.func @transform_12(%arg0: i32) -> (i32, i32) {
    %c0_i32 = arith.constant 0 : i32
    %c0_i32_0 = arith.constant 0 : i32
    %c0_i32_1 = arith.constant 0 : i32
    return %c0_i32, %c0_i32_0 : i32, i32
  }
  func.func @transform_13(%arg0: i32) -> (i32, i32) {
    %c0_i32 = arith.constant 0 : i32
    %c0_i32_0 = arith.constant 0 : i32
    %c0_i32_1 = arith.constant 0 : i32
    return %c0_i32, %c0_i32_0 : i32, i32
  }
  func.func @transform_14(%arg0: i32) -> (i32, i32) {
    %c0_i32 = arith.constant 0 : i32
    %c0_i32_0 = arith.constant 0 : i32
    %c0_i32_1 = arith.constant 0 : i32
    return %c0_i32, %c0_i32_0 : i32, i32
  }
  func.func @transform_15(%arg0: i32) -> (i32, i32) {
    %c0_i32 = arith.constant 0 : i32
    %c0_i32_0 = arith.constant 0 : i32
    %c0_i32_1 = arith.constant 0 : i32
    return %c0_i32, %c0_i32_0 : i32, i32
  }
  func.func @transform_16(%arg0: i32) -> (i32, i32) {
    %c0_i32 = arith.constant 0 : i32
    %c0_i32_0 = arith.constant 0 : i32
    %c0_i32_1 = arith.constant 0 : i32
    return %c0_i32, %c0_i32_0 : i32, i32
  }
  func.func @transform_17(%arg0: i32) -> (i32, i32) {
    %c0_i32 = arith.constant 0 : i32
    %c0_i32_0 = arith.constant 0 : i32
    %c0_i32_1 = arith.constant 0 : i32
    return %c0_i32, %c0_i32_0 : i32, i32
  }
  func.func @transform_18(%arg0: i32) -> (i32, i32) {
    %c0_i32 = arith.constant 0 : i32
    %c0_i32_0 = arith.constant 0 : i32
    %c0_i32_1 = arith.constant 0 : i32
    return %c0_i32, %c0_i32_0 : i32, i32
  }
  func.func @transform_19(%arg0: i32) -> (i32, i32) {
    %c0_i32 = arith.constant 0 : i32
    %c0_i32_0 = arith.constant 0 : i32
    %c0_i32_1 = arith.constant 0 : i32
    return %c0_i32, %c0_i32_0 : i32, i32
  }
  func.func @transform_20(%arg0: i32) -> (i32, i32) {
    %c0_i32 = arith.constant 0 : i32
    %c0_i32_0 = arith.constant 0 : i32
    %c0_i32_1 = arith.constant 0 : i32
    return %c0_i32, %c0_i32_0 : i32, i32
  }
  func.func @transform_21(%arg0: i32) -> (i32, i32) {
    %c0_i32 = arith.constant 0 : i32
    %c0_i32_0 = arith.constant 0 : i32
    %c0_i32_1 = arith.constant 0 : i32
    return %c0_i32, %c0_i32_0 : i32, i32
  }
  func.func @transform_22(%arg0: i32) -> (i32, i32) {
    %c0_i32 = arith.constant 0 : i32
    %c0_i32_0 = arith.constant 0 : i32
    %c0_i32_1 = arith.constant 0 : i32
    return %c0_i32, %c0_i32_0 : i32, i32
  }
  func.func @transform_23(%arg0: i32) -> (i32, i32) {
    %c0_i32 = arith.constant 0 : i32
    %c0_i32_0 = arith.constant 0 : i32
    %c0_i32_1 = arith.constant 0 : i32
    return %c0_i32, %c0_i32_0 : i32, i32
  }
  func.func @transform_24(%arg0: i32) -> (i32, i32) {
    %c0_i32 = arith.constant 0 : i32
    %c0_i32_0 = arith.constant 0 : i32
    %c0_i32_1 = arith.constant 0 : i32
    return %c0_i32, %c0_i32_0 : i32, i32
  }
  func.func @transform_25(%arg0: i32) -> (i32, i32) {
    %c0_i32 = arith.constant 0 : i32
    %c0_i32_0 = arith.constant 0 : i32
    %c0_i32_1 = arith.constant 0 : i32
    return %c0_i32, %c0_i32_0 : i32, i32
  }
  func.func @transform_26(%arg0: i32) -> (i32, i32) {
    %c0_i32 = arith.constant 0 : i32
    %c0_i32_0 = arith.constant 0 : i32
    %c0_i32_1 = arith.constant 0 : i32
    return %c0_i32, %c0_i32_0 : i32, i32
  }
  func.func @transform_27(%arg0: i32) -> (i32, i32) {
    %c0_i32 = arith.constant 0 : i32
    %c0_i32_0 = arith.constant 0 : i32
    %c0_i32_1 = arith.constant 0 : i32
    return %c0_i32, %c0_i32_0 : i32, i32
  }
  func.func @transform_28(%arg0: i32) -> (i32, i32) {
    %c0_i32 = arith.constant 0 : i32
    %c0_i32_0 = arith.constant 0 : i32
    %c0_i32_1 = arith.constant 0 : i32
    return %c0_i32, %c0_i32_0 : i32, i32
  }
  func.func @transform_29(%arg0: i32) -> (i32, i32, i32) {
    %c0_i32 = arith.constant 0 : i32
    %c0_i32_0 = arith.constant 0 : i32
    %c0_i32_1 = arith.constant 0 : i32
    return %arg0, %c0_i32, %c0_i32_0 : i32, i32, i32
  }
}

</mosaic_0001>

<bundles_post_ra>
// kernel: particlenet_fl_forward.1
= control target key start
LH: loop header
LB: loop body
LE: loop exit
PB: predicated region body
PF: predicated region fallthrough
CT: control target
= control target key end

     0   :  { %s4397_s6 = smov 1   ;;  %s4398_s10 = smov 2   ;;  %s5284_s0 = inlined_call_operand.smem [shape: u32[30], index: -1, kind: input, shape index: {}] }
   0x1   :  { %s4442_s5 = sld [smem:[%s5284_s0]]   ;;  %s4399_s14 = smov 3  }
   0x2   :  { %s4447_s9 = sld [smem:[%s5284_s0 + %s4397_s6]]   ;;  %s4400_s18 = smov 4  }
   0x3   :  { %s4452_s13 = sld [smem:[%s5284_s0 + %s4398_s10]]   ;;  %s4401_s22 = smov 5  }
   0x4   :  { %s4457_s17 = sld [smem:[%s5284_s0 + %s4399_s14]]   ;;  %s4402_s26 = smov 6  }
   0x5   :  { %s4462_s21 = sld [smem:[%s5284_s0 + %s4400_s18]]   ;;  %s4403_s30 = smov 7  }
   0x6   :  { %s4467_s25 = sld [smem:[%s5284_s0 + %s4401_s22]]   ;;  %s4404_s4 = smov 8  }
   0x7   :  { %5298 = sst [smem:[#allocation5_spill]] %s4442_s5  ;;  %s4405_s10 = smov 9  }
   0x8   :  { %5299 = sst [smem:[#allocation6_spill]] %s4447_s9  ;;  %s4406_s15 = smov 10  }
   0x9   :  { %5300 = sst [smem:[#allocation7_spill]] %s4452_s13  ;;  %s4407_s20 = smov 11  }
   0xa   :  { %s4472_s29 = sld [smem:[%s5284_s0 + %s4402_s26]]   ;;  %s4408_s26 = smov 12  }
   0xb   :  { %s4477_s3 = sld [smem:[%s5284_s0 + %s4403_s30]]   ;;  %s4409_s1 = smov 13  }
   0xc   :  { %s4482_s8 = sld [smem:[%s5284_s0 + %s4404_s4]]   ;;  %s4410_s7 = smov 14  }
   0xd   :  { %s4487_s14 = sld [smem:[%s5284_s0 + %s4405_s10]]   ;;  %s4412_s22 = smov 16  }
   0xe   :  { %s4492_s19 = sld [smem:[%s5284_s0 + %s4406_s15]]   ;;  %s4411_s15 = smov 15  }
   0xf   :  { %s4497_s24 = sld [smem:[%s5284_s0 + %s4407_s20]]   ;;  %s4413_s28 = smov 17  }
  0x10   :  { %s4502_s30 = sld [smem:[%s5284_s0 + %s4408_s26]]  }
  0x11   :  { %5301 = sst [smem:[#allocation8_spill]] %s4477_s3 }
  0x12   :  { %5302 = sst [smem:[#allocation9_spill]] %s4482_s8 }
  0x13   :  { %5303 = sst [smem:[#allocation10_spill]] %s4487_s14 }
  0x14   :  { %s4507_s6 = sld [smem:[%s5284_s0 + %s4409_s1]]  }
  0x15   :  { %s4512_s12 = sld [smem:[%s5284_s0 + %s4410_s7]]   ;;  %s4414_s7 = smov 18  }
  0x16   :  { %s4517_s20 = sld [smem:[%s5284_s0 + %s4411_s15]]   ;;  %s4415_s15 = smov 19  }
  0x17   :  { %s4522_s27 = sld [smem:[%s5284_s0 + %s4412_s22]]   ;;  %s4416_s22 = smov 20  }
  0x18   :  { %s4527_s4 = sld [smem:[%s5284_s0 + %s4413_s28]]   ;;  %s4417_s28 = smov 21  }
  0x1a   :  { %5304 = sst [smem:[#allocation11_spill]] %s4507_s6 }
  0x1b   :  { %5305 = sst [smem:[#allocation12_spill]] %s4512_s12 }
  0x1c   :  { %5306 = sst [smem:[#allocation13_spill]] %s4517_s20 }
  0x1d   :  { %5307 = sst [smem:[#allocation14_spill]] %s4522_s27 }
  0x1e   :  { %5308 = sst [smem:[#allocation15_spill]] %s4527_s4 }
  0x1f   :  { %s4532_s12 = sld [smem:[%s5284_s0 + %s4414_s7]]   ;;  %s4418_s7 = smov 22  }
  0x20   :  { %s4537_s20 = sld [smem:[%s5284_s0 + %s4415_s15]]   ;;  %s4419_s15 = smov 23  }
  0x21   :  { %s4542_s27 = sld [smem:[%s5284_s0 + %s4416_s22]]   ;;  %s4420_s22 = smov 24  }
  0x22   :  { %s4547_s4 = sld [smem:[%s5284_s0 + %s4417_s28]]   ;;  %s4421_s28 = smov 25  }
  0x25   :  { %5309 = sst [smem:[#allocation16_spill]] %s4532_s12 }
  0x26   :  { %5310 = sst [smem:[#allocation17_spill]] %s4537_s20 }
  0x27   :  { %5311 = sst [smem:[#allocation18_spill]] %s4542_s27 }
  0x28   :  { %5312 = sst [smem:[#allocation19_spill]] %s4547_s4 }
  0x29   :  { %s4552_s12 = sld [smem:[%s5284_s0 + %s4418_s7]]   ;;  %s4422_s7 = smov 26  }
  0x2a   :  { %s4557_s20 = sld [smem:[%s5284_s0 + %s4419_s15]]   ;;  %s4423_s15 = smov 27  }
  0x2b   :  { %s4562_s27 = sld [smem:[%s5284_s0 + %s4420_s22]]   ;;  %s4424_s22 = smov 28  }
  0x2c   :  { %s4567_s4 = sld [smem:[%s5284_s0 + %s4421_s28]]   ;;  %s4425_s28 = smov 29  }
  0x2f   :  { %5313 = sst [smem:[#allocation20_spill]] %s4552_s12 }
  0x30   :  { %5314 = sst [smem:[#allocation21_spill]] %s4557_s20 }
  0x31   :  { %5315 = sst [smem:[#allocation22_spill]] %s4562_s27 }
  0x32   :  { %5316 = sst [smem:[#allocation23_spill]] %s4567_s4 }
  0x33   :  { %s4572_s12 = sld [smem:[%s5284_s0 + %s4422_s7]]  }
  0x34   :  { %s4577_s20 = sld [smem:[%s5284_s0 + %s4423_s15]]  }
  0x35   :  { %s4582_s27 = sld [smem:[%s5284_s0 + %s4424_s22]]  }
  0x36   :  { %s4587_s4 = sld [smem:[%s5284_s0 + %s4425_s28]]  }
  0x39   :  { %5317 = sst [smem:[#allocation24_spill]] %s4572_s12 }
  0x3a   :  { %64 = vsyncpa [#allocation3], 0 }
  0x3b   :  { %66 = vsyncpa [#allocation3 + $0x1], 0  ;;  %s4589_s7 = smov 0   ;;  %s4591_s10 = smov 0  }
  0x3c   :  { %s4593_s11 = smov 0   ;;  %s4595_s15 = smov 0  }
  0x3d LB: > { %s4610_s0 = sadd.s32 4294967295, %s4395_s15   ;;  %s3534_s16 = sadd.s32 4294967294, %s4395_s15   ;;  %s4395_s15 = sphi %s4595_s15, %s5346_s15   ;;  %s4391_s11 = sphi %s4593_s11, %s5345_s11   ;;  %s4387_s10 = sphi %s4591_s10, %s5344_s10   ;;  %s4383_s7 = sphi %s4589_s7, %s5343_s7  }
  0x3e   : > { %s4614_s18 = sadd.s32 1, %s4395_s15   ;;  %s708_s22 = sadd.s32 1, %s4391_s11 }
  0x3f   : > { %s705_s23 = ssub.s32 %s4395_s15, %s4614_s18  ;;  %p718_p0 = scmp.ne.s32.totalorder %s4391_s11, %s4387_s10 }
  0x40   : > { %p706_p1 = scmp.eq.s32.totalorder %s705_s23, 0  ;;  %p719_p2 = scmp.eq.s32.totalorder %s4610_s0, 1 }
  0x41   : > { %p724_p3 = scmp.ne.s32.totalorder %s4387_s10, %s4383_s7  ;;  %p725_p4 = scmp.eq.s32.totalorder %s3534_s16, 1 }
  0x42   : > { %s4625_s26 = scalar_select %p706_p1, %s4391_s11, %s708_s22  }
  0x43   : > { %p4627_p5 = por %p719_p2, %p718_p0  ;;  %p4631_p6 = por %p725_p4, %p724_p3 }
  0x44   : > { %p3537_p7 = scmp.ge.s32.totalorder %s4395_s15, 1  ;;  %p848_p8 = scmp.lt.s32.totalorder %s4395_s15, 3 }
  0x46   : > { %p849_p9 = pnand %p3537_p7, %p848_p8 }
  0x47   : > { %s5320_s13 = sld [smem:[#allocation7_spill]] (!%p849_p9)  ;;  %p936_p10 = scmp.lt.s32.totalorder (!%p849_p9), %s4610_s0, 1  ;;  %v4426_v0 = vmov (!%p849_p9), 0   ;;  %vm3164_vm0 = vcmask (!%p849_p9), 7168   ;;  %v4291_v6 = vld [vmem:[%s4472_s29] sm:$0xff] (!%p849_p9)   ;;  %v4427_v7 = vmov (!%p849_p9), 0.0   ;;  %v996_v33 = vlaneseq (!%p849_p9) }
  0x48   : > { %852 = sbr.rel (%p849_p9) target bundleno = 5684 (0x1634), region = 136  ;;  %4284 = vset.pattern.permute.xlu0 (!%p849_p9), %v4426_v0  ;;  %4290 = vset.pattern.permute.xlu1 (!%p849_p9), %v4426_v0  ;;  %s5321_s9 = sld [smem:[#allocation6_spill]] (!%p849_p9)  ;;  %vm4428_vm1 = vmmov (!%p849_p9), 0   ;;  %vm1036_vm2 = vcmask (!%p849_p9), 130048   ;;  %v3544_v11 = vld [vmem:[%s4462_s21] ss:$0 sm:$0xff] (!%p849_p9) }
  0x49   : > { %s5322_s5 = sld [smem:[#allocation5_spill]] (!%p849_p9)  ;;  %3869 = vmatprep.subr.bf16.mxu1 (!%p849_p9), %v4427_v7  ;;  %3871 = vmatprep.mubr.msk.bf16.mxu1 (!%p849_p9), %vm4428_vm1, %v4427_v7  ;;  %v3545_v18 = vld [vmem:[%s4467_s25] ss:$0 sm:$0xff] (!%p849_p9)  ;;  %vm4665_vm3 = vmpackc.low (!%p849_p9), %vm1036_vm2, %vm1036_vm2  ;;  %v4429_v32 = vmov (!%p849_p9), 1.0   ;;  %v997_v35 = vshrl.u32 (!%p849_p9), %v996_v33, 7  ;;  %v1000_v38 = vand.u32 (!%p849_p9), 127, %v996_v33 }
  0x4a   : > { %3870 = vmatpush3.bf16.msra.mxu1 (!%p849_p9), %v4291_v6  ;;  %s5325_s14 = sld [smem:[#allocation10_spill]] (!%p849_p9)  ;;  %s5326_s3 = sld [smem:[#allocation8_spill]] (!%p849_p9) }
  0x4b   : > { %3875 = vmatprep.subr.bf16.mxu1 (!%p849_p9), %v4427_v7  ;;  %v998_v37 = vadd.s32 (!%p849_p9), 8, %v997_v35  ;;  %v1011_v42 = vsub.s32 (!%p849_p9), 0, %v997_v35  ;;  %vm1002_vm5 = vcmp.eq.s32.totalorder (!%p849_p9), %v997_v35, %v1000_v38  ;;  %v4704_v59 = vsub.s32 (!%p849_p9), 15, %v1000_v38  ;;  %s5327_s8 = sld [smem:[#allocation9_spill]] (!%p849_p9)  ;;  %s5328_s6 = sld [smem:[#allocation11_spill]] (!%p849_p9) }
  0x4c   : > { %v1004_v49 = vsel (!%p849_p9), %vm1002_vm5, -1e+38, %v4427_v7  ;;  %s5342_s12 = sld [smem:[#allocation24_spill]] (!%p849_p9) }
  0x4d   : > { %vm1003_vm4 = vcmp.eq.s32.totalorder (!%p849_p9), %v998_v37, %v1000_v38 }
  0x4e   : > { %v1005_v48 = vsel (!%p849_p9), %vm1003_vm4, -1e+38, %v4427_v7 }
  0x4f   : > { %s4639_s2 = scalar_select %p936_p10, %s4610_s0, 1 }
  0x51   : > { %s3702_s16 = sshll.u32 %s4639_s2, 4 }
  0x52   : > { %s950_s22 = scalar_lea.vmem %s5320_s13, %s3702_s16  ;;  %s945_s23 = scalar_lea.vmem %s5321_s9, %s3702_s16 }
  0x53   : > { %v955_v1 = vld [vmem:[%s950_s22] sm:$0xff]  ;;  %v956_v3 = vld [vmem:[%s950_s22 + $0x8] sm:$0xff]  ;;  %s940_s13 = scalar_lea.vmem %s5322_s5, %s3702_s16  ;;  %s4431_s16 = smov 96  }
  0x54   : > { %962 = vperm.xlu0 %4284, %v955_v1   ;;  %v3165_v2 = vsel %vm3164_vm0, %v955_v1, 0.0  ;;  %v3166_v4 = vsel %vm3164_vm0, %v956_v3, 0.0  ;;  %v972_v8 = vld [vmem:[%s945_s23] sm:$0xff]  ;;  %v973_v14 = vld [vmem:[%s945_s23 + $0x8] sm:$0xff]  ;;  %s5329_s22 = sld [smem:[#allocation12_spill]]  ;;  %s5330_s23 = sld [smem:[#allocation14_spill]] }
  0x55   : > { %v4643_v5 = vadd.f32 %v3166_v4, %v3165_v2  ;;  %v958_v9 = vld [vmem:[%s940_s13] sm:$0xff]  ;;  %v959_v15 = vld [vmem:[%s940_s13 + $0x8] sm:$0xff]  ;;  %s953_s13 = scalar_lea.vmem %s4457_s17, %s4639_s2  ;;  %s4430_s2 = smov 32  }
  0x56   : > { %v957_v34 = vld [vmem:[%s953_s13] sm:$0x1]  ;;  %s5331_s13 = sld [smem:[#allocation15_spill]]  ;;  %s5339_s5 = sld [smem:[#allocation20_spill]] }
  0x57   : > { %v1006_v36 = vsub.f32 1.0, %v957_v34 }
  0x58   : > { %967 = vperm.xlu0 %4284, %v956_v3   ;;  %v4712_v3 = vor.u32 -1.9999981e+38, %v4704_v59 }
  0x59   : > { %v1007_v41 = vmul.f32 -1e+12, %v1006_v36 }
  0x5b   : > { %v1012_v47 = vrot.slane %v1007_v41, %v1011_v42 }
  0x5d   : > { %v4699_v51 = vadd.f32 %v1012_v47, %v1005_v48  ;;  %v4701_v54 = vadd.f32 %v1012_v47, %v1004_v49  ;;  %v3577_v49 = vld [vmem:[%s5326_s3] ss:$0 sm:$0xff]  ;;  %s5338_s3 = smov 64  }
  0xd3   : > { %v4652_v10 = vpop.permute.xlu0 %962 }
  0xd4   : > { %v974_v12 = vmul.f32 %v972_v8, %v4652_v10  ;;  %v970_v13 = vmul.f32 %v4652_v10, %v958_v9 }
  0xd6   : > { %3829 = vmatprep.mubr.msk.f32.mxu0 %vm1036_vm2, %v970_v13  ;;  %v983_v16 = vmul.f32 %v3544_v11, %v974_v12  ;;  %v1120_v21 = vmul.f32 %v970_v13, %v970_v13 }
  0xd7   : > { %v4658_v17 = vpop.permute.xlu0 %967 }
  0xd8   : > { %v975_v19 = vmul.f32 %v973_v14, %v4658_v17  ;;  %v971_v20 = vmul.f32 %v4658_v17, %v959_v15  ;;  %v992_v26 = vadd.f32 %v3545_v18, %v983_v16  ;;  %v4292_v16 = vld [vmem:[%s5325_s14] sm:$0xff]  }
  0xda   : > { %v4185_v23 = vpack.c.bf16 %v971_v20, %v970_v13  ;;  %v1121_v24 = vmul.f32 %v971_v20, %v971_v20  ;;  %v984_v25 = vmul.f32 %v3544_v11, %v975_v19  ;;  %v994_v29 = vmul.f32 %v992_v26, %v4652_v10 }
  0xdc   : > { %4187 = vmatprep.subr.msk.bf16.mxu0 %vm4665_vm3, %v4185_v23  ;;  %v4191_v27 = vpack.c.bf16 %v1121_v24, %v1120_v21  ;;  %v993_v28 = vadd.f32 %v3545_v18, %v984_v25 }
  0xdd   : > { %4190 = vmatpush3.bf16.xpose.msk.msra.mxu0 %vm4665_vm3, %v4185_v23 }
  0xde   : > { %4193 = vmatprep.subr.msk.bf16.mxu0 %vm4665_vm3, %v4191_v27  ;;  %v995_v30 = vmul.f32 %v993_v28, %v4658_v17 }
  0xe0   : > { %v1333_v31 = vpack.c.bf16 %v995_v30, %v994_v29 }
  0xe2   : > { %3872 = vmatmul.mubr.msk.bf16.vlgmr.msra.gmra.mrb[0].mxu1 %vm1036_vm2, %v1333_v31 }
  0xe3   : > { %3877 = vmatprep.mubr.msk.bf16.mxu1 %vm4428_vm1, %v4427_v7  ;;  %3876 = vmatpush3.bf16.msra.mxu1 %v4292_v16 }
  0xe4   : > { %3830 = vmatmul.mubr.msk.f32.vlgmr.msra.gmra.mrb[0].mxu0 %vm1036_vm2, %v971_v20  ;;  %3937 = vmatprep.subr.bf16.mxu1 %v4427_v7 }
  0xe5   : > { %4196 = vmatpush3.bf16.xpose.msk.msra.mxu0 %vm4665_vm3, %v4191_v27  ;;  %3836 = vmatprep.mubr.msk.f32.mxu0 %vm1036_vm2, %v4429_v32 }
  0xe6   : > { %3839 = vmatprep.subr.bf16.mxu0 %v4427_v7 }
  0xec   : > { %3837 = vmatmul.mubr.msk.f32.vlgmr.msra.gmra.mrb[2].mxu0 %vm1036_vm2, %v4429_v32 }
  0xed   : > { %3840 = vmatpush3.bf16.msra.mxu0 %v1333_v31  ;;  %3841 = vmatprep.mubr.msk.bf16.mxu0 %vm4428_vm1, %v4427_v7 }
  0xee   : > { %3905 = vmatprep.subr.bf16.mxu0 %v4427_v7 }
 0x1b5   : > { %v4693_v39 = vpop.f32.mrb[0].mxu1 }
 0x1b6   : > { %v3873_v40 = vpop.f32.mrb[1].mxu1 }
 0x1b7   : > { %v3831_v43 = vpop.f32.mrb[0].mxu0  ;;  %v4695_v44 = vpop.f32.mrb[2].mxu1 }
 0x1b8   : > { %v1109_v45 = vpop.f32.mrb[1].mxu0  ;;  %v3874_v46 = vpop.f32.mrb[3].mxu1  ;;  %v1119_v50 = vmul.f32 2.0, %v3831_v43 }
 0x1b9   : > { %v1118_v52 = vmul.f32 2.0, %v1109_v45 }
 0x1bf   : > { %v3838_v53 = vpop.f32.mrb[2].mxu0 }
 0x1c0   : > { %v1207_v55 = vsub.f32 %v1119_v50, %v3838_v53  ;;  %v1197_v56 = vpop.f32.mrb[3].mxu0  ;;  %v4751_v50 = vadd.f32 %v3577_v49, %v4693_v39  ;;  %v4754_v53 = vadd.f32 %v3577_v49, %v4695_v44 }
 0x1c1   : > { %v1206_v57 = vsub.f32 %v1118_v52, %v1197_v56 }
 0x1c2   : > { %v1209_v58 = vadd.f32 %v1207_v55, %v4699_v51 }
 0x1c3   : > { %v1208_v60 = vadd.f32 %v1206_v57, %v4701_v54 }
 0x1c4   : > { %v1213_v61 = vand.u32 4294967280, %v1209_v58 }
 0x1c5   : > { %v1212_v62 = vand.u32 4294967280, %v1208_v60 }
 0x1c6   : > { %v1215_v1 = vor.u32 %v1213_v61, %v4704_v59 }
 0x1c7   : > { %v1214_v63 = vor.u32 %v1212_v62, %v4704_v59 }
 0x1c8   : > { %v1221_v2 = vsel %vm1036_vm2, %v1215_v1, -inf }
 0x1c9   : > { %v1218_v0 = vsel %vm1036_vm2, %v1214_v63, -inf }
 0x1ca   : > { %1219 = vmax.xlane.f32.xlu1 %v1218_v0 }
 0x1ce   : > { %1222 = vmax.xlane.f32.xlu1 %v1221_v2 }
 0x257   : > { %v1220_v4 = vpop.xlane.xlu1 %1219 }
 0x258   : > { %vm1224_vm6 = vcmp.eq.f32.partialorder %v1214_v63, %v1220_v4 }
 0x259   : > { %v3554_v6 = vsel %vm1224_vm6, 1.0, %v4427_v7 }
 0x25a   : > { %vm1230_vm7 = vcmp.gt.f32.partialorder %v3554_v6, 0.0 }
 0x25b   : > { %v1223_v8 = vpop.xlane.xlu1 %1222  ;;  %v1232_v9 = vsel %vm1230_vm7, %v4712_v3, %v1214_v63 }
 0x25c   : > { %vm1225_vm8 = vcmp.eq.f32.partialorder %v1215_v1, %v1223_v8  ;;  %v1234_v11 = vsel %vm1036_vm2, %v1232_v9, -inf }
 0x25d   : > { %v3555_v12 = vsel %vm1225_vm8, 1.0, %v4427_v7  ;;  %1235 = vmax.xlane.f32.xlu0 %v1234_v11 }
 0x25e   : > { %vm1231_vm9 = vcmp.gt.f32.partialorder %v3555_v12, 0.0  ;;  %v1326_v13 = vpack.c.bf16 %v3555_v12, %v3554_v6 }
 0x25f   : > { %v1233_v14 = vsel %vm1231_vm9, %v4712_v3, %v1215_v1 }
 0x260   : > { %3842 = vmatmul.mubr.msk.bf16.vlgmr.msra.gmra.mrb[4].mxu0 %vm1036_vm2, %v1326_v13  ;;  %v1237_v15 = vsel %vm1036_vm2, %v1233_v14, -inf }
 0x261   : > { %1238 = vmax.xlane.f32.xlu1 %v1237_v15  ;;  %3845 = vmatprep.mubr.msk.bf16.mxu0 %vm4428_vm1, %v4427_v7 }
 0x2ea   : > { %v1236_v18 = vpop.xlane.xlu0 %1235 }
 0x2eb   : > { %vm1240_vm10 = vcmp.eq.f32.partialorder %v1232_v9, %v1236_v18 }
 0x2ec   : > { %v3556_v19 = vsel %vm1240_vm10, 1.0, %v4427_v7 }
 0x2ed   : > { %vm1246_vm11 = vcmp.gt.f32.partialorder %v3556_v19, 0.0 }
 0x2ee   : > { %v1239_v20 = vpop.xlane.xlu1 %1238  ;;  %v1248_v21 = vsel %vm1246_vm11, %v4712_v3, %v1232_v9 }
 0x2ef   : > { %vm1241_vm12 = vcmp.eq.f32.partialorder %v1233_v14, %v1239_v20  ;;  %v1250_v22 = vsel %vm1036_vm2, %v1248_v21, -inf }
 0x2f0   : > { %v3557_v23 = vsel %vm1241_vm12, 1.0, %v4427_v7  ;;  %1251 = vmax.xlane.f32.xlu1 %v1250_v22 }
 0x2f1   : > { %vm1247_vm13 = vcmp.gt.f32.partialorder %v3557_v23, 0.0  ;;  %v1327_v24 = vpack.c.bf16 %v3557_v23, %v3556_v19 }
 0x2f2   : > { %v1249_v25 = vsel %vm1247_vm13, %v4712_v3, %v1233_v14 }
 0x2f3   : > { %3846 = vmatmul.mubr.msk.bf16.gmra.mrb[8].mxu0 %vm1036_vm2, %v1327_v24  ;;  %v1253_v26 = vsel %vm1036_vm2, %v1249_v25, -inf }
 0x2f4   : > { %1254 = vmax.xlane.f32.xlu1 %v1253_v26  ;;  %3849 = vmatprep.mubr.msk.bf16.mxu0 %vm4428_vm1, %v4427_v7 }
 0x333   : > { %v1389_v27 = vpop.f32.mrb[4].mxu0 }
 0x334   : > { %v3843_v28 = vpop.f32.mrb[5].mxu0 }
 0x335   : > { %v1392_v29 = vpop.f32.mrb[6].mxu0 }
 0x336   : > { %v1512_v30 = vpack.c.bf16 %v1392_v29, %v1389_v27  ;;  %v3844_v31 = vpop.f32.mrb[7].mxu0 }
 0x338   : > { %3878 = vmatmul.mubr.msk.bf16.vlgmr.msra.gmra.mrb[4].mxu1 %vm1036_vm2, %v1512_v30 }
 0x339   : > { %3881 = vmatprep.mubr.msk.bf16.mxu1 %vm4428_vm1, %v4427_v7 }
 0x37d   : > { %v1252_v33 = vpop.xlane.xlu1 %1251 }
 0x37e   : > { %vm1256_vm14 = vcmp.eq.f32.partialorder %v1248_v21, %v1252_v33 }
 0x37f   : > { %v3558_v34 = vsel %vm1256_vm14, 1.0, %v4427_v7 }
 0x380   : > { %vm1262_vm15 = vcmp.gt.f32.partialorder %v3558_v34, 0.0 }
 0x381   : > { %v1255_v35 = vpop.xlane.xlu1 %1254  ;;  %v1264_v36 = vsel %vm1262_vm15, %v4712_v3, %v1248_v21 }
 0x382   : > { %vm1257_vm0 = vcmp.eq.f32.partialorder %v1249_v25, %v1255_v35  ;;  %v1266_v37 = vsel %vm1036_vm2, %v1264_v36, -inf }
 0x383   : > { %v3559_v38 = vsel %vm1257_vm0, 1.0, %v4427_v7  ;;  %1267 = vmax.xlane.f32.xlu1 %v1266_v37 }
 0x384   : > { %vm1263_vm3 = vcmp.gt.f32.partialorder %v3559_v38, 0.0  ;;  %v1328_v40 = vpack.c.bf16 %v3559_v38, %v3558_v34 }
 0x385   : > { %v1265_v41 = vsel %vm1263_vm3, %v4712_v3, %v1249_v25 }
 0x386   : > { %3850 = vmatmul.mubr.msk.bf16.gmra.mrb[12].mxu0 %vm1036_vm2, %v1328_v40  ;;  %v1269_v42 = vsel %vm1036_vm2, %v1265_v41, -inf }
 0x387   : > { %1270 = vmax.xlane.f32.xlu1 %v1269_v42  ;;  %3853 = vmatprep.mubr.msk.bf16.mxu0 %vm4428_vm1, %v4427_v7 }
 0x3c6   : > { %v1397_v43 = vpop.f32.mrb[8].mxu0 }
 0x3c7   : > { %v3847_v45 = vpop.f32.mrb[9].mxu0 }
 0x3c8   : > { %v1400_v46 = vpop.f32.mrb[10].mxu0 }
 0x3c9   : > { %v1513_v47 = vpack.c.bf16 %v1400_v46, %v1397_v43  ;;  %v3848_v48 = vpop.f32.mrb[11].mxu0 }
 0x3cb   : > { %3882 = vmatmul.mubr.msk.bf16.gmra.mrb[8].mxu1 %vm1036_vm2, %v1513_v47 }
 0x3cc   : > { %3885 = vmatprep.mubr.msk.bf16.mxu1 %vm4428_vm1, %v4427_v7 }
 0x40b   : > { %v1580_v52 = vpop.f32.mrb[4].mxu1 }
 0x40c   : > { %v1635_v55 = vadd.f32 %v1580_v52, %v4751_v50  ;;  %v3879_v56 = vpop.f32.mrb[5].mxu1 }
 0x40d   : > { %v1583_v57 = vpop.f32.mrb[6].mxu1 }
 0x40e   : > { %v1636_v58 = vadd.f32 %v1583_v57, %v4754_v53  ;;  %v3880_v60 = vpop.f32.mrb[7].mxu1  ;;  %v1649_v61 = vmax.f32 %v1635_v55, 0.0 }
 0x410   : > { %v1650_v62 = vmax.f32 %v1636_v58, 0.0  ;;  %v1268_v63 = vpop.xlane.xlu1 %1267 }
 0x411   : > { %vm1272_vm4 = vcmp.eq.f32.partialorder %v1264_v36, %v1268_v63 }
 0x412   : > { %v4758_v0 = vpack.c.bf16 %v1650_v62, %v1649_v61  ;;  %v3560_v1 = vsel %vm1272_vm4, 1.0, %v4427_v7  ;;  %vm1688_vm4 = vcmask 261120  }
 0x413   : > { %vm1278_vm5 = vcmp.gt.f32.partialorder %v3560_v1, 0.0 }
 0x414   : > { %v1271_v2 = vpop.xlane.xlu1 %1270  ;;  %v1280_v4 = vsel %vm1278_vm5, %v4712_v3, %v1264_v36  ;;  %vm4198_vm5 = vmpackc.low %vm1688_vm4, %vm1688_vm4 }
 0x415   : > { %vm1273_vm6 = vcmp.eq.f32.partialorder %v1265_v41, %v1271_v2  ;;  %v1282_v6 = vsel %vm1036_vm2, %v1280_v4, -inf }
 0x416   : > { %v3561_v8 = vsel %vm1273_vm6, 1.0, %v4427_v7  ;;  %1283 = vmax.xlane.f32.xlu1 %v1282_v6 }
 0x417   : > { %vm1279_vm7 = vcmp.gt.f32.partialorder %v3561_v8, 0.0  ;;  %v1329_v9 = vpack.c.bf16 %v3561_v8, %v3560_v1  ;;  %v3578_v8 = vld [vmem:[%s5327_s8] ss:$0 sm:$0xff] }
 0x418   : > { %v1281_v11 = vsel %vm1279_vm7, %v4712_v3, %v1265_v41 }
 0x419   : > { %3854 = vmatmul.mubr.msk.bf16.gmra.mrb[16].mxu0 %vm1036_vm2, %v1329_v9  ;;  %v1285_v12 = vsel %vm1036_vm2, %v1281_v11, -inf  ;;  %v4293_v9 = vld [vmem:[%s4492_s19] sm:$0xff]  }
 0x41a   : > { %1286 = vmax.xlane.f32.xlu1 %v1285_v12  ;;  %3857 = vmatprep.mubr.msk.bf16.mxu0 %vm4428_vm1, %v4427_v7 }
 0x41b   : > { %3906 = vmatpush3.bf16.msra.mxu0 %v4293_v9 }
 0x41c   : > { %3907 = vmatprep.subr.bf16.mxu0 %v4427_v7 }
 0x459   : > { %v1405_v13 = vpop.f32.mrb[12].mxu0 }
 0x45a   : > { %v3851_v14 = vpop.f32.mrb[13].mxu0 }
 0x45b   : > { %v1408_v15 = vpop.f32.mrb[14].mxu0 }
 0x45c   : > { %v1514_v16 = vpack.c.bf16 %v1408_v15, %v1405_v13  ;;  %v3852_v18 = vpop.f32.mrb[15].mxu0 }
 0x45e   : > { %3886 = vmatmul.mubr.msk.bf16.gmra.mrb[12].mxu1 %vm1036_vm2, %v1514_v16 }
 0x45f   : > { %3889 = vmatprep.mubr.msk.bf16.mxu1 %vm4428_vm1, %v4427_v7 }
 0x49e   : > { %v1588_v19 = vpop.f32.mrb[8].mxu1 }
 0x49f   : > { %v1637_v20 = vadd.f32 %v1588_v19, %v4751_v50  ;;  %v3883_v21 = vpop.f32.mrb[9].mxu1 }
 0x4a0   : > { %v1591_v22 = vpop.f32.mrb[10].mxu1 }
 0x4a1   : > { %v1638_v23 = vadd.f32 %v1591_v22, %v4754_v53  ;;  %v3884_v24 = vpop.f32.mrb[11].mxu1  ;;  %v1651_v25 = vmax.f32 %v1637_v20, 0.0 }
 0x4a3   : > { %v1652_v26 = vmax.f32 %v1638_v23, 0.0  ;;  %v1284_v27 = vpop.xlane.xlu1 %1283 }
 0x4a4   : > { %vm1288_vm8 = vcmp.eq.f32.partialorder %v1280_v4, %v1284_v27 }
 0x4a5   : > { %v4774_v28 = vpack.c.bf16 %v1652_v26, %v1651_v25  ;;  %v3562_v29 = vsel %vm1288_vm8, 1.0, %v4427_v7 }
 0x4a6   : > { %vm1294_vm9 = vcmp.gt.f32.partialorder %v3562_v29, 0.0 }
 0x4a7   : > { %v1287_v30 = vpop.xlane.xlu1 %1286  ;;  %v1296_v31 = vsel %vm1294_vm9, %v4712_v3, %v1280_v4 }
 0x4a8   : > { %vm1289_vm10 = vcmp.eq.f32.partialorder %v1281_v11, %v1287_v30  ;;  %v1298_v33 = vsel %vm1036_vm2, %v1296_v31, -inf }
 0x4a9   : > { %v3563_v34 = vsel %vm1289_vm10, 1.0, %v4427_v7  ;;  %1299 = vmax.xlane.f32.xlu1 %v1298_v33 }
 0x4aa   : > { %vm1295_vm11 = vcmp.gt.f32.partialorder %v3563_v34, 0.0  ;;  %v1330_v35 = vpack.c.bf16 %v3563_v34, %v3562_v29 }
 0x4ab   : > { %v1297_v36 = vsel %vm1295_vm11, %v4712_v3, %v1281_v11  ;;  %v4294_v11 = vld [vmem:[%s4492_s19 + $0x8] sm:$0xff]  }
 0x4ac   : > { %3858 = vmatmul.mubr.msk.bf16.gmra.mrb[20].mxu0 %vm1036_vm2, %v1330_v35  ;;  %v1301_v37 = vsel %vm1036_vm2, %v1297_v36, -inf }
 0x4ad   : > { %1302 = vmax.xlane.f32.xlu0 %v1301_v37  ;;  %3861 = vmatprep.mubr.msk.bf16.mxu0 %vm4428_vm1, %v4427_v7 }
 0x4ae   : > { %3908 = vmatpush3.bf16.msra.mxu0 %v4294_v11 }
 0x4ec   : > { %v1413_v38 = vpop.f32.mrb[16].mxu0 }
 0x4ed   : > { %v3855_v40 = vpop.f32.mrb[17].mxu0 }
 0x4ee   : > { %v1416_v41 = vpop.f32.mrb[18].mxu0 }
 0x4ef   : > { %v1515_v42 = vpack.c.bf16 %v1416_v41, %v1413_v38  ;;  %v3856_v43 = vpop.f32.mrb[19].mxu0  ;;  %v4296_v38 = vld [vmem:[%s4502_s30 + $0x8] sm:$0xff]  }
 0x4f1   : > { %3890 = vmatmul.mubr.msk.bf16.gmra.mrb[16].mxu1 %vm1036_vm2, %v1515_v42 }
 0x4f2   : > { %3893 = vmatprep.mubr.msk.bf16.mxu1 %vm4428_vm1, %v4427_v7 }
 0x531   : > { %v1596_v45 = vpop.f32.mrb[12].mxu1 }
 0x532   : > { %v1639_v46 = vadd.f32 %v1596_v45, %v4751_v50  ;;  %v3887_v47 = vpop.f32.mrb[13].mxu1 }
 0x533   : > { %v1599_v48 = vpop.f32.mrb[14].mxu1 }
 0x534   : > { %v1640_v49 = vadd.f32 %v1599_v48, %v4754_v53  ;;  %v3888_v52 = vpop.f32.mrb[15].mxu1  ;;  %v1653_v55 = vmax.f32 %v1639_v46, 0.0 }
 0x536   : > { %v1654_v56 = vmax.f32 %v1640_v49, 0.0  ;;  %v1300_v57 = vpop.xlane.xlu1 %1299 }
 0x537   : > { %vm1304_vm12 = vcmp.eq.f32.partialorder %v1296_v31, %v1300_v57 }
 0x538   : > { %v1665_v58 = vpack.c.bf16 %v1654_v56, %v1653_v55  ;;  %v3564_v60 = vsel %vm1304_vm12, 1.0, %v4427_v7 }
 0x539   : > { %vm1310_vm13 = vcmp.gt.f32.partialorder %v3564_v60, 0.0 }
 0x53a   : > { %v1303_v61 = vpop.xlane.xlu0 %1302  ;;  %v1312_v62 = vsel %vm1310_vm13, %v4712_v3, %v1296_v31 }
 0x53b   : > { %vm1305_vm14 = vcmp.eq.f32.partialorder %v1297_v36, %v1303_v61  ;;  %v1314_v63 = vsel %vm1036_vm2, %v1312_v62, -inf }
 0x53c   : > { %v3565_v1 = vsel %vm1305_vm14, 1.0, %v4427_v7  ;;  %1315 = vmax.xlane.f32.xlu1 %v1314_v63 }
 0x53d   : > { %vm1311_vm15 = vcmp.gt.f32.partialorder %v3565_v1, 0.0  ;;  %v1331_v2 = vpack.c.bf16 %v3565_v1, %v3564_v60  ;;  %v4842_v60 = vld [vmem:[%s4497_s24] ss:$0 sm:$0xff] }
 0x53e   : > { %v1313_v4 = vsel %vm1311_vm15, %v4712_v3, %v1297_v36 }
 0x53f   : > { %3862 = vmatmul.mubr.msk.bf16.gmra.mrb[24].mxu0 %vm1036_vm2, %v1331_v2  ;;  %v1317_v6 = vsel %vm1036_vm2, %v1313_v4, -inf }
 0x540   : > { %1318 = vmax.xlane.f32.xlu0 %v1317_v6  ;;  %3865 = vmatprep.mubr.msk.bf16.mxu0 %vm4428_vm1, %v4427_v7 }
 0x54d   : > { %1507 = vrot.lane.b32.xlu1 %v3578_v8, %s4430_s2 }
 0x57f   : > { %v1421_v12 = vpop.f32.mrb[20].mxu0 }
 0x580   : > { %v3859_v13 = vpop.f32.mrb[21].mxu0 }
 0x581   : > { %v1424_v14 = vpop.f32.mrb[22].mxu0 }
 0x582   : > { %v1516_v15 = vpack.c.bf16 %v1424_v14, %v1421_v12  ;;  %v3860_v16 = vpop.f32.mrb[23].mxu0 }
 0x584   : > { %3894 = vmatmul.mubr.msk.bf16.gmra.mrb[20].mxu1 %vm1036_vm2, %v1516_v15 }
 0x585   : > { %3897 = vmatprep.mubr.msk.bf16.mxu1 %vm4428_vm1, %v4427_v7 }
 0x5c4   : > { %v1604_v18 = vpop.f32.mrb[16].mxu1 }
 0x5c5   : > { %v1641_v19 = vadd.f32 %v1604_v18, %v4751_v50  ;;  %v3891_v20 = vpop.f32.mrb[17].mxu1 }
 0x5c6   : > { %v1607_v21 = vpop.f32.mrb[18].mxu1 }
 0x5c7   : > { %v1642_v22 = vadd.f32 %v1607_v21, %v4754_v53  ;;  %v3892_v23 = vpop.f32.mrb[19].mxu1  ;;  %v1655_v24 = vmax.f32 %v1641_v19, 0.0 }
 0x5c9   : > { %v1656_v25 = vmax.f32 %v1642_v22, 0.0  ;;  %v1316_v26 = vpop.xlane.xlu1 %1315 }
 0x5ca   : > { %vm1320_vm0 = vcmp.eq.f32.partialorder %v1312_v62, %v1316_v26 }
 0x5cb   : > { %v1666_v27 = vpack.c.bf16 %v1656_v25, %v1655_v24  ;;  %v3566_v30 = vsel %vm1320_vm0, 1.0, %v4427_v7 }
 0x5cd   : > { %v1319_v29 = vpop.xlane.xlu0 %1318 }
 0x5ce   : > { %vm1321_vm3 = vcmp.eq.f32.partialorder %v1313_v4, %v1319_v29 }
 0x5cf   : > { %v3567_v31 = vsel %vm1321_vm3, 1.0, %v4427_v7 }
 0x5d0   : > { %v1332_v33 = vpack.c.bf16 %v3567_v31, %v3566_v30 }
 0x5d2   : > { %3866 = vmatmul.mubr.msk.bf16.gmra.mrb[28].mxu0 %vm1036_vm2, %v1332_v33 }
 0x5d3   : > { %3909 = vmatprep.mubr.msk.bf16.mxu0 %vm4428_vm1, %v4427_v7 }
 0x5da   : > { %3910 = vmatmul.mubr.msk.bf16.vlgmr.msra.gmra.mrb[32].mxu0 %vm1688_vm4, %v4758_v0 }
 0x5db   : > { %3913 = vmatprep.mubr.msk.bf16.mxu0 %vm4428_vm1, %v4427_v7 }
 0x5e2   : > { %3914 = vmatmul.mubr.msk.bf16.gmra.mrb[36].mxu0 %vm1688_vm4, %v4774_v28  ;;  %v4295_v28 = vld [vmem:[%s4502_s30] sm:$0xff]  }
 0x5e3   : > { %3917 = vmatprep.mubr.msk.bf16.mxu0 %vm4428_vm1, %v4427_v7  ;;  %3938 = vmatpush3.bf16.msra.mxu1 %v4295_v28 }
 0x5e4   : > { %3939 = vmatprep.subr.bf16.mxu1 %v4427_v7 }
 0x5e7   : > { %3940 = vmatpush3.bf16.msra.mxu1 %v4296_v38 }
 0x5e8   : > { %3983 = vmatprep.subr.bf16.mxu1 %v4427_v7 }
 0x5ea   : > { %3918 = vmatmul.mubr.msk.bf16.gmra.mrb[40].mxu0 %vm1688_vm4, %v1665_v58 }
 0x5eb   : > { %3921 = vmatprep.mubr.msk.bf16.mxu0 %vm4428_vm1, %v4427_v7 }
 0x5f2   : > { %3922 = vmatmul.mubr.msk.bf16.gmra.mrb[44].mxu0 %vm1688_vm4, %v1666_v27 }
 0x5f3   : > { %3925 = vmatprep.mubr.msk.bf16.mxu0 %vm4428_vm1, %v4427_v7 }
 0x612   : > { %v1429_v0 = vpop.f32.mrb[24].mxu0 }
 0x613   : > { %v3863_v34 = vpop.f32.mrb[25].mxu0 }
 0x614   : > { %v1432_v35 = vpop.f32.mrb[26].mxu0 }
 0x615   : > { %v1517_v36 = vpack.c.bf16 %v1432_v35, %v1429_v0  ;;  %v3864_v37 = vpop.f32.mrb[27].mxu0 }
 0x617   : > { %3898 = vmatmul.mubr.msk.bf16.gmra.mrb[24].mxu1 %vm1036_vm2, %v1517_v36 }
 0x618   : > { %3901 = vmatprep.mubr.msk.bf16.mxu1 %vm4428_vm1, %v4427_v7 }
 0x657   : > { %v1612_v40 = vpop.f32.mrb[20].mxu1 }
 0x658   : > { %v1643_v41 = vadd.f32 %v1612_v40, %v4751_v50  ;;  %v3895_v42 = vpop.f32.mrb[21].mxu1 }
 0x659   : > { %v1615_v43 = vpop.f32.mrb[22].mxu1 }
 0x65a   : > { %v1644_v45 = vadd.f32 %v1615_v43, %v4754_v53  ;;  %v3896_v46 = vpop.f32.mrb[23].mxu1  ;;  %v1657_v47 = vmax.f32 %v1643_v41, 0.0 }
 0x65c   : > { %v1658_v48 = vmax.f32 %v1644_v45, 0.0 }
 0x65e   : > { %v1667_v49 = vpack.c.bf16 %v1658_v48, %v1657_v47 }
 0x660   : > { %3926 = vmatmul.mubr.msk.bf16.gmra.mrb[48].mxu0 %vm1688_vm4, %v1667_v49 }
 0x661   : > { %3929 = vmatprep.mubr.msk.bf16.mxu0 %vm4428_vm1, %v4427_v7 }
 0x6a5   : > { %v1437_v52 = vpop.f32.mrb[28].mxu0 }
 0x6a6   : > { %v3867_v55 = vpop.f32.mrb[29].mxu0 }
 0x6a7   : > { %v1440_v56 = vpop.f32.mrb[30].mxu0 }
 0x6a8   : > { %v1518_v57 = vpack.c.bf16 %v1440_v56, %v1437_v52  ;;  %v3868_v58 = vpop.f32.mrb[31].mxu0 }
 0x6aa   : > { %3902 = vmatmul.mubr.msk.bf16.gmra.mrb[28].mxu1 %vm1036_vm2, %v1518_v57 }
 0x6ab   : > { %3941 = vmatprep.mubr.msk.bf16.mxu1 %vm4428_vm1, %v4427_v7 }
 0x6ad   : > { %v1744_v61 = vpop.f32.mrb[32].mxu0 }
 0x6ae   : > { %v1745_v62 = vadd.f32 %v4842_v60, %v1744_v61  ;;  %v3911_v63 = vpop.f32.mrb[33].mxu0 }
 0x6af   : > { %v1747_v1 = vpop.f32.mrb[34].mxu0 }
 0x6b0   : > { %v1748_v2 = vadd.f32 %v4842_v60, %v1747_v1  ;;  %v3912_v4 = vpop.f32.mrb[35].mxu0  ;;  %v1799_v6 = vmax.f32 %v1745_v62, 0.0 }
 0x6b2   : > { %v1800_v8 = vmax.f32 %v1748_v2, 0.0 }
 0x6b4   : > { %v1813_v9 = vpack.c.bf16 %v1800_v8, %v1799_v6 }
 0x6b5   : > { %v1752_v11 = vpop.f32.mrb[36].mxu0 }
 0x6b6   : > { %v1753_v12 = vadd.f32 %v4842_v60, %v1752_v11  ;;  %v3915_v13 = vpop.f32.mrb[37].mxu0  ;;  %3942 = vmatmul.mubr.msk.bf16.vlgmr.msra.gmra.mrb[32].mxu1 %vm1688_vm4, %v1813_v9 }
 0x6b7   : > { %v1755_v14 = vpop.f32.mrb[38].mxu0  ;;  %3945 = vmatprep.mubr.msk.bf16.mxu1 %vm4428_vm1, %v4427_v7 }
 0x6b8   : > { %v1756_v15 = vadd.f32 %v4842_v60, %v1755_v14  ;;  %v3916_v16 = vpop.f32.mrb[39].mxu0  ;;  %v1801_v18 = vmax.f32 %v1753_v12, 0.0 }
 0x6ba   : > { %v1802_v19 = vmax.f32 %v1756_v15, 0.0 }
 0x6bc   : > { %v1814_v20 = vpack.c.bf16 %v1802_v19, %v1801_v18 }
 0x6bd   : > { %v1760_v21 = vpop.f32.mrb[40].mxu0 }
 0x6be   : > { %v1761_v22 = vadd.f32 %v4842_v60, %v1760_v21  ;;  %v3919_v23 = vpop.f32.mrb[41].mxu0  ;;  %3946 = vmatmul.mubr.msk.bf16.gmra.mrb[36].mxu1 %vm1688_vm4, %v1814_v20  ;;  %v4880_v20 = vld [vmem:[%s5328_s6] ss:$0 sm:$0xff] }
 0x6bf   : > { %v1763_v24 = vpop.f32.mrb[42].mxu0  ;;  %3949 = vmatprep.mubr.msk.bf16.mxu1 %vm4428_vm1, %v4427_v7 }
 0x6c0   : > { %v1764_v25 = vadd.f32 %v4842_v60, %v1763_v24  ;;  %v3920_v26 = vpop.f32.mrb[43].mxu0  ;;  %v1803_v27 = vmax.f32 %v1761_v22, 0.0 }
 0x6c2   : > { %v1804_v29 = vmax.f32 %v1764_v25, 0.0 }
 0x6c4   : > { %v1815_v30 = vpack.c.bf16 %v1804_v29, %v1803_v27 }
 0x6c5   : > { %v1768_v31 = vpop.f32.mrb[44].mxu0 }
 0x6c6   : > { %v1769_v33 = vadd.f32 %v4842_v60, %v1768_v31  ;;  %v3923_v0 = vpop.f32.mrb[45].mxu0  ;;  %3950 = vmatmul.mubr.msk.bf16.gmra.mrb[40].mxu1 %vm1688_vm4, %v1815_v30 }
 0x6c7   : > { %v1771_v34 = vpop.f32.mrb[46].mxu0  ;;  %3953 = vmatprep.mubr.msk.bf16.mxu1 %vm4428_vm1, %v4427_v7 }
 0x6c8   : > { %v1772_v35 = vadd.f32 %v4842_v60, %v1771_v34  ;;  %v3924_v36 = vpop.f32.mrb[47].mxu0  ;;  %v1805_v37 = vmax.f32 %v1769_v33, 0.0 }
 0x6ca   : > { %v1806_v28 = vmax.f32 %v1772_v35, 0.0 }
 0x6cc   : > { %v1816_v38 = vpack.c.bf16 %v1806_v28, %v1805_v37 }
 0x6ce   : > { %3954 = vmatmul.mubr.msk.bf16.gmra.mrb[44].mxu1 %vm1688_vm4, %v1816_v38 }
 0x6cf   : > { %3957 = vmatprep.mubr.msk.bf16.mxu1 %vm4428_vm1, %v4427_v7 }
 0x6ea   : > { %v1620_v40 = vpop.f32.mrb[24].mxu1 }
 0x6eb   : > { %v1645_v41 = vadd.f32 %v1620_v40, %v4751_v50  ;;  %v3899_v42 = vpop.f32.mrb[25].mxu1 }
 0x6ec   : > { %v1623_v43 = vpop.f32.mrb[26].mxu1 }
 0x6ed   : > { %v1646_v45 = vadd.f32 %v1623_v43, %v4754_v53  ;;  %v3900_v46 = vpop.f32.mrb[27].mxu1  ;;  %v1659_v47 = vmax.f32 %v1645_v41, 0.0 }
 0x6ef   : > { %v1660_v48 = vmax.f32 %v1646_v45, 0.0 }
 0x6f1   : > { %v1668_v49 = vpack.c.bf16 %v1660_v48, %v1659_v47 }
 0x6f3   : > { %3930 = vmatmul.mubr.msk.bf16.gmra.mrb[52].mxu0 %vm1688_vm4, %v1668_v49 }
 0x6f4   : > { %3933 = vmatprep.mubr.msk.bf16.mxu0 %vm4428_vm1, %v4427_v7 }
 0x733   : > { %v1776_v52 = vpop.f32.mrb[48].mxu0 }
 0x734   : > { %v1777_v55 = vadd.f32 %v4842_v60, %v1776_v52  ;;  %v3927_v56 = vpop.f32.mrb[49].mxu0 }
 0x735   : > { %v1779_v57 = vpop.f32.mrb[50].mxu0 }
 0x736   : > { %v1780_v58 = vadd.f32 %v4842_v60, %v1779_v57  ;;  %v3928_v61 = vpop.f32.mrb[51].mxu0  ;;  %v1807_v62 = vmax.f32 %v1777_v55, 0.0 }
 0x738   : > { %v1808_v63 = vmax.f32 %v1780_v58, 0.0 }
 0x73a   : > { %v1817_v1 = vpack.c.bf16 %v1808_v63, %v1807_v62 }
 0x73c   : > { %3958 = vmatmul.mubr.msk.bf16.gmra.mrb[48].mxu1 %vm1688_vm4, %v1817_v1 }
 0x73d   : > { %3961 = vmatprep.mubr.msk.bf16.mxu1 %vm4428_vm1, %v4427_v7 }
 0x77d   : > { %v1628_v2 = vpop.f32.mrb[28].mxu1 }
 0x77e   : > { %v1647_v4 = vadd.f32 %v1628_v2, %v4751_v50  ;;  %v3903_v6 = vpop.f32.mrb[29].mxu1 }
 0x77f   : > { %v1631_v8 = vpop.f32.mrb[30].mxu1 }
 0x780   : > { %v1648_v9 = vadd.f32 %v1631_v8, %v4754_v53  ;;  %v3904_v11 = vpop.f32.mrb[31].mxu1  ;;  %v1661_v12 = vmax.f32 %v1647_v4, 0.0 }
 0x782   : > { %v1662_v13 = vmax.f32 %v1648_v9, 0.0 }
 0x784   : > { %v1669_v14 = vpack.c.bf16 %v1662_v13, %v1661_v12 }
 0x786   : > { %3934 = vmatmul.mubr.msk.bf16.gmra.mrb[56].mxu0 %vm1688_vm4, %v1669_v14 }
 0x789   : > { %v1893_v15 = vpop.f32.mrb[32].mxu1 }
 0x78a   : > { %v3943_v16 = vpop.f32.mrb[33].mxu1  ;;  %v1894_v21 = vadd.f32 %v4880_v20, %v1893_v15 }
 0x78b   : > { %v1896_v18 = vpop.f32.mrb[34].mxu1 }
 0x78c   : > { %v3944_v19 = vpop.f32.mrb[35].mxu1  ;;  %v1897_v50 = vadd.f32 %v4880_v20, %v1896_v18  ;;  %v1948_v25 = vmax.f32 %v1894_v21, 0.0 }
 0x78e   : > { %v1949_v30 = vmax.f32 %v1897_v50, 0.0 }
 0x791   : > { %v1901_v22 = vpop.f32.mrb[36].mxu1 }
 0x792   : > { %v1902_v23 = vadd.f32 %v4880_v20, %v1901_v22  ;;  %v3947_v53 = vpop.f32.mrb[37].mxu1 }
 0x793   : > { %v1904_v24 = vpop.f32.mrb[38].mxu1 }
 0x794   : > { %v1950_v26 = vmax.f32 %v1902_v23, 0.0  ;;  %v1905_v27 = vadd.f32 %v4880_v20, %v1904_v24  ;;  %v3948_v29 = vpop.f32.mrb[39].mxu1 }
 0x796   : > { %v1962_v31 = vadd.f32 %v1950_v26, %v1948_v25  ;;  %v1951_v33 = vmax.f32 %v1905_v27, 0.0 }
 0x798   : > { %v1963_v0 = vadd.f32 %v1951_v33, %v1949_v30 }
 0x799   : > { %v1909_v34 = vpop.f32.mrb[40].mxu1 }
 0x79a   : > { %v1910_v35 = vadd.f32 %v4880_v20, %v1909_v34  ;;  %v3951_v36 = vpop.f32.mrb[41].mxu1 }
 0x79b   : > { %v1912_v37 = vpop.f32.mrb[42].mxu1 }
 0x79c   : > { %v1952_v28 = vmax.f32 %v1910_v35, 0.0  ;;  %v1913_v38 = vadd.f32 %v4880_v20, %v1912_v37  ;;  %v3952_v40 = vpop.f32.mrb[43].mxu1 }
 0x79e   : > { %v1964_v41 = vadd.f32 %v1962_v31, %v1952_v28  ;;  %v1953_v42 = vmax.f32 %v1913_v38, 0.0 }
 0x7a0   : > { %v1965_v43 = vadd.f32 %v1963_v0, %v1953_v42 }
 0x7a1   : > { %v1917_v45 = vpop.f32.mrb[44].mxu1 }
 0x7a2   : > { %v1918_v46 = vadd.f32 %v4880_v20, %v1917_v45  ;;  %v3955_v47 = vpop.f32.mrb[45].mxu1 }
 0x7a3   : > { %v1920_v48 = vpop.f32.mrb[46].mxu1 }
 0x7a4   : > { %v1954_v49 = vmax.f32 %v1918_v46, 0.0  ;;  %v1921_v52 = vadd.f32 %v4880_v20, %v1920_v48  ;;  %v3956_v55 = vpop.f32.mrb[47].mxu1 }
 0x7a5   : > { %v1508_v55 = vpop.permute.xlu1 %1507 }
 0x7a6   : > { %v1966_v56 = vadd.f32 %v1964_v41, %v1954_v49  ;;  %v1955_v57 = vmax.f32 %v1921_v52, 0.0 }
 0x7a8   : > { %v1967_v58 = vadd.f32 %v1965_v43, %v1955_v57 }
 0x7c6   : > { %v1784_v61 = vpop.f32.mrb[52].mxu0 }
 0x7c7   : > { %v1785_v62 = vadd.f32 %v4842_v60, %v1784_v61  ;;  %v3931_v63 = vpop.f32.mrb[53].mxu0 }
 0x7c8   : > { %v1787_v1 = vpop.f32.mrb[54].mxu0 }
 0x7c9   : > { %v1788_v2 = vadd.f32 %v4842_v60, %v1787_v1  ;;  %v3932_v4 = vpop.f32.mrb[55].mxu0  ;;  %v1809_v6 = vmax.f32 %v1785_v62, 0.0 }
 0x7cb   : > { %v1810_v8 = vmax.f32 %v1788_v2, 0.0 }
 0x7cd   : > { %v1818_v9 = vpack.c.bf16 %v1810_v8, %v1809_v6 }
 0x7cf   : > { %3962 = vmatmul.mubr.msk.bf16.gmra.mrb[52].mxu1 %vm1688_vm4, %v1818_v9 }
 0x7d0   : > { %3965 = vmatprep.mubr.msk.bf16.mxu1 %vm4428_vm1, %v4427_v7 }
 0x80f   : > { %v1925_v11 = vpop.f32.mrb[48].mxu1 }
 0x810   : > { %v1926_v12 = vadd.f32 %v4880_v20, %v1925_v11  ;;  %v3959_v13 = vpop.f32.mrb[49].mxu1 }
 0x811   : > { %v1928_v14 = vpop.f32.mrb[50].mxu1 }
 0x812   : > { %v1956_v15 = vmax.f32 %v1926_v12, 0.0  ;;  %v1929_v16 = vadd.f32 %v4880_v20, %v1928_v14  ;;  %v3960_v18 = vpop.f32.mrb[51].mxu1 }
 0x814   : > { %v1968_v19 = vadd.f32 %v1966_v56, %v1956_v15  ;;  %v1957_v21 = vmax.f32 %v1929_v16, 0.0  ;;  %v1510_v56 = vadd.f32 %v1508_v55, %v4693_v39 }
 0x816   : > { %v1969_v22 = vadd.f32 %v1967_v58, %v1957_v21  ;;  %v1511_v58 = vadd.f32 %v1508_v55, %v4695_v44 }
 0x859   : > { %v1792_v50 = vpop.f32.mrb[56].mxu0 }
 0x85a   : > { %v1793_v23 = vadd.f32 %v4842_v60, %v1792_v50  ;;  %v3935_v53 = vpop.f32.mrb[57].mxu0 }
 0x85b   : > { %v1795_v24 = vpop.f32.mrb[58].mxu0 }
 0x85c   : > { %v1796_v25 = vadd.f32 %v4842_v60, %v1795_v24  ;;  %v3936_v26 = vpop.f32.mrb[59].mxu0  ;;  %v1811_v27 = vmax.f32 %v1793_v23, 0.0 }
 0x85e   : > { %v1812_v29 = vmax.f32 %v1796_v25, 0.0 }
 0x860   : > { %v1819_v30 = vpack.c.bf16 %v1812_v29, %v1811_v27 }
 0x862   : > { %3966 = vmatmul.mubr.msk.bf16.gmra.mrb[56].mxu1 %vm1688_vm4, %v1819_v30 }
 0x863   : > { %3985 = vmatprep.mubr.msk.bf16.mxu1 %vm4428_vm1, %v4427_v7 }
 0x8a2   : > { %v1933_v31 = vpop.f32.mrb[52].mxu1 }
 0x8a3   : > { %v1934_v33 = vadd.f32 %v4880_v20, %v1933_v31  ;;  %v3963_v0 = vpop.f32.mrb[53].mxu1 }
 0x8a4   : > { %v1936_v34 = vpop.f32.mrb[54].mxu1 }
 0x8a5   : > { %v1958_v35 = vmax.f32 %v1934_v33, 0.0  ;;  %v1937_v36 = vadd.f32 %v4880_v20, %v1936_v34  ;;  %v3964_v37 = vpop.f32.mrb[55].mxu1 }
 0x8a7   : > { %v1970_v28 = vadd.f32 %v1968_v19, %v1958_v35  ;;  %v1959_v60 = vmax.f32 %v1937_v36, 0.0 }
 0x8a9   : > { %v1971_v38 = vadd.f32 %v1969_v22, %v1959_v60 }
 0x935   : > { %v1941_v40 = vpop.f32.mrb[56].mxu1 }
 0x936   : > { %v1942_v41 = vadd.f32 %v4880_v20, %v1941_v40  ;;  %v3967_v42 = vpop.f32.mrb[57].mxu1 }
 0x937   : > { %v1944_v43 = vpop.f32.mrb[58].mxu1 }
 0x938   : > { %v1960_v45 = vmax.f32 %v1942_v41, 0.0  ;;  %v1945_v46 = vadd.f32 %v4880_v20, %v1944_v43  ;;  %v3968_v47 = vpop.f32.mrb[59].mxu1 }
 0x93a   : > { %v1972_v48 = vadd.f32 %v1970_v28, %v1960_v45  ;;  %v1961_v49 = vmax.f32 %v1945_v46, 0.0 }
 0x93c   : > { %v1973_v52 = vadd.f32 %v1971_v38, %v1961_v49  ;;  %1976 = vrot.lane.b32.xlu0 %v1972_v48, %s4430_s2 }
 0x93e   : > { %1978 = vrot.lane.b32.xlu1 %v1973_v52, %s4430_s2  ;;  %s5292_s2 = smov 64  }
 0x9ae   : > { %v1977_v57 = vpop.permute.xlu0 %1976 }
 0x9af   : > { %v1982_v61 = vadd.f32 %v1977_v57, %v1510_v56 }
 0x9b0   : > { %v1979_v62 = vpop.permute.xlu1 %1978 }
 0x9b1   : > { %v1984_v63 = vmax.f32 %v1982_v61, 0.0  ;;  %v1983_v1 = vadd.f32 %v1979_v62, %v1511_v58 }
 0x9b3   : > { %v4911_v20 = vmul.f32 %v1984_v63, %v4652_v10  ;;  %v1985_v2 = vmax.f32 %v1983_v1, 0.0 }
 0x9b5   : > { %v4914_v4 = vmul.f32 %v1985_v2, %v4658_v17  ;;  %2018 = vrot.lane.b32.xlu1 %v4911_v20, %s4431_s16  ;;  %v2103_v39 = vmul.f32 %v4911_v20, %v4911_v20 }
 0x9b7   : > { %2020 = vrot.lane.b32.xlu0 %v4914_v4, %s4431_s16  ;;  %v2104_v44 = vmul.f32 %v4914_v4, %v4914_v4  ;;  %v2319_v6 = vpack.c.bf16 %v4914_v4, %v4911_v20 }
 0x9b9   : > { %v4285_v8 = vpack.i.bf16 %v2104_v44, %v2103_v39 }
 0x9bb   : > { %4286 = vrot.lane.b32.xlu1 %v4285_v8, %s4431_s16 }
 0xa27   : > { %v2019_v9 = vpop.permute.xlu1 %2018 }
 0xa28   : > { %3973 = vmatprep.mubr.msk.f32.mxu0 %vm1688_vm4, %v2019_v9 }
 0xa29   : > { %v2021_v11 = vpop.permute.xlu0 %2020 }
 0xa2a   : > { %v4197_v12 = vpack.c.bf16 %v2021_v11, %v2019_v9 }
 0xa2c   : > { %4199 = vmatprep.subr.msk.bf16.mxu0 %vm4198_vm5, %v4197_v12 }
 0xa2d   : > { %4202 = vmatpush3.bf16.xpose.msk.msra.mxu0 %vm4198_vm5, %v4197_v12  ;;  %v4287_v13 = vpop.permute.xlu1 %4286 }
 0xa2e   : > { %v4289_v14 = vunpack.i.h.bf16 %v4287_v13  ;;  %v4288_v15 = vunpack.i.l.bf16 %v4287_v13  ;;  %v4297_v13 = vld [vmem:[%s5329_s22] sm:$0xff]  }
 0xa30   : > { %v4203_v16 = vpack.c.bf16 %v4289_v14, %v4288_v15 }
 0xa32   : > { %4205 = vmatprep.subr.msk.bf16.mxu0 %vm4198_vm5, %v4203_v16 }
 0xa34   : > { %3974 = vmatmul.mubr.msk.f32.vlgmr.msra.gmra.mrb[60].mxu0 %vm1688_vm4, %v2021_v11 }
 0xa35   : > { %4208 = vmatpush3.bf16.xpose.msk.msra.mxu0 %vm4198_vm5, %v4203_v16  ;;  %3980 = vmatprep.mubr.msk.f32.mxu0 %vm1688_vm4, %v4429_v32 }
 0xa36   : > { %4013 = vmatprep.subr.bf16.mxu0 %v4427_v7 }
 0xa3c   : > { %3981 = vmatmul.mubr.msk.f32.vlgmr.msra.gmra.mrb[62].mxu0 %vm1688_vm4, %v4429_v32 }
 0xa3d   : > { %4017 = vmatprep.mubr.msk.bf16.mxu0 %vm4428_vm1, %v4427_v7  ;;  %4014 = vmatpush3.bf16.msra.mxu0 %v4297_v13 }
 0xa3e   : > { %4015 = vmatprep.subr.bf16.mxu0 %v4427_v7 }
 0xb07   : > { %v3975_v18 = vpop.f32.mrb[60].mxu0 }
 0xb08   : > { %v2092_v19 = vpop.f32.mrb[61].mxu0  ;;  %v2102_v21 = vmul.f32 2.0, %v3975_v18 }
 0xb09   : > { %v2101_v22 = vmul.f32 2.0, %v2092_v19 }
 0xb0f   : > { %v3982_v50 = vpop.f32.mrb[62].mxu0 }
 0xb10   : > { %v2193_v23 = vsub.f32 %v2102_v21, %v3982_v50  ;;  %v2183_v53 = vpop.f32.mrb[63].mxu0 }
 0xb11   : > { %v2192_v24 = vsub.f32 %v2101_v22, %v2183_v53  ;;  %v4298_v53 = vld [vmem:[%s5329_s22 + $0x8] sm:$0xff]  }
 0xb12   : > { %v2195_v25 = vadd.f32 %v2193_v23, %v4699_v51  ;;  %4016 = vmatpush3.bf16.msra.mxu0 %v4298_v53 }
 0xb13   : > { %v2194_v26 = vadd.f32 %v2192_v24, %v4701_v54  ;;  %4021 = vmatprep.subr.bf16.mxu0 %v4427_v7 }
 0xb14   : > { %v2199_v27 = vand.u32 4294967280, %v2195_v25 }
 0xb15   : > { %v2198_v29 = vand.u32 4294967280, %v2194_v26 }
 0xb16   : > { %v2201_v30 = vor.u32 %v2199_v27, %v4704_v59 }
 0xb17   : > { %v2200_v32 = vor.u32 %v2198_v29, %v4704_v59 }
 0xb18   : > { %v2207_v31 = vsel %vm1036_vm2, %v2201_v30, -inf }
 0xb19   : > { %2208 = vmax.xlane.f32.xlu1 %v2207_v31  ;;  %v2204_v33 = vsel %vm1036_vm2, %v2200_v32, -inf  ;;  %v4299_v31 = vld [vmem:[%s5331_s13] sm:$0xff]  }
 0xb1a   : > { %2205 = vmax.xlane.f32.xlu0 %v2204_v33  ;;  %v4300_v33 = vld [vmem:[%s5331_s13 + $0x8] sm:$0xff]  }
 0xba6   : > { %v2209_v0 = vpop.xlane.xlu1 %2208 }
 0xba7   : > { %vm2211_vm6 = vcmp.eq.f32.partialorder %v2201_v30, %v2209_v0  ;;  %v2206_v34 = vpop.xlane.xlu0 %2205 }
 0xba8   : > { %v4945_v35 = vsel %vm2211_vm6, 1.0, %v4427_v7  ;;  %vm2210_vm7 = vcmp.eq.f32.partialorder %v2200_v32, %v2206_v34 }
 0xba9   : > { %v4948_v51 = vsel %vm2210_vm7, 1.0, %v4427_v7  ;;  %vm2217_vm8 = vcmp.gt.f32.partialorder %v4945_v35, 0.0 }
 0xbaa   : > { %vm2216_vm9 = vcmp.gt.f32.partialorder %v4948_v51, 0.0  ;;  %v2312_v54 = vpack.c.bf16 %v4945_v35, %v4948_v51  ;;  %v2219_v37 = vsel %vm2217_vm8, %v4712_v3, %v2201_v30 }
 0xbab   : > { %v2218_v59 = vsel %vm2216_vm9, %v4712_v3, %v2200_v32  ;;  %v2223_v28 = vsel %vm1036_vm2, %v2219_v37, -inf }
 0xbac   : > { %v2220_v36 = vsel %vm1036_vm2, %v2218_v59, -inf }
 0xbad   : > { %2221 = vmax.xlane.f32.xlu0 %v2220_v36 }
 0xbb1   : > { %2224 = vmax.xlane.f32.xlu0 %v2223_v28 }
 0xc3a   : > { %v2222_v60 = vpop.xlane.xlu0 %2221 }
 0xc3b   : > { %vm2226_vm10 = vcmp.eq.f32.partialorder %v2218_v59, %v2222_v60 }
 0xc3c   : > { %v4959_v38 = vsel %vm2226_vm10, 1.0, %v4427_v7 }
 0xc3d   : > { %vm2232_vm11 = vcmp.gt.f32.partialorder %v4959_v38, 0.0 }
 0xc3e   : > { %v2225_v40 = vpop.xlane.xlu0 %2224  ;;  %v2234_v41 = vsel %vm2232_vm11, %v4712_v3, %v2218_v59 }
 0xc3f   : > { %vm2227_vm12 = vcmp.eq.f32.partialorder %v2219_v37, %v2225_v40  ;;  %v2236_v42 = vsel %vm1036_vm2, %v2234_v41, -inf }
 0xc40   : > { %v4965_v43 = vsel %vm2227_vm12, 1.0, %v4427_v7  ;;  %2237 = vmax.xlane.f32.xlu1 %v2236_v42 }
 0xc41   : > { %vm2233_vm13 = vcmp.gt.f32.partialorder %v4965_v43, 0.0  ;;  %v2313_v45 = vpack.c.bf16 %v4965_v43, %v4959_v38 }
 0xc42   : > { %v2235_v46 = vsel %vm2233_vm13, %v4712_v3, %v2219_v37 }
 0xc43   : > { %v2239_v47 = vsel %vm1036_vm2, %v2235_v46, -inf }
 0xc44   : > { %2240 = vmax.xlane.f32.xlu0 %v2239_v47 }
 0xccd   : > { %v2238_v48 = vpop.xlane.xlu1 %2237 }
 0xcce   : > { %vm2242_vm14 = vcmp.eq.f32.partialorder %v2234_v41, %v2238_v48 }
 0xccf   : > { %v4973_v49 = vsel %vm2242_vm14, 1.0, %v4427_v7 }
 0xcd0   : > { %vm2248_vm15 = vcmp.gt.f32.partialorder %v4973_v49, 0.0 }
 0xcd1   : > { %v2241_v52 = vpop.xlane.xlu0 %2240  ;;  %v2250_v55 = vsel %vm2248_vm15, %v4712_v3, %v2234_v41 }
 0xcd2   : > { %vm2243_vm0 = vcmp.eq.f32.partialorder %v2235_v46, %v2241_v52  ;;  %v2252_v56 = vsel %vm1036_vm2, %v2250_v55, -inf }
 0xcd3   : > { %v4979_v57 = vsel %vm2243_vm0, 1.0, %v4427_v7  ;;  %2253 = vmax.xlane.f32.xlu1 %v2252_v56 }
 0xcd4   : > { %vm2249_vm3 = vcmp.gt.f32.partialorder %v4979_v57, 0.0  ;;  %v2314_v58 = vpack.c.bf16 %v4979_v57, %v4973_v49 }
 0xcd5   : > { %v2251_v61 = vsel %vm2249_vm3, %v4712_v3, %v2235_v46 }
 0xcd6   : > { %v2255_v62 = vsel %vm1036_vm2, %v2251_v61, -inf }
 0xcd7   : > { %2256 = vmax.xlane.f32.xlu0 %v2255_v62 }
 0xd60   : > { %v2254_v63 = vpop.xlane.xlu1 %2253 }
 0xd61   : > { %vm2258_vm5 = vcmp.eq.f32.partialorder %v2250_v55, %v2254_v63 }
 0xd62   : > { %v3621_v1 = vsel %vm2258_vm5, 1.0, %v4427_v7 }
 0xd63   : > { %vm2264_vm6 = vcmp.gt.f32.partialorder %v3621_v1, 0.0 }
 0xd64   : > { %v2257_v2 = vpop.xlane.xlu0 %2256  ;;  %v2266_v39 = vsel %vm2264_vm6, %v4712_v3, %v2250_v55 }
 0xd65   : > { %vm2259_vm7 = vcmp.eq.f32.partialorder %v2251_v61, %v2257_v2  ;;  %v2268_v44 = vsel %vm1036_vm2, %v2266_v39, -inf }
 0xd66   : > { %v3622_v8 = vsel %vm2259_vm7, 1.0, %v4427_v7  ;;  %2269 = vmax.xlane.f32.xlu1 %v2268_v44 }
 0xd67   : > { %vm2265_vm8 = vcmp.gt.f32.partialorder %v3622_v8, 0.0  ;;  %v2315_v9 = vpack.c.bf16 %v3622_v8, %v3621_v1 }
 0xd68   : > { %v2267_v11 = vsel %vm2265_vm8, %v4712_v3, %v2251_v61 }
 0xd69   : > { %v2271_v12 = vsel %vm1036_vm2, %v2267_v11, -inf }
 0xd6a   : > { %2272 = vmax.xlane.f32.xlu0 %v2271_v12 }
 0xdf3   : > { %v2270_v14 = vpop.xlane.xlu1 %2269 }
 0xdf4   : > { %vm2274_vm9 = vcmp.eq.f32.partialorder %v2266_v39, %v2270_v14 }
 0xdf5   : > { %v3623_v15 = vsel %vm2274_vm9, 1.0, %v4427_v7 }
 0xdf6   : > { %vm2280_vm10 = vcmp.gt.f32.partialorder %v3623_v15, 0.0 }
 0xdf7   : > { %v2273_v16 = vpop.xlane.xlu0 %2272  ;;  %v2282_v18 = vsel %vm2280_vm10, %v4712_v3, %v2266_v39 }
 0xdf8   : > { %vm2275_vm11 = vcmp.eq.f32.partialorder %v2267_v11, %v2273_v16  ;;  %v2284_v19 = vsel %vm1036_vm2, %v2282_v18, -inf }
 0xdf9   : > { %v3624_v21 = vsel %vm2275_vm11, 1.0, %v4427_v7  ;;  %2285 = vmax.xlane.f32.xlu1 %v2284_v19 }
 0xdfa   : > { %vm2281_vm12 = vcmp.gt.f32.partialorder %v3624_v21, 0.0  ;;  %v2316_v22 = vpack.c.bf16 %v3624_v21, %v3623_v15 }
 0xdfb   : > { %v2283_v50 = vsel %vm2281_vm12, %v4712_v3, %v2267_v11 }
 0xdfc   : > { %v2287_v23 = vsel %vm1036_vm2, %v2283_v50, -inf }
 0xdfd   : > { %2288 = vmax.xlane.f32.xlu0 %v2287_v23 }
 0xe0a   : > { %2321 = vrot.lane.b32.xlu1 %v2319_v6, %s4431_s16  ;;  %s5332_s16 = sld [smem:[#allocation16_spill]] }
 0xe10   : > { %v4301_v62 = vld [vmem:[%s5332_s16] sm:$0xff]   ;;  %v4302_v39 = vld [vmem:[%s5332_s16 + $0x8] sm:$0xff]   ;;  %v4303_v19 = vld [vmem:[%s5332_s16 + $0x10] sm:$0xff]  }
 0xe11   : > { %v4304_v21 = vld [vmem:[%s5332_s16 + $0x18] sm:$0xff]  }
 0xe86   : > { %v2286_v24 = vpop.xlane.xlu1 %2285 }
 0xe87   : > { %vm2290_vm13 = vcmp.eq.f32.partialorder %v2282_v18, %v2286_v24 }
 0xe88   : > { %v3625_v25 = vsel %vm2290_vm13, 1.0, %v4427_v7 }
 0xe89   : > { %vm2296_vm14 = vcmp.gt.f32.partialorder %v3625_v25, 0.0 }
 0xe8a   : > { %v5007_v26 = vpop.permute.xlu1 %2321  ;;  %v2289_v27 = vpop.xlane.xlu0 %2288  ;;  %v2298_v29 = vsel %vm2296_vm14, %v4712_v3, %v2282_v18 }
 0xe8b   : > { %vm2291_vm15 = vcmp.eq.f32.partialorder %v2283_v50, %v2289_v27  ;;  %3984 = vmatpush3.bf16.msra.mxu1 %v5007_v26  ;;  %4018 = vmatmul.mubr.msk.bf16.vlgmr.msra.gmra.mrb[64].mxu0 %vm1688_vm4, %v5007_v26  ;;  %v2300_v20 = vsel %vm1036_vm2, %v2298_v29, -inf }
 0xe8c   : > { %v3626_v4 = vsel %vm2291_vm15, 1.0, %v4427_v7  ;;  %2301 = vmax.xlane.f32.xlu0 %v2300_v20  ;;  %4025 = vmatprep.mubr.msk.bf16.mxu0 %vm4428_vm1, %v4427_v7 }
 0xe8d   : > { %vm2297_vm0 = vcmp.gt.f32.partialorder %v3626_v4, 0.0  ;;  %4053 = vmatprep.subr.bf16.mxu1 %v4427_v7  ;;  %v2317_v32 = vpack.c.bf16 %v3626_v4, %v3625_v25  ;;  %4022 = vmatpush3.bf16.msra.mxu0 %v4299_v31 }
 0xe8e   : > { %3986 = vmatmul.mubr.msk.bf16.vlgmr.msra.gmra.mrb[60].mxu1 %vm1036_vm2, %v2312_v54  ;;  %v2299_v6 = vsel %vm2297_vm0, %v4712_v3, %v2283_v50  ;;  %v3640_v3 = vld [vmem:[%s5330_s23] ss:$0 sm:$0xff]  ;;  %4023 = vmatprep.subr.bf16.mxu0 %v4427_v7  ;;  %s5333_s23 = sld [smem:[#allocation13_spill]] }
 0xe8f   : > { %v2303_v30 = vsel %vm1036_vm2, %v2299_v6, -inf  ;;  %3989 = vmatprep.mubr.msk.bf16.mxu1 %vm4428_vm1, %v4427_v7  ;;  %4054 = vmatpush3.bf16.msra.mxu1 %v4301_v62 }
 0xe90   : > { %2304 = vmax.xlane.f32.xlu0 %v2303_v30  ;;  %4055 = vmatprep.subr.bf16.mxu1 %v4427_v7 }
 0xe91   : > { %4024 = vmatpush3.bf16.msra.mxu0 %v4300_v33 }
 0xe92   : > { %4089 = vmatprep.subr.bf16.mxu0 %v4427_v7 }
 0xe93   : > { %4056 = vmatpush3.bf16.msra.mxu1 %v4302_v39 }
 0xe94   : > { %4057 = vmatprep.subr.bf16.mxu1 %v4427_v7  ;;  %v3639_v25 = vld [vmem:[%s5333_s23] ss:$0 sm:$0xff]  ;;  %s5334_s23 = sld [smem:[#allocation18_spill]] }
 0xe96   : > { %3990 = vmatmul.mubr.msk.bf16.gmra.mrb[64].mxu1 %vm1036_vm2, %v2313_v45 }
 0xe97   : > { %3993 = vmatprep.mubr.msk.bf16.mxu1 %vm4428_vm1, %v4427_v7  ;;  %4058 = vmatpush3.bf16.msra.mxu1 %v4303_v19 }
 0xe98   : > { %4059 = vmatprep.subr.bf16.mxu1 %v4427_v7 }
 0xe9b   : > { %4060 = vmatpush3.bf16.msra.mxu1 %v4304_v21 }
 0xe9c   : > { %4125 = vmatprep.subr.bf16.mxu1 %v4427_v7 }
 0xe9e   : > { %3994 = vmatmul.mubr.msk.bf16.gmra.mrb[68].mxu1 %vm1036_vm2, %v2314_v58 }
 0xe9f   : > { %3997 = vmatprep.mubr.msk.bf16.mxu1 %vm4428_vm1, %v4427_v7 }
 0xea6   : > { %3998 = vmatmul.mubr.msk.bf16.gmra.mrb[72].mxu1 %vm1036_vm2, %v2315_v9  ;;  %2503 = vrot.lane.b32.xlu0 %v3640_v3, %s5292_s2  ;;  %s5335_s2 = sld [smem:[#allocation17_spill]] }
 0xea7   : > { %4001 = vmatprep.mubr.msk.bf16.mxu1 %vm4428_vm1, %v4427_v7 }
 0xeae   : > { %4002 = vmatmul.mubr.msk.bf16.gmra.mrb[76].mxu1 %vm1036_vm2, %v2316_v22 }
 0xeaf   : > { %4005 = vmatprep.mubr.msk.bf16.mxu1 %vm4428_vm1, %v4427_v7 }
 0xeb6   : > { %4006 = vmatmul.mubr.msk.bf16.gmra.mrb[80].mxu1 %vm1036_vm2, %v2317_v32 }
 0xeb7   : > { %4009 = vmatprep.mubr.msk.bf16.mxu1 %vm4428_vm1, %v4427_v7 }
 0xf19   : > { %v2302_v0 = vpop.xlane.xlu0 %2301 }
 0xf1a   : > { %vm2306_vm3 = vcmp.eq.f32.partialorder %v2298_v29, %v2302_v0 }
 0xf1b   : > { %v3627_v35 = vsel %vm2306_vm3, 1.0, %v4427_v7 }
 0xf1d   : > { %v2305_v34 = vpop.xlane.xlu0 %2304 }
 0xf1e   : > { %vm2307_vm5 = vcmp.eq.f32.partialorder %v2299_v6, %v2305_v34 }
 0xf1f   : > { %v3628_v51 = vsel %vm2307_vm5, 1.0, %v4427_v7 }
 0xf20   : > { %v2318_v54 = vpack.c.bf16 %v3628_v51, %v3627_v35 }
 0xf22   : > { %4010 = vmatmul.mubr.msk.bf16.gmra.mrb[84].mxu1 %vm1036_vm2, %v2318_v54  ;;  %vm2702_vm2 = vcmask 523264  }
 0xf23   : > { %4061 = vmatprep.mubr.msk.bf16.mxu1 %vm4428_vm1, %v4427_v7 }
 0xf5e   : > { %v5058_v59 = vpop.f32.mrb[64].mxu0 }
 0xf5f   : > { %v4019_v36 = vpop.f32.mrb[65].mxu0  ;;  %v5093_v27 = vadd.f32 %v3639_v25, %v5058_v59 }
 0xf60   : > { %v5060_v37 = vpop.f32.mrb[66].mxu0 }
 0xf61   : > { %v2379_v28 = vpop.f32.mrb[60].mxu1  ;;  %v4020_v60 = vpop.f32.mrb[67].mxu0  ;;  %v5096_v20 = vadd.f32 %v3639_v25, %v5060_v37 }
 0xf62   : > { %v3987_v38 = vpop.f32.mrb[61].mxu1 }
 0xf63   : > { %v2382_v40 = vpop.f32.mrb[62].mxu1 }
 0xf64   : > { %v2508_v41 = vpack.c.bf16 %v2382_v40, %v2379_v28  ;;  %v3988_v42 = vpop.f32.mrb[63].mxu1 }
 0xf66   : > { %4026 = vmatmul.mubr.msk.bf16.vlgmr.msra.gmra.mrb[68].mxu0 %vm1688_vm4, %v2508_v41 }
 0xf67   : > { %4029 = vmatprep.mubr.msk.bf16.mxu0 %vm4428_vm1, %v4427_v7 }
 0xf69   : > { %v2387_v43 = vpop.f32.mrb[64].mxu1 }
 0xf6a   : > { %v3991_v45 = vpop.f32.mrb[65].mxu1 }
 0xf6b   : > { %v2390_v46 = vpop.f32.mrb[66].mxu1 }
 0xf6c   : > { %v2509_v47 = vpack.c.bf16 %v2390_v46, %v2387_v43  ;;  %v3992_v48 = vpop.f32.mrb[67].mxu1 }
 0xf6e   : > { %4030 = vmatmul.mubr.msk.bf16.gmra.mrb[72].mxu0 %vm1688_vm4, %v2509_v47 }
 0xf6f   : > { %4033 = vmatprep.mubr.msk.bf16.mxu0 %vm4428_vm1, %v4427_v7 }
 0xf71   : > { %v2395_v49 = vpop.f32.mrb[68].mxu1 }
 0xf72   : > { %v3995_v52 = vpop.f32.mrb[69].mxu1 }
 0xf73   : > { %v2398_v55 = vpop.f32.mrb[70].mxu1 }
 0xf74   : > { %v2510_v56 = vpack.c.bf16 %v2398_v55, %v2395_v49  ;;  %v3996_v57 = vpop.f32.mrb[71].mxu1 }
 0xf76   : > { %4034 = vmatmul.mubr.msk.bf16.gmra.mrb[76].mxu0 %vm1688_vm4, %v2510_v56 }
 0xf77   : > { %4037 = vmatprep.mubr.msk.bf16.mxu0 %vm4428_vm1, %v4427_v7 }
 0xf79   : > { %v2403_v58 = vpop.f32.mrb[72].mxu1 }
 0xf7a   : > { %v3999_v61 = vpop.f32.mrb[73].mxu1 }
 0xf7b   : > { %v2406_v63 = vpop.f32.mrb[74].mxu1 }
 0xf7c   : > { %v2511_v1 = vpack.c.bf16 %v2406_v63, %v2403_v58  ;;  %v4000_v2 = vpop.f32.mrb[75].mxu1 }
 0xf7d   : > { %v4305_v2 = vld [vmem:[%s5334_s23] sm:$0xff]  }
 0xf7e   : > { %4038 = vmatmul.mubr.msk.bf16.gmra.mrb[80].mxu0 %vm1688_vm4, %v2511_v1 }
 0xf7f   : > { %4041 = vmatprep.mubr.msk.bf16.mxu0 %vm4428_vm1, %v4427_v7  ;;  %4090 = vmatpush3.bf16.msra.mxu0 %v4305_v2 }
 0xf80   : > { %4091 = vmatprep.subr.bf16.mxu0 %v4427_v7 }
 0xf81   : > { %v2411_v44 = vpop.f32.mrb[76].mxu1 }
 0xf82   : > { %v4003_v8 = vpop.f32.mrb[77].mxu1 }
 0xf83   : > { %v2414_v9 = vpop.f32.mrb[78].mxu1 }
 0xf84   : > { %v2512_v11 = vpack.c.bf16 %v2414_v9, %v2411_v44  ;;  %v4004_v12 = vpop.f32.mrb[79].mxu1  ;;  %v4306_v44 = vld [vmem:[%s5334_s23 + $0x8] sm:$0xff]  }
 0xf85   : > { %4092 = vmatpush3.bf16.msra.mxu0 %v4306_v44 }
 0xf86   : > { %4042 = vmatmul.mubr.msk.bf16.gmra.mrb[84].mxu0 %vm1688_vm4, %v2512_v11  ;;  %4093 = vmatprep.subr.bf16.mxu0 %v4427_v7 }
 0xf87   : > { %4045 = vmatprep.mubr.msk.bf16.mxu0 %vm4428_vm1, %v4427_v7 }
 0xf89   : > { %v2419_v13 = vpop.f32.mrb[80].mxu1 }
 0xf8a   : > { %v4007_v14 = vpop.f32.mrb[81].mxu1 }
 0xf8b   : > { %v2422_v15 = vpop.f32.mrb[82].mxu1 }
 0xf8c   : > { %v2513_v16 = vpack.c.bf16 %v2422_v15, %v2419_v13  ;;  %v4008_v18 = vpop.f32.mrb[83].mxu1 }
 0xf8e   : > { %4046 = vmatmul.mubr.msk.bf16.gmra.mrb[88].mxu0 %vm1688_vm4, %v2513_v16 }
 0xf8f   : > { %4049 = vmatprep.mubr.msk.bf16.mxu0 %vm4428_vm1, %v4427_v7 }
 0xff5   : > { %v2427_v22 = vpop.f32.mrb[84].mxu1 }
 0xff6   : > { %v4011_v50 = vpop.f32.mrb[85].mxu1 }
 0xff7   : > { %v2430_v23 = vpop.f32.mrb[86].mxu1 }
 0xff8   : > { %v2514_v53 = vpack.c.bf16 %v2430_v23, %v2427_v22  ;;  %v4012_v24 = vpop.f32.mrb[87].mxu1 }
 0xffa   : > { %4050 = vmatmul.mubr.msk.bf16.gmra.mrb[92].mxu0 %vm1688_vm4, %v2514_v53 }
 0xffb   : > { %4097 = vmatprep.mubr.msk.bf16.mxu0 %vm4428_vm1, %v4427_v7 }
0x1039   : > { %v2582_v29 = vpop.f32.mrb[68].mxu0 }
0x103a   : > { %v2637_v4 = vadd.f32 %v2582_v29, %v5093_v27  ;;  %v4027_v6 = vpop.f32.mrb[69].mxu0 }
0x103b   : > { %v2585_v30 = vpop.f32.mrb[70].mxu0  ;;  %v4308_v6 = vld [vmem:[%s5334_s23 + $0x18] sm:$0xff]  }
0x103c   : > { %v2638_v3 = vadd.f32 %v2585_v30, %v5096_v20  ;;  %v4028_v32 = vpop.f32.mrb[71].mxu0  ;;  %v2651_v31 = vmax.f32 %v2637_v4, 0.0  ;;  %v4307_v4 = vld [vmem:[%s5334_s23 + $0x10] sm:$0xff]  }
0x103d   : > { %4094 = vmatpush3.bf16.msra.mxu0 %v4307_v4 }
0x103e   : > { %v2652_v33 = vmax.f32 %v2638_v3, 0.0  ;;  %4095 = vmatprep.subr.bf16.mxu0 %v4427_v7 }
0x1040   : > { %v2665_v0 = vpack.c.bf16 %v2652_v33, %v2651_v31 }
0x1041   : > { %v2590_v34 = vpop.f32.mrb[72].mxu0  ;;  %4096 = vmatpush3.bf16.msra.mxu0 %v4308_v6 }
0x1042   : > { %v2639_v35 = vadd.f32 %v2590_v34, %v5093_v27  ;;  %v4031_v51 = vpop.f32.mrb[73].mxu0  ;;  %4062 = vmatmul.mubr.msk.bf16.vlgmr.msra.gmra.mrb[88].mxu1 %vm2702_vm2, %v2665_v0  ;;  %4145 = vmatprep.subr.bf16.mxu0 %v4427_v7 }
0x1043   : > { %v2593_v54 = vpop.f32.mrb[74].mxu0  ;;  %4065 = vmatprep.mubr.msk.bf16.mxu1 %vm4428_vm1, %v4427_v7 }
0x1044   : > { %v2640_v36 = vadd.f32 %v2593_v54, %v5096_v20  ;;  %v4032_v28 = vpop.f32.mrb[75].mxu0  ;;  %v2653_v60 = vmax.f32 %v2639_v35, 0.0  ;;  %v5142_v54 = vld [vmem:[%s5335_s2] ss:$0 sm:$0xff]  ;;  %s5336_s2 = sld [smem:[#allocation19_spill]] }
0x1046   : > { %v2654_v38 = vmax.f32 %v2640_v36, 0.0 }
0x1048   : > { %v2666_v40 = vpack.c.bf16 %v2654_v38, %v2653_v60 }
0x1049   : > { %v2598_v41 = vpop.f32.mrb[76].mxu0 }
0x104a   : > { %v2641_v42 = vadd.f32 %v2598_v41, %v5093_v27  ;;  %v4035_v43 = vpop.f32.mrb[77].mxu0  ;;  %4066 = vmatmul.mubr.msk.bf16.gmra.mrb[92].mxu1 %vm2702_vm2, %v2666_v40 }
0x104b   : > { %v2601_v45 = vpop.f32.mrb[78].mxu0  ;;  %4069 = vmatprep.mubr.msk.bf16.mxu1 %vm4428_vm1, %v4427_v7 }
0x104c   : > { %v2642_v46 = vadd.f32 %v2601_v45, %v5096_v20  ;;  %v4036_v47 = vpop.f32.mrb[79].mxu0  ;;  %v2655_v48 = vmax.f32 %v2641_v42, 0.0 }
0x104e   : > { %v2656_v49 = vmax.f32 %v2642_v46, 0.0 }
0x1050   : > { %v2667_v52 = vpack.c.bf16 %v2656_v49, %v2655_v48 }
0x1051   : > { %v2606_v55 = vpop.f32.mrb[80].mxu0 }
0x1052   : > { %v2643_v56 = vadd.f32 %v2606_v55, %v5093_v27  ;;  %v4039_v57 = vpop.f32.mrb[81].mxu0  ;;  %4070 = vmatmul.mubr.msk.bf16.gmra.mrb[96].mxu1 %vm2702_vm2, %v2667_v52 }
0x1053   : > { %v2609_v58 = vpop.f32.mrb[82].mxu0  ;;  %4073 = vmatprep.mubr.msk.bf16.mxu1 %vm4428_vm1, %v4427_v7 }
0x1054   : > { %v2644_v61 = vadd.f32 %v2609_v58, %v5096_v20  ;;  %v4040_v62 = vpop.f32.mrb[83].mxu0  ;;  %v2657_v63 = vmax.f32 %v2643_v56, 0.0 }
0x1056   : > { %v2658_v1 = vmax.f32 %v2644_v61, 0.0 }
0x1058   : > { %v2668_v39 = vpack.c.bf16 %v2658_v1, %v2657_v63 }
0x1059   : > { %v2614_v8 = vpop.f32.mrb[84].mxu0 }
0x105a   : > { %v2645_v9 = vadd.f32 %v2614_v8, %v5093_v27  ;;  %v4043_v11 = vpop.f32.mrb[85].mxu0  ;;  %4074 = vmatmul.mubr.msk.bf16.gmra.mrb[100].mxu1 %vm2702_vm2, %v2668_v39 }
0x105b   : > { %v2617_v12 = vpop.f32.mrb[86].mxu0  ;;  %4077 = vmatprep.mubr.msk.bf16.mxu1 %vm4428_vm1, %v4427_v7 }
0x105c   : > { %v2646_v13 = vadd.f32 %v2617_v12, %v5096_v20  ;;  %v4044_v14 = vpop.f32.mrb[87].mxu0  ;;  %v2659_v15 = vmax.f32 %v2645_v9, 0.0 }
0x105e   : > { %v2660_v16 = vmax.f32 %v2646_v13, 0.0 }
0x1060   : > { %v2669_v18 = vpack.c.bf16 %v2660_v16, %v2659_v15 }
0x1061   : > { %v2622_v19 = vpop.f32.mrb[88].mxu0 }
0x1062   : > { %v2647_v21 = vadd.f32 %v2622_v19, %v5093_v27  ;;  %v4047_v22 = vpop.f32.mrb[89].mxu0  ;;  %4078 = vmatmul.mubr.msk.bf16.gmra.mrb[104].mxu1 %vm2702_vm2, %v2669_v18 }
0x1063   : > { %v2625_v50 = vpop.f32.mrb[90].mxu0  ;;  %4081 = vmatprep.mubr.msk.bf16.mxu1 %vm4428_vm1, %v4427_v7 }
0x1064   : > { %v2648_v23 = vadd.f32 %v2625_v50, %v5096_v20  ;;  %v4048_v53 = vpop.f32.mrb[91].mxu0  ;;  %v2661_v24 = vmax.f32 %v2647_v21, 0.0 }
0x1066   : > { %v2662_v25 = vmax.f32 %v2648_v23, 0.0 }
0x1068   : > { %v2670_v29 = vpack.c.bf16 %v2662_v25, %v2661_v24 }
0x106a   : > { %4082 = vmatmul.mubr.msk.bf16.gmra.mrb[108].mxu1 %vm2702_vm2, %v2670_v29 }
0x106b   : > { %4085 = vmatprep.mubr.msk.bf16.mxu1 %vm4428_vm1, %v4427_v7 }
0x10cd   : > { %v2630_v30 = vpop.f32.mrb[92].mxu0 }
0x10ce   : > { %v2649_v3 = vadd.f32 %v2630_v30, %v5093_v27  ;;  %v4051_v32 = vpop.f32.mrb[93].mxu0 }
0x10cf   : > { %v2633_v31 = vpop.f32.mrb[94].mxu0 }
0x10d0   : > { %v2650_v33 = vadd.f32 %v2633_v31, %v5096_v20  ;;  %v4052_v0 = vpop.f32.mrb[95].mxu0  ;;  %v2663_v34 = vmax.f32 %v2649_v3, 0.0 }
0x10d2   : > { %v2664_v35 = vmax.f32 %v2650_v33, 0.0 }
0x10d4   : > { %v2671_v51 = vpack.c.bf16 %v2664_v35, %v2663_v34 }
0x10d6   : > { %4086 = vmatmul.mubr.msk.bf16.gmra.mrb[112].mxu1 %vm2702_vm2, %v2671_v51 }
0x10d7   : > { %4133 = vmatprep.mubr.msk.bf16.mxu1 %vm4428_vm1, %v4427_v7 }
0x1115   : > { %v2758_v36 = vpop.f32.mrb[88].mxu1 }
0x1116   : > { %v2759_v28 = vadd.f32 %v5142_v54, %v2758_v36  ;;  %v4063_v60 = vpop.f32.mrb[89].mxu1 }
0x1117   : > { %v2761_v27 = vpop.f32.mrb[90].mxu1 }
0x1118   : > { %v2762_v38 = vadd.f32 %v5142_v54, %v2761_v27  ;;  %v4064_v40 = vpop.f32.mrb[91].mxu1  ;;  %v2813_v20 = vmax.f32 %v2759_v28, 0.0 }
0x111a   : > { %v2814_v41 = vmax.f32 %v2762_v38, 0.0 }
0x111c   : > { %v2827_v42 = vpack.c.bf16 %v2814_v41, %v2813_v20 }
0x111d   : > { %v2766_v43 = vpop.f32.mrb[92].mxu1 }
0x111e   : > { %v2767_v45 = vadd.f32 %v5142_v54, %v2766_v43  ;;  %v4067_v46 = vpop.f32.mrb[93].mxu1  ;;  %4098 = vmatmul.mubr.msk.bf16.vlgmr.msra.gmra.mrb[96].mxu0 %vm2702_vm2, %v2827_v42 }
0x111f   : > { %v2769_v47 = vpop.f32.mrb[94].mxu1  ;;  %4101 = vmatprep.mubr.msk.bf16.mxu0 %vm4428_vm1, %v4427_v7  ;;  %v3662_v46 = vld [vmem:[%s5336_s2] ss:$0 sm:$0xff]  ;;  %s5337_s2 = sld [smem:[#allocation21_spill]] }
0x1120   : > { %v2770_v48 = vadd.f32 %v5142_v54, %v2769_v47  ;;  %v4068_v49 = vpop.f32.mrb[95].mxu1  ;;  %v2815_v52 = vmax.f32 %v2767_v45, 0.0 }
0x1122   : > { %v2816_v55 = vmax.f32 %v2770_v48, 0.0 }
0x1124   : > { %v2828_v56 = vpack.c.bf16 %v2816_v55, %v2815_v52 }
0x1125   : > { %v2774_v57 = vpop.f32.mrb[96].mxu1 }
0x1126   : > { %v2775_v58 = vadd.f32 %v5142_v54, %v2774_v57  ;;  %v4071_v61 = vpop.f32.mrb[97].mxu1  ;;  %4102 = vmatmul.mubr.msk.bf16.gmra.mrb[100].mxu0 %vm2702_vm2, %v2828_v56 }
0x1127   : > { %v2777_v62 = vpop.f32.mrb[98].mxu1  ;;  %4105 = vmatprep.mubr.msk.bf16.mxu0 %vm4428_vm1, %v4427_v7 }
0x1128   : > { %v2778_v63 = vadd.f32 %v5142_v54, %v2777_v62  ;;  %v4072_v1 = vpop.f32.mrb[99].mxu1  ;;  %v2817_v2 = vmax.f32 %v2775_v58, 0.0 }
0x112a   : > { %v2818_v39 = vmax.f32 %v2778_v63, 0.0 }
0x112c   : > { %v2829_v44 = vpack.c.bf16 %v2818_v39, %v2817_v2 }
0x112d   : > { %v2782_v8 = vpop.f32.mrb[100].mxu1 }
0x112e   : > { %v2783_v9 = vadd.f32 %v5142_v54, %v2782_v8  ;;  %v4075_v11 = vpop.f32.mrb[101].mxu1  ;;  %4106 = vmatmul.mubr.msk.bf16.gmra.mrb[104].mxu0 %vm2702_vm2, %v2829_v44 }
0x112f   : > { %v2785_v12 = vpop.f32.mrb[102].mxu1  ;;  %4109 = vmatprep.mubr.msk.bf16.mxu0 %vm4428_vm1, %v4427_v7 }
0x1130   : > { %v2786_v13 = vadd.f32 %v5142_v54, %v2785_v12  ;;  %v4076_v14 = vpop.f32.mrb[103].mxu1  ;;  %v2819_v15 = vmax.f32 %v2783_v9, 0.0 }
0x1132   : > { %v2820_v16 = vmax.f32 %v2786_v13, 0.0 }
0x1134   : > { %v2830_v18 = vpack.c.bf16 %v2820_v16, %v2819_v15 }
0x1135   : > { %v2790_v19 = vpop.f32.mrb[104].mxu1 }
0x1136   : > { %v2791_v21 = vadd.f32 %v5142_v54, %v2790_v19  ;;  %v4079_v22 = vpop.f32.mrb[105].mxu1  ;;  %4110 = vmatmul.mubr.msk.bf16.gmra.mrb[108].mxu0 %vm2702_vm2, %v2830_v18 }
0x1137   : > { %v2793_v50 = vpop.f32.mrb[106].mxu1  ;;  %4113 = vmatprep.mubr.msk.bf16.mxu0 %vm4428_vm1, %v4427_v7 }
0x1138   : > { %v2794_v23 = vadd.f32 %v5142_v54, %v2793_v50  ;;  %v4080_v53 = vpop.f32.mrb[107].mxu1  ;;  %v2821_v24 = vmax.f32 %v2791_v21, 0.0 }
0x113a   : > { %v2822_v25 = vmax.f32 %v2794_v23, 0.0 }
0x113c   : > { %v2831_v29 = vpack.c.bf16 %v2822_v25, %v2821_v24 }
0x113d   : > { %v2798_v4 = vpop.f32.mrb[108].mxu1 }
0x113e   : > { %v2799_v6 = vadd.f32 %v5142_v54, %v2798_v4  ;;  %v4083_v30 = vpop.f32.mrb[109].mxu1  ;;  %4114 = vmatmul.mubr.msk.bf16.gmra.mrb[112].mxu0 %vm2702_vm2, %v2831_v29 }
0x113f   : > { %v2801_v3 = vpop.f32.mrb[110].mxu1  ;;  %4117 = vmatprep.mubr.msk.bf16.mxu0 %vm4428_vm1, %v4427_v7 }
0x1140   : > { %v2802_v32 = vadd.f32 %v5142_v54, %v2801_v3  ;;  %v4084_v31 = vpop.f32.mrb[111].mxu1  ;;  %v2823_v33 = vmax.f32 %v2799_v6, 0.0 }
0x1142   : > { %v2824_v0 = vmax.f32 %v2802_v32, 0.0 }
0x1144   : > { %v2832_v34 = vpack.c.bf16 %v2824_v0, %v2823_v33 }
0x1146   : > { %4118 = vmatmul.mubr.msk.bf16.gmra.mrb[116].mxu0 %vm2702_vm2, %v2832_v34 }
0x1147   : > { %4121 = vmatprep.mubr.msk.bf16.mxu0 %vm4428_vm1, %v4427_v7 }
0x11a9   : > { %v2806_v35 = vpop.f32.mrb[112].mxu1 }
0x11aa   : > { %v2807_v51 = vadd.f32 %v5142_v54, %v2806_v35  ;;  %v4087_v36 = vpop.f32.mrb[113].mxu1 }
0x11ab   : > { %v2809_v28 = vpop.f32.mrb[114].mxu1 }
0x11ac   : > { %v2810_v60 = vadd.f32 %v5142_v54, %v2809_v28  ;;  %v4088_v27 = vpop.f32.mrb[115].mxu1  ;;  %v2825_v38 = vmax.f32 %v2807_v51, 0.0 }
0x11ae   : > { %v2826_v40 = vmax.f32 %v2810_v60, 0.0 }
0x11b0   : > { %v2833_v20 = vpack.c.bf16 %v2826_v40, %v2825_v38 }
0x11b2   : > { %4122 = vmatmul.mubr.msk.bf16.gmra.mrb[120].mxu0 %vm2702_vm2, %v2833_v20 }
0x11b3   : > { %4161 = vmatprep.mubr.msk.bf16.mxu0 %vm4428_vm1, %v4427_v7 }
0x11f1   : > { %v2919_v41 = vpop.f32.mrb[96].mxu0 }
0x11f2   : > { %v4099_v42 = vpop.f32.mrb[97].mxu0  ;;  %v2920_v47 = vadd.f32 %v3662_v46, %v2919_v41 }
0x11f3   : > { %v2922_v43 = vpop.f32.mrb[98].mxu0 }
0x11f4   : > { %v4100_v45 = vpop.f32.mrb[99].mxu0  ;;  %v2923_v49 = vadd.f32 %v3662_v46, %v2922_v43  ;;  %v2974_v56 = vmax.f32 %v2920_v47, 0.0 }
0x11f6   : > { %v2975_v62 = vmax.f32 %v2923_v49, 0.0 }
0x11f9   : > { %v2927_v48 = vpop.f32.mrb[100].mxu0 }
0x11fa   : > { %v2928_v52 = vadd.f32 %v3662_v46, %v2927_v48  ;;  %v4103_v55 = vpop.f32.mrb[101].mxu0 }
0x11fb   : > { %v2930_v54 = vpop.f32.mrb[102].mxu0 }
0x11fc   : > { %v2976_v57 = vmax.f32 %v2928_v52, 0.0  ;;  %v2931_v58 = vadd.f32 %v3662_v46, %v2930_v54  ;;  %v4104_v61 = vpop.f32.mrb[103].mxu0 }
0x11fd   : > { %v4310_v61 = vld [vmem:[%s5337_s2 + $0x8] sm:$0xff]  }
0x11fe   : > { %v2988_v63 = vadd.f32 %v2976_v57, %v2974_v56  ;;  %v2977_v1 = vmax.f32 %v2931_v58, 0.0  ;;  %v4309_v57 = vld [vmem:[%s5337_s2] sm:$0xff]  }
0x11ff   : > { %4126 = vmatpush3.bf16.msra.mxu1 %v4309_v57 }
0x1200   : > { %v2989_v2 = vadd.f32 %v2977_v1, %v2975_v62  ;;  %4127 = vmatprep.subr.bf16.mxu1 %v4427_v7  ;;  %v4311_v62 = vld [vmem:[%s5337_s2 + $0x10] sm:$0xff]   ;;  %v2504_v1 = vpop.permute.xlu0 %2503 }
0x1201   : > { %v2935_v39 = vpop.f32.mrb[104].mxu0 }
0x1202   : > { %v2936_v44 = vadd.f32 %v3662_v46, %v2935_v39  ;;  %v4107_v8 = vpop.f32.mrb[105].mxu0 }
0x1203   : > { %v2938_v9 = vpop.f32.mrb[106].mxu0  ;;  %4128 = vmatpush3.bf16.msra.mxu1 %v4310_v61 }
0x1204   : > { %v2978_v11 = vmax.f32 %v2936_v44, 0.0  ;;  %v2939_v12 = vadd.f32 %v3662_v46, %v2938_v9  ;;  %v4108_v13 = vpop.f32.mrb[107].mxu0  ;;  %4129 = vmatprep.subr.bf16.mxu1 %v4427_v7  ;;  %v2507_v9 = vadd.f32 %v2504_v1, %v5060_v37  ;;  %v4313_v37 = vld [vmem:[%s5339_s5] sm:$0xff]  }
0x1206   : > { %v2990_v14 = vadd.f32 %v2988_v63, %v2978_v11  ;;  %v2979_v15 = vmax.f32 %v2939_v12, 0.0  ;;  %v4312_v63 = vld [vmem:[%s5337_s2 + $0x18] sm:$0xff]   ;;  %s5340_s2 = sld [smem:[#allocation23_spill]] }
0x1207   : > { %4130 = vmatpush3.bf16.msra.mxu1 %v4311_v62 }
0x1208   : > { %v2991_v16 = vadd.f32 %v2989_v2, %v2979_v15  ;;  %4131 = vmatprep.subr.bf16.mxu1 %v4427_v7  ;;  %v2506_v2 = vadd.f32 %v2504_v1, %v5058_v59 }
0x1209   : > { %v2943_v18 = vpop.f32.mrb[108].mxu0 }
0x120a   : > { %v2944_v19 = vadd.f32 %v3662_v46, %v2943_v18  ;;  %v4111_v21 = vpop.f32.mrb[109].mxu0 }
0x120b   : > { %v2946_v22 = vpop.f32.mrb[110].mxu0  ;;  %4132 = vmatpush3.bf16.msra.mxu1 %v4312_v63 }
0x120c   : > { %v2980_v50 = vmax.f32 %v2944_v19, 0.0  ;;  %v2947_v23 = vadd.f32 %v3662_v46, %v2946_v22  ;;  %v4112_v53 = vpop.f32.mrb[111].mxu0  ;;  %4137 = vmatprep.subr.bf16.mxu1 %v4427_v7 }
0x120d   : > { %v4315_v53 = vld [vmem:[%s5340_s2] sm:$0xff]  }
0x120e   : > { %v2992_v24 = vadd.f32 %v2990_v14, %v2980_v50  ;;  %v2981_v25 = vmax.f32 %v2947_v23, 0.0  ;;  %v4314_v23 = vld [vmem:[%s5339_s5 + $0x8] sm:$0xff]   ;;  %4146 = vmatpush3.bf16.msra.mxu0 %v4315_v53 }
0x120f   : > { %4147 = vmatprep.subr.bf16.mxu0 %v4427_v7 }
0x1210   : > { %v2993_v29 = vadd.f32 %v2991_v16, %v2981_v25  ;;  %v4317_v25 = vld [vmem:[%s5340_s2 + $0x10] sm:$0xff]  }
0x1211   : > { %v2951_v4 = vpop.f32.mrb[112].mxu0 }
0x1212   : > { %v2952_v6 = vadd.f32 %v3662_v46, %v2951_v4  ;;  %v4115_v30 = vpop.f32.mrb[113].mxu0  ;;  %v4320_v4 = vld [vmem:[%s5340_s2 + $0x28] sm:$0xff]  }
0x1213   : > { %v2954_v3 = vpop.f32.mrb[114].mxu0  ;;  %v4322_v30 = vld [vmem:[%s5340_s2 + $0x38] sm:$0xff]  }
0x1214   : > { %v2982_v32 = vmax.f32 %v2952_v6, 0.0  ;;  %v2955_v31 = vadd.f32 %v3662_v46, %v2954_v3  ;;  %v4116_v33 = vpop.f32.mrb[115].mxu0  ;;  %v4321_v6 = vld [vmem:[%s5340_s2 + $0x30] sm:$0xff]   ;;  %v4323_v3 = vld [vmem:[%s4577_s20] sm:$0xff]  }
0x1215   : > { %v4326_v33 = vld [vmem:[%s4577_s20 + $0x18] sm:$0xff]  }
0x1216   : > { %v2994_v0 = vadd.f32 %v2992_v24, %v2982_v32  ;;  %v2983_v34 = vmax.f32 %v2955_v31, 0.0  ;;  %v4316_v24 = vld [vmem:[%s5340_s2 + $0x8] sm:$0xff]   ;;  %v4325_v31 = vld [vmem:[%s4577_s20 + $0x10] sm:$0xff]  }
0x1217   : > { %4148 = vmatpush3.bf16.msra.mxu0 %v4316_v24  ;;  %v4324_v32 = vld [vmem:[%s4577_s20 + $0x8] sm:$0xff]  }
0x1218   : > { %v2995_v35 = vadd.f32 %v2993_v29, %v2983_v34  ;;  %4149 = vmatprep.subr.bf16.mxu0 %v4427_v7  ;;  %v4319_v29 = vld [vmem:[%s5340_s2 + $0x20] sm:$0xff]   ;;  %v4328_v34 = vld [vmem:[%s4577_s20 + $0x28] sm:$0xff]  }
0x1219   : > { %v2959_v51 = vpop.f32.mrb[116].mxu0 }
0x121a   : > { %v2960_v36 = vadd.f32 %v3662_v46, %v2959_v51  ;;  %v4119_v28 = vpop.f32.mrb[117].mxu0 }
0x121b   : > { %v2962_v60 = vpop.f32.mrb[118].mxu0  ;;  %4150 = vmatpush3.bf16.msra.mxu0 %v4317_v25 }
0x121c   : > { %v2984_v27 = vmax.f32 %v2960_v36, 0.0  ;;  %v2963_v38 = vadd.f32 %v3662_v46, %v2962_v60  ;;  %v4120_v40 = vpop.f32.mrb[119].mxu0  ;;  %4151 = vmatprep.subr.bf16.mxu0 %v4427_v7 }
0x121e   : > { %v2996_v20 = vadd.f32 %v2994_v0, %v2984_v27  ;;  %v2985_v41 = vmax.f32 %v2963_v38, 0.0  ;;  %v4327_v0 = vld [vmem:[%s4577_s20 + $0x20] sm:$0xff]  }
0x1220   : > { %v2997_v42 = vadd.f32 %v2995_v35, %v2985_v41 }
0x1285   : > { %v2967_v43 = vpop.f32.mrb[120].mxu0 }
0x1286   : > { %v2968_v45 = vadd.f32 %v3662_v46, %v2967_v43  ;;  %v4123_v47 = vpop.f32.mrb[121].mxu0 }
0x1287   : > { %v2970_v48 = vpop.f32.mrb[122].mxu0 }
0x1288   : > { %v2986_v49 = vmax.f32 %v2968_v45, 0.0  ;;  %v2971_v52 = vadd.f32 %v3662_v46, %v2970_v48  ;;  %v4124_v55 = vpop.f32.mrb[123].mxu0  ;;  %v3168_v46 = vrot.slane %v4643_v5, 4 }
0x128a   : > { %v2998_v54 = vadd.f32 %v2996_v20, %v2986_v49  ;;  %v2987_v56 = vmax.f32 %v2971_v52, 0.0  ;;  %v3169_v39 = vadd.f32 %v3168_v46, %v4643_v5 }
0x128c   : > { %v2999_v58 = vadd.f32 %v2997_v42, %v2987_v56  ;;  %3002 = vrot.lane.b32.xlu1 %v2998_v54, %s5338_s3  ;;  %v3170_v11 = vrot.slane %v3169_v39, 2 }
0x128e   : > { %v3171_v16 = vadd.f32 %v3170_v11, %v3169_v39  ;;  %v3206_v39 = vld [vmem:[%s5342_s12] sm:$0x1] }
0x1290   : > { %3004 = vrot.lane.b32.xlu1 %v2999_v58, %s5338_s3  ;;  %v3172_v21 = vrot.slane %v3171_v16, 1 }
0x1292   : > { %v3173_v5 = vadd.f32 %v3172_v21, %v3171_v16 }
0x1294   : > { %v3174_v22 = vmax.f32 %v3173_v5, 1.0 }
0x12fe   : > { %v3003_v44 = vpop.permute.xlu1 %3002 }
0x12ff   : > { %v3008_v8 = vadd.f32 %v3003_v44, %v2506_v2 }
0x1301   : > { %v3010_v13 = vmax.f32 %v3008_v8, 0.0 }
0x1302   : > { %v3005_v12 = vpop.permute.xlu1 %3004 }
0x1303   : > { %v3009_v14 = vadd.f32 %v3005_v12, %v2507_v9  ;;  %v3012_v18 = vmul.f32 %v3010_v13, %v4652_v10 }
0x1305   : > { %v3011_v15 = vmax.f32 %v3009_v14, 0.0 }
0x1307   : > { %v3013_v19 = vmul.f32 %v3011_v15, %v4658_v17  ;;  %v3313_v15 = vld [vmem:[%s4582_s27] sm:$0x1] }
0x1309   : > { %v3018_v59 = vpack.c.bf16 %v3013_v19, %v3012_v18 }
0x130b   : > { %3028 = vrot.lane.b32.xlu1 %v3018_v59, %s5338_s3  ;;  %s5341_s3 = sld [smem:[#allocation22_spill]] }
0x130f   : > { %3184 = vperm.xlu1 %4290, %v3174_v22  }
0x1311   : > { %v3682_v27 = vld [vmem:[%s5341_s3] ss:$0 sm:$0xff]  ;;  %s934_s3 = sand.u32 1, %s4387_s10  }
0x1312   : > { %s935_s5 = scalar_lea.vmem [#allocation2], %s934_s3  ;;  %s3405_s9 = scalar_lea.sflag [#allocation3], %s934_s3 }
0x1313   : > { %s3417_s6 = sshll.u32 %s935_s5, 4  ;;  %s5248_s6 = int_to_ptr.vmem [resolvable:$true] %s3417_s6 }
0x1314   : > { %s4333_s12 = scalar_lea.vmem %s5248_s6, 16 }
0x1315   : > { %p4334_p11 = scmp.ne.s32.totalorder %s5248_s6, %s4333_s12 }
0x1317   : > { %p4335_p12 = pnand %p4334_p11, %p4627_p5 }
0x1319   : > { %p4336_p13 = pneg %p4335_p12 }
0x137d   : > { %v3029_v50 = vpop.permute.xlu1 %3028 }
0x137e   : > { %4134 = vmatmul.mubr.msk.bf16.vlgmr.msra.gmra.mrb[116].mxu1 %vm2702_vm2, %v3029_v50 }
0x137f   : > { %4138 = vmatpush3.bf16.msra.mxu1 %v4313_v37  ;;  %4141 = vmatprep.mubr.msk.bf16.mxu1 %vm4428_vm1, %v4427_v7 }
0x1380   : > { %4139 = vmatprep.subr.bf16.mxu1 %v4427_v7 }
0x1383   : > { %4140 = vmatpush3.bf16.msra.mxu1 %v4314_v23 }
0x1384   : > { %4165 = vmatprep.subr.bf16.mxu1 %v4427_v7 }
0x1386   : > { %4142 = vmatmul.mubr.msk.bf16.vlgmr.msra.gmra.mrb[120].mxu1 %vm1688_vm4, %v5007_v26  ;;  %v4318_v26 = vld [vmem:[%s5340_s2 + $0x18] sm:$0xff]   ;;  %s3699_s2 = sshll.u32 %s4610_s0, 4  ;;  %s4433_s0 = smov [#allocation2]  }
0x1387   : > { %4181 = vmatprep.mubr.msk.bf16.mxu1 %vm4428_vm1, %v4427_v7  ;;  %4152 = vmatpush3.bf16.msra.mxu0 %v4318_v26  ;;  %vm3402_vm1 = vcmask 32768   ;;  %s5246_s8 = scalar_lea.hbm %s4587_s4, %s3699_s2  ;;  %s4337_s13 = sshll.u32 %s4433_s0, 4  ;;  %s4338_s13 = int_to_ptr.vmem [resolvable:$false] %s4337_s13 }
0x1388   : > { %4153 = vmatprep.subr.bf16.mxu0 %v4427_v7  ;;  %4166 = vmatpush3.bf16.msra.mxu1 %v4323_v3  ;;  %s4339_s14 = scalar_lea.vmem %s4338_s13, 32  ;;  %p4340_p0 = scmp.lt.s32.totalorder %s5248_s6, %s4338_s13 }
0x1389   : > { %4167 = vmatprep.subr.bf16.mxu1 %v4427_v7  ;;  %p4341_p1 = scmp.lt.s32.totalorder %s4339_s14, %s4333_s12 }
0x138b   : > { %4154 = vmatpush3.bf16.msra.mxu0 %v4319_v29  ;;  %p4342_p2 = por %p4341_p1, %p4340_p0 }
0x138c   : > { %4155 = vmatprep.subr.bf16.mxu0 %v4427_v7  ;;  %4168 = vmatpush3.bf16.msra.mxu1 %v4324_v32 }
0x138d   : > { %4169 = vmatprep.subr.bf16.mxu1 %v4427_v7  ;;  %p4343_p3 = pnand %p4342_p2, %p4336_p13 }
0x138e   : > { %v3185_v55 = vpop.permute.xlu1 %3184 }
0x138f   : > { %4156 = vmatpush3.bf16.msra.mxu0 %v4320_v4  ;;  %4331 = vrcp.f32 %v3185_v55 }
0x1390   : > { %4157 = vmatprep.subr.bf16.mxu0 %v4427_v7  ;;  %4170 = vmatpush3.bf16.msra.mxu1 %v4325_v31 }
0x1391   : > { %4171 = vmatprep.subr.bf16.mxu1 %v4427_v7 }
0x1393   : > { %4158 = vmatpush3.bf16.msra.mxu0 %v4321_v6 }
0x1394   : > { %4159 = vmatprep.subr.bf16.mxu0 %v4427_v7  ;;  %4172 = vmatpush3.bf16.msra.mxu1 %v4326_v33 }
0x1395   : > { %4173 = vmatprep.subr.bf16.mxu1 %v4427_v7 }
0x1397   : > { %4160 = vmatpush3.bf16.msra.mxu0 %v4322_v30 }
0x1398   : > { %4174 = vmatpush3.bf16.msra.mxu1 %v4327_v0 }
0x1399   : > { %4175 = vmatprep.subr.bf16.mxu1 %v4427_v7  ;;  %v4332_v63 = vpop.eup %4331 }
0x139c   : > { %4176 = vmatpush3.bf16.msra.mxu1 %v4328_v34 }
0x139d   : > { %4177 = vmatprep.subr.bf16.mxu1 %v4427_v7 }
0x1451   : > { %v3091_v35 = vpop.f32.mrb[116].mxu1 }
0x1452   : > { %v4135_v51 = vpop.f32.mrb[117].mxu1 }
0x1453   : > { %v3094_v36 = vpop.f32.mrb[118].mxu1 }
0x1454   : > { %v4136_v28 = vpop.f32.mrb[119].mxu1 }
0x1459   : > { %v3144_v60 = vpop.f32.mrb[120].mxu1 }
0x145a   : > { %v3145_v38 = vadd.f32 %v3144_v60, %v3091_v35  ;;  %v4143_v40 = vpop.f32.mrb[121].mxu1 }
0x145b   : > { %v3147_v20 = vpop.f32.mrb[122].mxu1 }
0x145c   : > { %v3158_v41 = vadd.f32 %v3682_v27, %v3145_v38  ;;  %v3148_v42 = vadd.f32 %v3147_v20, %v3094_v36  ;;  %v4144_v43 = vpop.f32.mrb[123].mxu1 }
0x145e   : > { %v3160_v45 = vmax.f32 %v3158_v41, 0.0  ;;  %v3159_v47 = vadd.f32 %v3682_v27, %v3148_v42 }
0x1460   : > { %v3161_v48 = vmax.f32 %v3159_v47, 0.0  ;;  %v3162_v49 = vmul.f32 %v3160_v45, %v4652_v10  ;;  %v4329_v10 = vld [vmem:[%s4577_s20 + $0x30] sm:$0xff]  }
0x1461   : > { %4178 = vmatpush3.bf16.msra.mxu1 %v4329_v10 }
0x1462   : > { %v3163_v52 = vmul.f32 %v3161_v48, %v4658_v17  ;;  %4179 = vmatprep.subr.bf16.mxu1 %v4427_v7  ;;  %v4330_v17 = vld [vmem:[%s4577_s20 + $0x38] sm:$0xff]  }
0x1464   : > { %v3175_v54 = vadd.f32 %v3163_v52, %v3162_v49 }
0x1465   : > { %4180 = vmatpush3.bf16.msra.mxu1 %v4330_v17 }
0x1466   : > { %v3176_v56 = vrot.slane %v3175_v54, 4 }
0x1468   : > { %v3177_v57 = vadd.f32 %v3176_v56, %v3175_v54 }
0x146a   : > { %v3178_v58 = vrot.slane %v3177_v57, 2 }
0x146c   : > { %v3179_v61 = vadd.f32 %v3178_v58, %v3177_v57 }
0x146e   : > { %v3180_v62 = vrot.slane %v3179_v61, 1 }
0x1470   : > { %v3181_v46 = vadd.f32 %v3180_v62, %v3179_v61 }
0x1472   : > { %v3188_v1 = vmul.f32 %v4332_v63, %v3181_v46 }
0x1474   : > { %v3189_v2 = vpack.c.bf16 %v3188_v1, %v3188_v1 }
0x1476   : > { %4162 = vmatmul.mubr.bf16.vlgmr.msra.gmra.mrb[124].mxu0 %v3189_v2 }
0x1549   : > { %v3289_v44 = vpop.f32.mrb[124].mxu0 }
0x154a   : > { %v3290_v8 = vadd.f32 %v3289_v44, %v3206_v39  ;;  %v4163_v9 = vpop.f32.mrb[125].mxu0 }
0x154b   : > { %v3292_v11 = vpop.f32.mrb[126].mxu0 }
0x154c   : > { %v3295_v12 = vmax.f32 %v3290_v8, 0.0  ;;  %v4164_v13 = vpop.f32.mrb[127].mxu0 }
0x154e   : > { %v3296_v14 = vpack.c.bf16 %v3295_v12, %v3295_v12 }
0x1550   : > { %4182 = vmatmul.mubr.bf16.vlgmr.msra.gmra.mrb[124].mxu1 %v3296_v14 }
0x1623   : > { %v3396_v16 = vpop.f32.mrb[124].mxu1 }
0x1624   : > { %v3397_v7 = vadd.f32 %v3396_v16, %v3313_v15  ;;  %v4183_v18 = vpop.f32.mrb[125].mxu1 }
0x1625   : > { %v3399_v19 = vpop.f32.mrb[126].mxu1 }
0x1626   : > { %v4184_v21 = vpop.f32.mrb[127].mxu1  ;;  %3403 = vst.msk [vmem:[%s935_s5] sm:$0x1] %vm3402_vm1, %v3397_v7 }
0x1627   : > { %4346 = shalt.err (!%p4343_p3)
}
0x1628   : > { %s4347_s5 = scalar_lea.hbm %s5246_s8, 16  ;;  %s4351_s2 = scalar_lea.hbm %s4587_s4, 32 }
0x1629   : > { %p4348_p4 = scmp.ne.s32.totalorder %s5246_s8, %s4347_s5  ;;  %p4352_p9 = scmp.lt.u32.totalorder %s5246_s8, %s4587_s4 }
0x162a   : > { %p4353_p10 = scmp.lt.u32.totalorder %s4351_s2, %s4347_s5  ;;  %p4355_p12 = scmp.lt.u32.totalorder %s4347_s5, %s5246_s8 }
0x162b   : > { %p4349_p7 = pnand %p4348_p4, %p4627_p5 }
0x162c   : > { %p4354_p11 = por %p4353_p10, %p4352_p9 }
0x162d   : > { %p4350_p8 = pneg %p4349_p7 }
0x162e   : > { %p4356_p0 = por %p4355_p12, %p4354_p11 }
0x1630   : > { %p4357_p13 = pnand %p4356_p0, %p4350_p8 }
0x1632   : > { %4360 = shalt.err (!%p4357_p13)
}
0x1633   : > { %4209 = dma.vmem_to_hbm [thread:$0]  (%p4627_p5), %s5248_s6, 16, %s5246_s8, %s3405_s9  }
0x1634 PF: > { %p4215_p1 = scmp.ge.s32.totalorder %s4395_s15, 2  ;;  %s3429_s14 = sand.u32 1, %s4383_s7  }
0x1635   : > { %s3430_s12 = scalar_lea.sflag [#allocation3], %s3429_s14 }
0x1636   : > { %p4212_p2 = pnand %p4215_p1, %p4631_p6 }
0x1638   : > { %4378 = dma.done.wait (!%p4212_p2), %s3430_s12, 16  }
0x1639   : > { %4380 = vsyncadd (!%p4212_p2), %s3430_s12, 4294967280  ;;  %p69_p3 = scmp.ge.s32.totalorder %s4614_s18, 4   ;;  %s5343_s7 = smov %s4387_s10 }
0x163a   : > { %s5344_s10 = smov %s4391_s11  ;;  %s5345_s11 = smov %s4625_s26 }
0x163b   : > { %s5346_s15 = smov %s4614_s18  ;;  %71 = sbr.rel (!%p69_p3) target bundleno = 61 (0x3d), region = 209 }
0x1642   :  { %3434 = vsyncpa [#allocation3], 1 }
0x1643   :  { %3436 = vsyncpa [#allocation3 + $0x1], 1 }

</bundles_post_ra>
